<compile_context>
chip_gen: v7x
topology: tpu7x:2x2x1
jax: 0.10.0
libtpu: 0.0.40
codegen_flags: <defaults>
</compile_context>

<pallas_src>
import functools

import jax
import jax.numpy as jnp
from jax.experimental import pallas as pl
from jax.experimental.pallas import tpu as pltpu

# ----------------------------- model config (small) -----------------------------
NUM_CLASSES = 8      # num_classes
HIGH_CH     = 32     # high_level_ch (HRNetV2 concat width, scaled down)
MID_CH      = 64     # OCR_block.MID_CHANNELS (scaled down from 512)
KEY_CH      = 32     # OCR_block.KEY_CHANNELS (scaled down from 256)
STEM_CH     = 16     # backbone stub stem width

TM = 512                               # row tile for the matmul-style kernels
VMEM_LIMIT = 32 * 1024 * 1024          # explicit scoped-VMEM budget (fits v5e..v7x)


def _cp(*sems):
    return pltpu.CompilerParams(dimension_semantics=tuple(sems),
                                vmem_limit_bytes=VMEM_LIMIT)


def _round_up(v, m):
    return ((v + m - 1) // m) * m


def _apply_act(x, act):
    if act == "relu":
        return jnp.maximum(x, 0.0)
    return x


# ======================= fused 1x1-conv chain (matmul) kernel ====================
def _mm2_kernel(a_ref, w0_ref, b0_ref, w1_ref, b1_ref, o_ref, *, act0, act1):
    h = jnp.dot(a_ref[...], w0_ref[...], preferred_element_type=jnp.float32)
    h = _apply_act(h + b0_ref[...], act0)
    h = jnp.dot(h.astype(jnp.bfloat16), w1_ref[...],
                preferred_element_type=jnp.float32)
    o_ref[...] = _apply_act(h + b1_ref[...], act1).astype(o_ref.dtype)


def matmul2_bias_act(a, w0, b0, act0, w1, b1, act1, out_dtype=jnp.bfloat16):
    """Fused chain act1(act0(a@w0+b0)@w1+b1); bf16 operands, f32 accumulation."""
    M, K = a.shape
    Kh = w0.shape[1]
    N = w1.shape[1]
    tm = min(TM, M)
    return pl.pallas_call(
        functools.partial(_mm2_kernel, act0=act0, act1=act1),
        out_shape=jax.ShapeDtypeStruct((M, N), out_dtype),
        grid=(pl.cdiv(M, tm),),
        in_specs=[
            pl.BlockSpec((tm, K), lambda i: (i, 0)),
            pl.BlockSpec((K, Kh), lambda i: (0, 0)),
            pl.BlockSpec((1, Kh), lambda i: (0, 0)),
            pl.BlockSpec((Kh, N), lambda i: (0, 0)),
            pl.BlockSpec((1, N), lambda i: (0, 0)),
        ],
        out_specs=pl.BlockSpec((tm, N), lambda i: (i, 0)),
        compiler_params=_cp("parallel"),
    )(a, w0, b0.reshape(1, Kh), w1, b1.reshape(1, N))


# ====================== fused conv kernel (no HBM im2col) =======================
def _taps_mm_kernel(x_ref, w_ref, b_ref, o_ref, *, starts, cin, act):
    """acc = sum_t x[start_t : start_t+P, :] @ w[t*cin:(t+1)*cin, :]  (f32 acc)."""
    P = o_ref.shape[0]
    acc = None
    for t, s in enumerate(starts):
        d = jnp.dot(x_ref[s:s + P, :], w_ref[t * cin:(t + 1) * cin, :],
                    preferred_element_type=jnp.float32)
        acc = d if acc is None else acc + d
    o_ref[...] = _apply_act(acc + b_ref[...], act).astype(o_ref.dtype)


def _taps_conv(xflat, w, b, starts, cin, p_out, act, out_dtype):
    B, p_big, _ = xflat.shape
    cout = w.shape[1]
    return pl.pallas_call(
        functools.partial(_taps_mm_kernel, starts=starts, cin=cin, act=act),
        out_shape=jax.ShapeDtypeStruct((B, p_out, cout), out_dtype),
        grid=(B,),
        in_specs=[
            pl.BlockSpec((None, p_big, cin), lambda bi: (bi, 0, 0)),
            pl.BlockSpec((w.shape[0], cout), lambda bi: (0, 0)),
            pl.BlockSpec((1, cout), lambda bi: (0, 0)),
        ],
        out_specs=pl.BlockSpec((None, p_out, cout), lambda bi: (bi, 0, 0)),
        compiler_params=_cp("parallel"),
    )(xflat, w, b.reshape(1, cout))


def conv3x3_s1(x_nhwc, w9, b, act="relu", out_dtype=jnp.bfloat16):
    """3x3 conv, stride 1, pad 1: 9-tap in-kernel accumulation over a flattened,
    padded input whose row stride is sublane-aligned (multiple of 8)."""
    B, H, W, C = x_nhwc.shape
    Wp = _round_up(W + 2, 8)                       # aligned row stride (>= W+2)
    big = jnp.pad(x_nhwc, ((0, 0), (2, 2), (1, Wp - W - 1), (0, 0)))
    big = big.reshape(B, (H + 4) * Wp, C)
    starts = tuple((dh + 1) * Wp + dw - 1 for dh in range(3) for dw in range(3))
    out = _taps_conv(big, w9, b, starts, C, H * Wp, act, out_dtype)
    # TODO(synk): at production resolutions, row-tile this kernel and write the cropped
    #             rows directly via the output BlockSpec instead of the XLA slice below.
    return out.reshape(B, H, Wp, -1)[:, :, 1:W + 1, :]


def _w_space_to_depth(w9, C):
    """Rearrange (9*C, Cout) 3x3 weights into (4*4C, Cout) 2x2 weights over the
    space-to-depth input: taps (bi,bj) with (sr,sc,c)-ordered channel groups."""
    cout = w9.shape[1]
    w = w9.reshape(3, 3, C, cout)
    zero = jnp.zeros((C, cout), w9.dtype)
    blocks = []
    for bi in range(2):
        for bj in range(2):
            for sr in range(2):
                for sc in range(2):
                    dh, dw = 2 * bi + sr - 1, 2 * bj + sc - 1
                    blocks.append(w[dh, dw] if 0 <= dh < 3 and 0 <= dw < 3 else zero)
    return jnp.concatenate(blocks, axis=0)


def conv3x3_s2(x_nhwc, w2, b, act="relu", out_dtype=jnp.bfloat16):
    """3x3 conv, stride 2, pad 1 (even H,W): space-to-depth -> 2x2 stride-1 conv with
    4-tap in-kernel accumulation; w2 is the pre-rearranged (16*C, Cout) weight."""
    B, H, W, C = x_nhwc.shape
    assert H % 2 == 0 and W % 2 == 0
    Ho, Wo = H // 2, W // 2
    xb = x_nhwc.reshape(B, Ho, 2, Wo, 2, C).transpose(0, 1, 3, 2, 4, 5)
    xb = xb.reshape(B, Ho, Wo, 4 * C)
    Wop = _round_up(Wo + 1, 8)                     # aligned row stride (>= Wo+1)
    xbp = jnp.pad(xb, ((0, 0), (1, 1), (1, Wop - Wo - 1), (0, 0)))
    xbp = xbp.reshape(B, (Ho + 2) * Wop, 4 * C)
    starts = tuple(bi * Wop + bj for bi in range(2) for bj in range(2))
    out = _taps_conv(xbp, w2, b, starts, 4 * C, Ho * Wop, act, out_dtype)
    return out.reshape(B, Ho, Wop, -1)[:, :, :Wo, :]


# ================= SpatialGather (online softmax over spatial tiles) =============
def _gather_kernel(l_ref, f_ref, o_ref, m_sc, s_sc, acc_sc):
    n = pl.program_id(1)

    @pl.when(n == 0)
    def _():
        m_sc[...] = jnp.full(m_sc.shape, -jnp.inf, jnp.float32)
        s_sc[...] = jnp.zeros(s_sc.shape, jnp.float32)
        acc_sc[...] = jnp.zeros(acc_sc.shape, jnp.float32)

    l = l_ref[...].astype(jnp.float32)                               # (K, tn)
    m_new = jnp.maximum(m_sc[...], jnp.max(l, axis=-1, keepdims=True))
    alpha = jnp.exp(m_sc[...] - m_new)
    p = jnp.exp(l - m_new)
    s_sc[...] = alpha * s_sc[...] + jnp.sum(p, axis=-1, keepdims=True)
    acc_sc[...] = alpha * acc_sc[...] + jnp.dot(
        p.astype(jnp.bfloat16), f_ref[...], preferred_element_type=jnp.float32)
    m_sc[...] = m_new

    @pl.when(n == pl.num_programs(1) - 1)
    def _():
        o_ref[...] = (acc_sc[...] / s_sc[...]).astype(o_ref.dtype)   # exact division


def spatial_gather(logits_t, feats, out_dtype=jnp.bfloat16):
    """logits_t: (B, K, N) f32, feats: (B, N, C) bf16 -> context (B, K, C)."""
    B, K, N = logits_t.shape
    C = feats.shape[-1]
    tn = N if N <= 512 else 512
    assert N % tn == 0   # TODO(synk): mask ragged spatial tails at production sizes
    return pl.pallas_call(
        _gather_kernel,
        out_shape=jax.ShapeDtypeStruct((B, K, C), out_dtype),
        grid=(B, N // tn),
        in_specs=[
            pl.BlockSpec((None, K, tn), lambda b, n: (b, 0, n)),
            pl.BlockSpec((None, tn, C), lambda b, n: (b, n, 0)),
        ],
        out_specs=pl.BlockSpec((None, K, C), lambda b, n: (b, 0, 0)),
        scratch_shapes=[pltpu.VMEM((K, 1), jnp.float32),
                        pltpu.VMEM((K, 1), jnp.float32),
                        pltpu.VMEM((K, C), jnp.float32)],
        compiler_params=_cp("parallel", "arbitrary"),
    )(logits_t, feats)


# ===================== f_object / f_down (one kernel, two outputs) ===============
def _obj_down_kernel(c_ref, wo0_ref, bo0_ref, wo1_ref, bo1_ref, wd_ref, bd_ref,
                     k_ref, v_ref):
    c = c_ref[...]
    h = jnp.maximum(jnp.dot(c, wo0_ref[...], preferred_element_type=jnp.float32)
                    + bo0_ref[...], 0.0)
    k = jnp.maximum(jnp.dot(h.astype(jnp.bfloat16), wo1_ref[...],
                            preferred_element_type=jnp.float32) + bo1_ref[...], 0.0)
    v = jnp.maximum(jnp.dot(c, wd_ref[...], preferred_element_type=jnp.float32)
                    + bd_ref[...], 0.0)
    k_ref[...] = k.astype(k_ref.dtype)
    v_ref[...] = v.astype(v_ref.dtype)


def obj_down_heads(ctx, wo0, bo0, wo1, bo1, wd, bd, out_dtype=jnp.bfloat16):
    M, C = ctx.shape
    Kc = wo0.shape[1]
    out = jax.ShapeDtypeStruct((M, Kc), out_dtype)
    return pl.pallas_call(
        _obj_down_kernel,
        out_shape=(out, out),
        grid=(1,),
        in_specs=[
            pl.BlockSpec((M, C), lambda i: (0, 0)),
            pl.BlockSpec((C, Kc), lambda i: (0, 0)),
            pl.BlockSpec((1, Kc), lambda i: (0, 0)),
            pl.BlockSpec((Kc, Kc), lambda i: (0, 0)),
            pl.BlockSpec((1, Kc), lambda i: (0, 0)),
            pl.BlockSpec((C, Kc), lambda i: (0, 0)),
            pl.BlockSpec((1, Kc), lambda i: (0, 0)),
        ],
        out_specs=(pl.BlockSpec((M, Kc), lambda i: (0, 0)),
                   pl.BlockSpec((M, Kc), lambda i: (0, 0))),
        compiler_params=_cp("arbitrary"),
    )(ctx, wo0, bo0.reshape(1, Kc), wo1, bo1.reshape(1, Kc), wd, bd.reshape(1, Kc))


# ===================== ObjectAttentionBlock2D (row-tiled over queries) ===========
def _attn_kernel(q_ref, k_ref, v_ref, o_ref):
    # NOTE: the 1/sqrt(KEY_CH) scale is folded into the f_pixel weights.
    # TODO(synk): class dim is only 8 wide (sparse lanes); pad to 128 for prod widths.
    s = jax.lax.dot_general(q_ref[...], k_ref[...], (((1,), (1,)), ((), ())),
                            preferred_element_type=jnp.float32)          # (tm, Kc)
    m = jnp.max(s, axis=-1, keepdims=True)
    p = jnp.exp(s - m)
    p = p / jnp.sum(p, axis=-1, keepdims=True)                           # exact division
    o_ref[...] = jnp.dot(p.astype(jnp.bfloat16), v_ref[...],
                         preferred_element_type=jnp.float32).astype(o_ref.dtype)


def batched_attention(q, k, v, out_dtype=jnp.bfloat16):
    """q: (B, N, d), k/v: (B, Kc, d), Kc = num classes.  Tiled over query rows."""
    B, N, d = q.shape
    Kc = k.shape[1]
    dv = v.shape[-1]
    tm = min(TM, N)
    return pl.pallas_call(
        _attn_kernel,
        out_shape=jax.ShapeDtypeStruct((B, N, dv), out_dtype),
        grid=(B, pl.cdiv(N, tm)),
        in_specs=[
            pl.BlockSpec((None, tm, d), lambda b, m: (b, m, 0)),
            pl.BlockSpec((None, Kc, d), lambda b, m: (b, 0, 0)),
            pl.BlockSpec((None, Kc, dv), lambda b, m: (b, 0, 0)),
        ],
        out_specs=pl.BlockSpec((None, tm, dv), lambda b, m: (b, m, 0)),
        compiler_params=_cp("parallel", "parallel"),
    )(q, k, v)


# ============ f_up + SpatialOCR bottleneck + cls_head (single fused kernel) ======
def _fuse_cls_kernel(cp_ref, ft_ref, wu_ref, bu_ref, wt_ref, wb_ref, bb_ref,
                     wc_ref, bc_ref, o_ref):
    u = jnp.dot(cp_ref[...], wu_ref[...], preferred_element_type=jnp.float32)
    u = jnp.maximum(u + bu_ref[...], 0.0)                                # f_up + BNReLU
    h = jnp.dot(u.astype(jnp.bfloat16), wt_ref[...], preferred_element_type=jnp.float32)
    h = h + jnp.dot(ft_ref[...], wb_ref[...], preferred_element_type=jnp.float32)
    h = jnp.maximum(h + bb_ref[...], 0.0)                                # bottleneck (concat)
    cls = jnp.dot(h.astype(jnp.bfloat16), wc_ref[...], preferred_element_type=jnp.float32)
    o_ref[...] = (cls + bc_ref[...]).astype(o_ref.dtype)                 # cls_head epilogue


def ocr_fuse_cls(ctx_pix, feats, wu, bu, wt, wb, bb, wc, bc):
    M, Kc = ctx_pix.shape
    Kf = feats.shape[1]
    Nc = wc.shape[1]
    tm = min(TM, M)
    return pl.pallas_call(
        _fuse_cls_kernel,
        out_shape=jax.ShapeDtypeStruct((M, Nc), jnp.float32),
        grid=(pl.cdiv(M, tm),),
        in_specs=[
            pl.BlockSpec((tm, Kc), lambda i: (i, 0)),
            pl.BlockSpec((tm, Kf), lambda i: (i, 0)),
            pl.BlockSpec((Kc, Kf), lambda i: (0, 0)),
            pl.BlockSpec((1, Kf), lambda i: (0, 0)),
            pl.BlockSpec((Kf, Kf), lambda i: (0, 0)),
            pl.BlockSpec((Kf, Kf), lambda i: (0, 0)),
            pl.BlockSpec((1, Kf), lambda i: (0, 0)),
            pl.BlockSpec((Kf, Nc), lambda i: (0, 0)),
            pl.BlockSpec((1, Nc), lambda i: (0, 0)),
        ],
        out_specs=pl.BlockSpec((tm, Nc), lambda i: (i, 0)),
        compiler_params=_cp("parallel"),
    )(ctx_pix, feats, wu, bu.reshape(1, Kf), wt, wb, bb.reshape(1, Kf),
      wc, bc.reshape(1, Nc))


# ======================== bilinear resize (matmul form) ==========================
def _interp_matrix(out_size, in_size):
    """Bilinear interpolation matrix (F.interpolate align_corners=False, clamped)."""
    s = in_size / out_size
    src = (jnp.arange(out_size, dtype=jnp.float32) + 0.5) * s - 0.5
    src = jnp.maximum(src, 0.0)
    i0 = jnp.minimum(jnp.floor(src).astype(jnp.int32), in_size - 1)
    i1 = jnp.minimum(i0 + 1, in_size - 1)
    w1 = src - i0.astype(jnp.float32)
    m0 = jax.nn.one_hot(i0, in_size, dtype=jnp.float32) * (1.0 - w1)[:, None]
    m1 = jax.nn.one_hot(i1, in_size, dtype=jnp.float32) * w1[:, None]
    return m0 + m1


def _resize_kernel(x_ref, wy_ref, wx_ref, o_ref):
    t = jax.lax.dot_general(x_ref[...], wx_ref[...], (((1,), (1,)), ((), ())),
                            preferred_element_type=jnp.float32)          # (H, out_w)
    o_ref[...] = jnp.dot(wy_ref[...], t, preferred_element_type=jnp.float32)


def resize_bilinear_nchw(x, out_h, out_w):
    """Separable bilinear resize: out = Wy @ x @ Wx^T per (batch, channel) plane."""
    B, C, H, W = x.shape
    if (H, W) == (out_h, out_w):
        return x
    wy = _interp_matrix(out_h, H)
    wx = _interp_matrix(out_w, W)
    xf = x.reshape(B * C, H, W).astype(jnp.float32)
    # TODO(synk): at production resolutions replace with a banded 2-tap formulation
    #             tiled over output rows (dense interp matrices waste MXU work / VMEM).
    out = pl.pallas_call(
        _resize_kernel,
        out_shape=jax.ShapeDtypeStruct((B * C, out_h, out_w), jnp.float32),
        grid=(B * C,),
        in_specs=[
            pl.BlockSpec((None, H, W), lambda i: (i, 0, 0)),
            pl.BlockSpec((out_h, H), lambda i: (0, 0)),
            pl.BlockSpec((out_w, W), lambda i: (0, 0)),
        ],
        out_specs=pl.BlockSpec((None, out_h, out_w), lambda i: (i, 0, 0)),
        compiler_params=_cp("parallel"),
    )(xf, wy, wx)
    return out.reshape(B, C, out_h, out_w)


# ================================ parameters =====================================
def init_params(key):
    P = {}

    def add(name, in_dim, out_dim, key):
        kw, kb, key = jax.random.split(key, 3)
        # weights are stored bf16 (MXU operand dtype) -> no in-kernel casts, half DMA.
        P[name + "_w"] = (jax.random.normal(kw, (in_dim, out_dim), jnp.float32)
                          * 0.05).astype(jnp.bfloat16)
        P[name + "_b"] = jax.random.normal(kb, (out_dim,), jnp.float32) * 0.01
        return key

    # backbone stub (TODO(synk): replaces HRNetV2 trunk)
    key = add("bb0", 9 * 3, STEM_CH, key)
    key = add("bb1", 9 * STEM_CH, HIGH_CH, key)
    # OCR_block.conv3x3_ocr (+ BNReLU folded)
    key = add("ocr3", 9 * HIGH_CH, MID_CH, key)
    # aux_head: 1x1 conv + BNReLU + 1x1 conv (bias)
    key = add("aux0", HIGH_CH, HIGH_CH, key)
    key = add("aux1", HIGH_CH, NUM_CLASSES, key)
    # ObjectAttentionBlock2D: f_pixel (2x), f_object (2x), f_down, f_up
    key = add("pix0", MID_CH, KEY_CH, key)
    key = add("pix1", KEY_CH, KEY_CH, key)
    key = add("obj0", MID_CH, KEY_CH, key)
    key = add("obj1", KEY_CH, KEY_CH, key)
    key = add("down", MID_CH, KEY_CH, key)
    key = add("up", KEY_CH, MID_CH, key)
    # SpatialOCR bottleneck (cat[context, feats] -> MID) + BNReLU (dropout=identity)
    key = add("bottle", 2 * MID_CH, MID_CH, key)
    # cls_head
    key = add("cls", MID_CH, NUM_CLASSES, key)

    # fold attention scale KEY_CH**-0.5 into f_pixel's last layer (relu(s*x)=s*relu(x))
    scale = jnp.float32(KEY_CH ** -0.5)
    P["pix1_w"] = (P["pix1_w"].astype(jnp.float32) * scale).astype(jnp.bfloat16)
    P["pix1_b"] = P["pix1_b"] * scale

    # pre-rearrange stride-2 conv weights for the space-to-depth 2x2 formulation
    P["bb0_w"] = _w_space_to_depth(P["bb0_w"], 3)
    P["bb1_w"] = _w_space_to_depth(P["bb1_w"], STEM_CH)
    return P


# ================================ forward pass ===================================
def ocrnet_forward(P, images_nchw):
    """OCRNet.forward (eval): backbone stub -> OCR block -> cls_head -> scale_as."""
    B, _, Hin, Win = images_nchw.shape
    x = jnp.transpose(images_nchw, (0, 2, 3, 1)).astype(jnp.bfloat16)   # NHWC bf16

    # TODO(synk): HRNetV2 trunk (get_trunk('hrnetv2')) is external; deterministic
    #             2-layer strided-conv stub -> 1/4-resolution high-level features.
    h = conv3x3_s2(x, P["bb0_w"], P["bb0_b"], "relu")
    hlf = conv3x3_s2(h, P["bb1_w"], P["bb1_b"], "relu")                 # (B, h, w, HIGH)

    # OCR_block.conv3x3_ocr (+ BNReLU folded to ReLU: PyTorch-default eval BN stats)
    feats = conv3x3_s1(hlf, P["ocr3_w"], P["ocr3_b"], "relu")           # (B, h, w, MID)
    _, hh, ww, _ = feats.shape
    N = hh * ww

    # aux_head: fused 1x1 conv + BNReLU + 1x1 conv
    aux_flat = matmul2_bias_act(hlf.reshape(B * N, HIGH_CH),
                                P["aux0_w"], P["aux0_b"], "relu",
                                P["aux1_w"], P["aux1_b"], "none",
                                out_dtype=jnp.float32)                  # (B*N, K)

    # SpatialGather_Module: context[b,k,:] = softmax_n(aux[b,n,k]) . feats[b,n,:]
    # (small (B,N,8)->(B,8,N) transpose kept host-side: keeps the kernel softmax
    #  reduction lane-dense over N; aux is 8x smaller than feats)
    logits_t = jnp.transpose(aux_flat.reshape(B, N, NUM_CLASSES), (0, 2, 1))
    context = spatial_gather(logits_t, feats.reshape(B, N, MID_CH))     # (B, K, MID)

    # SpatialOCR_Module / ObjectAttentionBlock2D
    q = matmul2_bias_act(feats.reshape(B * N, MID_CH),
                         P["pix0_w"], P["pix0_b"], "relu",
                         P["pix1_w"], P["pix1_b"], "relu")              # f_pixel (scale folded)
    kmat, vmat = obj_down_heads(context.reshape(B * NUM_CLASSES, MID_CH),
                                P["obj0_w"], P["obj0_b"],
                                P["obj1_w"], P["obj1_b"],
                                P["down_w"], P["down_b"])               # f_object / f_down
    ctx_pix = batched_attention(q.reshape(B, N, KEY_CH),
                                kmat.reshape(B, NUM_CLASSES, KEY_CH),
                                vmat.reshape(B, NUM_CLASSES, KEY_CH))   # (B, N, KEY)

    # f_up + bottleneck (concat -> two summed matmuls) + cls_head, all in one kernel
    cls_flat = ocr_fuse_cls(ctx_pix.reshape(B * N, KEY_CH),
                            feats.reshape(B * N, MID_CH),
                            P["up_w"], P["up_b"],
                            P["bottle_w"][:MID_CH], P["bottle_w"][MID_CH:],
                            P["bottle_b"], P["cls_w"], P["cls_b"])      # (B*N, K) f32

    cls_out = jnp.transpose(cls_flat.reshape(B, hh, ww, NUM_CLASSES), (0, 3, 1, 2))
    cls_out = resize_bilinear_nchw(cls_out, Hin, Win)                   # scale_as(cls_out, x)
    # aux_out's scale_as is dead code in eval (not returned) and is skipped.
    return {"pred": cls_out}


# =================================== main ========================================
if __name__ == "__main__":
    key = jax.random.PRNGKey(0)
    pkey, xkey = jax.random.split(key)
    params = init_params(pkey)
    images = jax.random.normal(xkey, (2, 3, 32, 32), jnp.float32)   # NCHW input

    fwd = jax.jit(ocrnet_forward)
    out = fwd(params, images)
    jax.block_until_ready(out["pred"])

    assert out["pred"].shape == (2, NUM_CLASSES, 32, 32)
    assert bool(jnp.all(jnp.isfinite(out["pred"])))
    print("KERNEL_OK")
</pallas_src>

<mosaic_0001>
module attributes {stable_mosaic.version = 11 : i64} {
  func.func @_taps_mm_kernel(%arg0: i32, %arg1: memref<1x432x12xbf16, #tpu.memory_space<vmem>>, %arg2: memref<48x16xbf16, #tpu.memory_space<vmem>>, %arg3: memref<1x16xf32, #tpu.memory_space<vmem>>, %arg4: memref<1x384x16xbf16, #tpu.memory_space<vmem>>) attributes {dimension_semantics = [#tpu.dimension_semantics<parallel>], iteration_bounds = array<i64: 2>, scalar_prefetch = 0 : i64, scratch_operands = 0 : i64, tpu.core_type = #tpu.core_type<tc>, window_params = [{transform_indices = @transform_0, window_bounds = array<i64: 1, 432, 12>}, {pipeline_mode = #tpu.pipeline_mode<synchronous>, transform_indices = @transform_1, window_bounds = array<i64: 48, 16>}, {pipeline_mode = #tpu.pipeline_mode<synchronous>, transform_indices = @transform_2, window_bounds = array<i64: 1, 16>}, {transform_indices = @transform_3, window_bounds = array<i64: 1, 384, 16>}]} {
    %c0 = arith.constant 0 : index
    %c0_0 = arith.constant 0 : index
    %c0_1 = arith.constant 0 : index
    %0 = vector.load %arg1[%c0, %c0_0, %c0_1] : memref<1x432x12xbf16, #tpu.memory_space<vmem>>, vector<1x384x12xbf16>
    %1 = vector.shape_cast %0 : vector<1x384x12xbf16> to vector<384x12xbf16>
    %c0_2 = arith.constant 0 : index
    %c0_3 = arith.constant 0 : index
    %2 = vector.load %arg2[%c0_2, %c0_3] : memref<48x16xbf16, #tpu.memory_space<vmem>>, vector<12x16xbf16>
    %cst = arith.constant dense<0.000000e+00> : vector<384x16xf32>
    %3 = tpu.matmul %1, %2, %cst {dimension_numbers = #tpu.dot_dimension_numbers<[1], [0], [0], [1], [0, 0, 1, 1], [], []>} : vector<384x12xbf16>, vector<12x16xbf16>, vector<384x16xf32> -> vector<384x16xf32>
    %c0_4 = arith.constant 0 : index
    %c1 = arith.constant 1 : index
    %c0_5 = arith.constant 0 : index
    %4 = vector.load %arg1[%c0_4, %c1, %c0_5] : memref<1x432x12xbf16, #tpu.memory_space<vmem>>, vector<1x384x12xbf16>
    %5 = vector.shape_cast %4 : vector<1x384x12xbf16> to vector<384x12xbf16>
    %c12 = arith.constant 12 : index
    %c0_6 = arith.constant 0 : index
    %6 = vector.load %arg2[%c12, %c0_6] : memref<48x16xbf16, #tpu.memory_space<vmem>>, vector<12x16xbf16>
    %cst_7 = arith.constant dense<0.000000e+00> : vector<384x16xf32>
    %7 = tpu.matmul %5, %6, %cst_7 {dimension_numbers = #tpu.dot_dimension_numbers<[1], [0], [0], [1], [0, 0, 1, 1], [], []>} : vector<384x12xbf16>, vector<12x16xbf16>, vector<384x16xf32> -> vector<384x16xf32>
    %8 = arith.addf %3, %7 : vector<384x16xf32>
    %c0_8 = arith.constant 0 : index
    %c24 = arith.constant 24 : index
    %c0_9 = arith.constant 0 : index
    %9 = vector.load %arg1[%c0_8, %c24, %c0_9] : memref<1x432x12xbf16, #tpu.memory_space<vmem>>, vector<1x384x12xbf16>
    %10 = vector.shape_cast %9 : vector<1x384x12xbf16> to vector<384x12xbf16>
    %c24_10 = arith.constant 24 : index
    %c0_11 = arith.constant 0 : index
    %11 = vector.load %arg2[%c24_10, %c0_11] : memref<48x16xbf16, #tpu.memory_space<vmem>>, vector<12x16xbf16>
    %cst_12 = arith.constant dense<0.000000e+00> : vector<384x16xf32>
    %12 = tpu.matmul %10, %11, %cst_12 {dimension_numbers = #tpu.dot_dimension_numbers<[1], [0], [0], [1], [0, 0, 1, 1], [], []>} : vector<384x12xbf16>, vector<12x16xbf16>, vector<384x16xf32> -> vector<384x16xf32>
    %13 = arith.addf %8, %12 : vector<384x16xf32>
    %c0_13 = arith.constant 0 : index
    %c25 = arith.constant 25 : index
    %c0_14 = arith.constant 0 : index
    %14 = vector.load %arg1[%c0_13, %c25, %c0_14] : memref<1x432x12xbf16, #tpu.memory_space<vmem>>, vector<1x384x12xbf16>
    %15 = vector.shape_cast %14 : vector<1x384x12xbf16> to vector<384x12xbf16>
    %c36 = arith.constant 36 : index
    %c0_15 = arith.constant 0 : index
    %16 = vector.load %arg2[%c36, %c0_15] : memref<48x16xbf16, #tpu.memory_space<vmem>>, vector<12x16xbf16>
    %cst_16 = arith.constant dense<0.000000e+00> : vector<384x16xf32>
    %17 = tpu.matmul %15, %16, %cst_16 {dimension_numbers = #tpu.dot_dimension_numbers<[1], [0], [0], [1], [0, 0, 1, 1], [], []>} : vector<384x12xbf16>, vector<12x16xbf16>, vector<384x16xf32> -> vector<384x16xf32>
    %18 = arith.addf %13, %17 : vector<384x16xf32>
    %c0_17 = arith.constant 0 : index
    %c0_18 = arith.constant 0 : index
    %19 = vector.load %arg3[%c0_17, %c0_18] : memref<1x16xf32, #tpu.memory_space<vmem>>, vector<1x16xf32>
    %20 = vector.broadcast %19 : vector<1x16xf32> to vector<384x16xf32>
    %21 = arith.addf %18, %20 : vector<384x16xf32>
    %cst_19 = arith.constant 0.000000e+00 : f32
    %22 = vector.broadcast %cst_19 : f32 to vector<384x16xf32>
    %23 = arith.maximumf %21, %22 : vector<384x16xf32>
    %24 = arith.truncf %23 : vector<384x16xf32> to vector<384x16xbf16>
    %c0_20 = arith.constant 0 : index
    %c0_21 = arith.constant 0 : index
    %c0_22 = arith.constant 0 : index
    %25 = vector.load %arg4[%c0_20, %c0_21, %c0_22] : memref<1x384x16xbf16, #tpu.memory_space<vmem>>, vector<1x384x16xbf16>
    %26 = vector.shape_cast %25 : vector<1x384x16xbf16> to vector<384x16xbf16>
    %27 = vector.shape_cast %24 : vector<384x16xbf16> to vector<1x384x16xbf16>
    tpu.vector_store %arg4[%c0_20, %c0_21, %c0_22], %27 {strides = array<i32>} : memref<1x384x16xbf16, #tpu.memory_space<vmem>>, vector<1x384x16xbf16>,
    return
  }
  func.func @transform_0(%arg0: i32) -> (i32, i32, i32) {
    %c0_i32 = arith.constant 0 : i32
    %c0_i32_0 = arith.constant 0 : i32
    %c0_i32_1 = arith.constant 0 : i32
    return %arg0, %c0_i32, %c0_i32_0 : i32, i32, i32
  }
  func.func @transform_1(%arg0: i32) -> (i32, i32) {
    %c0_i32 = arith.constant 0 : i32
    %c0_i32_0 = arith.constant 0 : i32
    %c0_i32_1 = arith.constant 0 : i32
    return %c0_i32, %c0_i32_0 : i32, i32
  }
  func.func @transform_2(%arg0: i32) -> (i32, i32) {
    %c0_i32 = arith.constant 0 : i32
    %c0_i32_0 = arith.constant 0 : i32
    %c0_i32_1 = arith.constant 0 : i32
    return %c0_i32, %c0_i32_0 : i32, i32
  }
  func.func @transform_3(%arg0: i32) -> (i32, i32, i32) {
    %c0_i32 = arith.constant 0 : i32
    %c0_i32_0 = arith.constant 0 : i32
    %c0_i32_1 = arith.constant 0 : i32
    return %arg0, %c0_i32, %c0_i32_0 : i32, i32, i32
  }
}

module attributes {stable_mosaic.version = 11 : i64} {
  func.func @_taps_mm_kernel(%arg0: i32, %arg1: memref<1x160x64xbf16, #tpu.memory_space<vmem>>, %arg2: memref<256x32xbf16, #tpu.memory_space<vmem>>, %arg3: memref<1x32xf32, #tpu.memory_space<vmem>>, %arg4: memref<1x128x32xbf16, #tpu.memory_space<vmem>>) attributes {dimension_semantics = [#tpu.dimension_semantics<parallel>], iteration_bounds = array<i64: 2>, scalar_prefetch = 0 : i64, scratch_operands = 0 : i64, tpu.core_type = #tpu.core_type<tc>, window_params = [{transform_indices = @transform_0, window_bounds = array<i64: 1, 160, 64>}, {pipeline_mode = #tpu.pipeline_mode<synchronous>, transform_indices = @transform_1, window_bounds = array<i64: 256, 32>}, {pipeline_mode = #tpu.pipeline_mode<synchronous>, transform_indices = @transform_2, window_bounds = array<i64: 1, 32>}, {transform_indices = @transform_3, window_bounds = array<i64: 1, 128, 32>}]} {
    %c0 = arith.constant 0 : index
    %c0_0 = arith.constant 0 : index
    %c0_1 = arith.constant 0 : index
    %0 = vector.load %arg1[%c0, %c0_0, %c0_1] : memref<1x160x64xbf16, #tpu.memory_space<vmem>>, vector<1x128x64xbf16>
    %1 = vector.shape_cast %0 : vector<1x128x64xbf16> to vector<128x64xbf16>
    %c0_2 = arith.constant 0 : index
    %c0_3 = arith.constant 0 : index
    %2 = vector.load %arg2[%c0_2, %c0_3] : memref<256x32xbf16, #tpu.memory_space<vmem>>, vector<64x32xbf16>
    %cst = arith.constant dense<0.000000e+00> : vector<128x32xf32>
    %3 = tpu.matmul %1, %2, %cst {dimension_numbers = #tpu.dot_dimension_numbers<[1], [0], [0], [1], [0, 0, 1, 1], [], []>} : vector<128x64xbf16>, vector<64x32xbf16>, vector<128x32xf32> -> vector<128x32xf32>
    %c0_4 = arith.constant 0 : index
    %c1 = arith.constant 1 : index
    %c0_5 = arith.constant 0 : index
    %4 = vector.load %arg1[%c0_4, %c1, %c0_5] : memref<1x160x64xbf16, #tpu.memory_space<vmem>>, vector<1x128x64xbf16>
    %5 = vector.shape_cast %4 : vector<1x128x64xbf16> to vector<128x64xbf16>
    %c64 = arith.constant 64 : index
    %c0_6 = arith.constant 0 : index
    %6 = vector.load %arg2[%c64, %c0_6] : memref<256x32xbf16, #tpu.memory_space<vmem>>, vector<64x32xbf16>
    %cst_7 = arith.constant dense<0.000000e+00> : vector<128x32xf32>
    %7 = tpu.matmul %5, %6, %cst_7 {dimension_numbers = #tpu.dot_dimension_numbers<[1], [0], [0], [1], [0, 0, 1, 1], [], []>} : vector<128x64xbf16>, vector<64x32xbf16>, vector<128x32xf32> -> vector<128x32xf32>
    %8 = arith.addf %3, %7 : vector<128x32xf32>
    %c0_8 = arith.constant 0 : index
    %c16 = arith.constant 16 : index
    %c0_9 = arith.constant 0 : index
    %9 = vector.load %arg1[%c0_8, %c16, %c0_9] : memref<1x160x64xbf16, #tpu.memory_space<vmem>>, vector<1x128x64xbf16>
    %10 = vector.shape_cast %9 : vector<1x128x64xbf16> to vector<128x64xbf16>
    %c128 = arith.constant 128 : index
    %c0_10 = arith.constant 0 : index
    %11 = vector.load %arg2[%c128, %c0_10] : memref<256x32xbf16, #tpu.memory_space<vmem>>, vector<64x32xbf16>
    %cst_11 = arith.constant dense<0.000000e+00> : vector<128x32xf32>
    %12 = tpu.matmul %10, %11, %cst_11 {dimension_numbers = #tpu.dot_dimension_numbers<[1], [0], [0], [1], [0, 0, 1, 1], [], []>} : vector<128x64xbf16>, vector<64x32xbf16>, vector<128x32xf32> -> vector<128x32xf32>
    %13 = arith.addf %8, %12 : vector<128x32xf32>
    %c0_12 = arith.constant 0 : index
    %c17 = arith.constant 17 : index
    %c0_13 = arith.constant 0 : index
    %14 = vector.load %arg1[%c0_12, %c17, %c0_13] : memref<1x160x64xbf16, #tpu.memory_space<vmem>>, vector<1x128x64xbf16>
    %15 = vector.shape_cast %14 : vector<1x128x64xbf16> to vector<128x64xbf16>
    %c192 = arith.constant 192 : index
    %c0_14 = arith.constant 0 : index
    %16 = vector.load %arg2[%c192, %c0_14] : memref<256x32xbf16, #tpu.memory_space<vmem>>, vector<64x32xbf16>
    %cst_15 = arith.constant dense<0.000000e+00> : vector<128x32xf32>
    %17 = tpu.matmul %15, %16, %cst_15 {dimension_numbers = #tpu.dot_dimension_numbers<[1], [0], [0], [1], [0, 0, 1, 1], [], []>} : vector<128x64xbf16>, vector<64x32xbf16>, vector<128x32xf32> -> vector<128x32xf32>
    %18 = arith.addf %13, %17 : vector<128x32xf32>
    %c0_16 = arith.constant 0 : index
    %c0_17 = arith.constant 0 : index
    %19 = vector.load %arg3[%c0_16, %c0_17] : memref<1x32xf32, #tpu.memory_space<vmem>>, vector<1x32xf32>
    %20 = vector.broadcast %19 : vector<1x32xf32> to vector<128x32xf32>
    %21 = arith.addf %18, %20 : vector<128x32xf32>
    %cst_18 = arith.constant 0.000000e+00 : f32
    %22 = vector.broadcast %cst_18 : f32 to vector<128x32xf32>
    %23 = arith.maximumf %21, %22 : vector<128x32xf32>
    %24 = arith.truncf %23 : vector<128x32xf32> to vector<128x32xbf16>
    %c0_19 = arith.constant 0 : index
    %c0_20 = arith.constant 0 : index
    %c0_21 = arith.constant 0 : index
    %25 = vector.load %arg4[%c0_19, %c0_20, %c0_21] : memref<1x128x32xbf16, #tpu.memory_space<vmem>>, vector<1x128x32xbf16>
    %26 = vector.shape_cast %25 : vector<1x128x32xbf16> to vector<128x32xbf16>
    %27 = vector.shape_cast %24 : vector<128x32xbf16> to vector<1x128x32xbf16>
    tpu.vector_store %arg4[%c0_19, %c0_20, %c0_21], %27 {strides = array<i32>} : memref<1x128x32xbf16, #tpu.memory_space<vmem>>, vector<1x128x32xbf16>,
    return
  }
  func.func @transform_0(%arg0: i32) -> (i32, i32, i32) {
    %c0_i32 = arith.constant 0 : i32
    %c0_i32_0 = arith.constant 0 : i32
    %c0_i32_1 = arith.constant 0 : i32
    return %arg0, %c0_i32, %c0_i32_0 : i32, i32, i32
  }
  func.func @transform_1(%arg0: i32) -> (i32, i32) {
    %c0_i32 = arith.constant 0 : i32
    %c0_i32_0 = arith.constant 0 : i32
    %c0_i32_1 = arith.constant 0 : i32
    return %c0_i32, %c0_i32_0 : i32, i32
  }
  func.func @transform_2(%arg0: i32) -> (i32, i32) {
    %c0_i32 = arith.constant 0 : i32
    %c0_i32_0 = arith.constant 0 : i32
    %c0_i32_1 = arith.constant 0 : i32
    return %c0_i32, %c0_i32_0 : i32, i32
  }
  func.func @transform_3(%arg0: i32) -> (i32, i32, i32) {
    %c0_i32 = arith.constant 0 : i32
    %c0_i32_0 = arith.constant 0 : i32
    %c0_i32_1 = arith.constant 0 : i32
    return %arg0, %c0_i32, %c0_i32_0 : i32, i32, i32
  }
}

module attributes {stable_mosaic.version = 11 : i64} {
  func.func @_taps_mm_kernel(%arg0: i32, %arg1: memref<1x192x32xbf16, #tpu.memory_space<vmem>>, %arg2: memref<288x64xbf16, #tpu.memory_space<vmem>>, %arg3: memref<1x64xf32, #tpu.memory_space<vmem>>, %arg4: memref<1x128x64xbf16, #tpu.memory_space<vmem>>) attributes {dimension_semantics = [#tpu.dimension_semantics<parallel>], iteration_bounds = array<i64: 2>, scalar_prefetch = 0 : i64, scratch_operands = 0 : i64, tpu.core_type = #tpu.core_type<tc>, window_params = [{transform_indices = @transform_0, window_bounds = array<i64: 1, 192, 32>}, {pipeline_mode = #tpu.pipeline_mode<synchronous>, transform_indices = @transform_1, window_bounds = array<i64: 288, 64>}, {pipeline_mode = #tpu.pipeline_mode<synchronous>, transform_indices = @transform_2, window_bounds = array<i64: 1, 64>}, {transform_indices = @transform_3, window_bounds = array<i64: 1, 128, 64>}]} {
    %c0 = arith.constant 0 : index
    %c15 = arith.constant 15 : index
    %c0_0 = arith.constant 0 : index
    %0 = vector.load %arg1[%c0, %c15, %c0_0] : memref<1x192x32xbf16, #tpu.memory_space<vmem>>, vector<1x128x32xbf16>
    %1 = vector.shape_cast %0 : vector<1x128x32xbf16> to vector<128x32xbf16>
    %c0_1 = arith.constant 0 : index
    %c0_2 = arith.constant 0 : index
    %2 = vector.load %arg2[%c0_1, %c0_2] : memref<288x64xbf16, #tpu.memory_space<vmem>>, vector<32x64xbf16>
    %cst = arith.constant dense<0.000000e+00> : vector<128x64xf32>
    %3 = tpu.matmul %1, %2, %cst {dimension_numbers = #tpu.dot_dimension_numbers<[1], [0], [0], [1], [0, 0, 1, 1], [], []>} : vector<128x32xbf16>, vector<32x64xbf16>, vector<128x64xf32> -> vector<128x64xf32>
    %c0_3 = arith.constant 0 : index
    %c16 = arith.constant 16 : index
    %c0_4 = arith.constant 0 : index
    %4 = vector.load %arg1[%c0_3, %c16, %c0_4] : memref<1x192x32xbf16, #tpu.memory_space<vmem>>, vector<1x128x32xbf16>
    %5 = vector.shape_cast %4 : vector<1x128x32xbf16> to vector<128x32xbf16>
    %c32 = arith.constant 32 : index
    %c0_5 = arith.constant 0 : index
    %6 = vector.load %arg2[%c32, %c0_5] : memref<288x64xbf16, #tpu.memory_space<vmem>>, vector<32x64xbf16>
    %cst_6 = arith.constant dense<0.000000e+00> : vector<128x64xf32>
    %7 = tpu.matmul %5, %6, %cst_6 {dimension_numbers = #tpu.dot_dimension_numbers<[1], [0], [0], [1], [0, 0, 1, 1], [], []>} : vector<128x32xbf16>, vector<32x64xbf16>, vector<128x64xf32> -> vector<128x64xf32>
    %8 = arith.addf %3, %7 : vector<128x64xf32>
    %c0_7 = arith.constant 0 : index
    %c17 = arith.constant 17 : index
    %c0_8 = arith.constant 0 : index
    %9 = vector.load %arg1[%c0_7, %c17, %c0_8] : memref<1x192x32xbf16, #tpu.memory_space<vmem>>, vector<1x128x32xbf16>
    %10 = vector.shape_cast %9 : vector<1x128x32xbf16> to vector<128x32xbf16>
    %c64 = arith.constant 64 : index
    %c0_9 = arith.constant 0 : index
    %11 = vector.load %arg2[%c64, %c0_9] : memref<288x64xbf16, #tpu.memory_space<vmem>>, vector<32x64xbf16>
    %cst_10 = arith.constant dense<0.000000e+00> : vector<128x64xf32>
    %12 = tpu.matmul %10, %11, %cst_10 {dimension_numbers = #tpu.dot_dimension_numbers<[1], [0], [0], [1], [0, 0, 1, 1], [], []>} : vector<128x32xbf16>, vector<32x64xbf16>, vector<128x64xf32> -> vector<128x64xf32>
    %13 = arith.addf %8, %12 : vector<128x64xf32>
    %c0_11 = arith.constant 0 : index
    %c31 = arith.constant 31 : index
    %c0_12 = arith.constant 0 : index
    %14 = vector.load %arg1[%c0_11, %c31, %c0_12] : memref<1x192x32xbf16, #tpu.memory_space<vmem>>, vector<1x128x32xbf16>
    %15 = vector.shape_cast %14 : vector<1x128x32xbf16> to vector<128x32xbf16>
    %c96 = arith.constant 96 : index
    %c0_13 = arith.constant 0 : index
    %16 = vector.load %arg2[%c96, %c0_13] : memref<288x64xbf16, #tpu.memory_space<vmem>>, vector<32x64xbf16>
    %cst_14 = arith.constant dense<0.000000e+00> : vector<128x64xf32>
    %17 = tpu.matmul %15, %16, %cst_14 {dimension_numbers = #tpu.dot_dimension_numbers<[1], [0], [0], [1], [0, 0, 1, 1], [], []>} : vector<128x32xbf16>, vector<32x64xbf16>, vector<128x64xf32> -> vector<128x64xf32>
    %18 = arith.addf %13, %17 : vector<128x64xf32>
    %c0_15 = arith.constant 0 : index
    %c32_16 = arith.constant 32 : index
    %c0_17 = arith.constant 0 : index
    %19 = vector.load %arg1[%c0_15, %c32_16, %c0_17] : memref<1x192x32xbf16, #tpu.memory_space<vmem>>, vector<1x128x32xbf16>
    %20 = vector.shape_cast %19 : vector<1x128x32xbf16> to vector<128x32xbf16>
    %c128 = arith.constant 128 : index
    %c0_18 = arith.constant 0 : index
    %21 = vector.load %arg2[%c128, %c0_18] : memref<288x64xbf16, #tpu.memory_space<vmem>>, vector<32x64xbf16>
    %cst_19 = arith.constant dense<0.000000e+00> : vector<128x64xf32>
    %22 = tpu.matmul %20, %21, %cst_19 {dimension_numbers = #tpu.dot_dimension_numbers<[1], [0], [0], [1], [0, 0, 1, 1], [], []>} : vector<128x32xbf16>, vector<32x64xbf16>, vector<128x64xf32> -> vector<128x64xf32>
    %23 = arith.addf %18, %22 : vector<128x64xf32>
    %c0_20 = arith.constant 0 : index
    %c33 = arith.constant 33 : index
    %c0_21 = arith.constant 0 : index
    %24 = vector.load %arg1[%c0_20, %c33, %c0_21] : memref<1x192x32xbf16, #tpu.memory_space<vmem>>, vector<1x128x32xbf16>
    %25 = vector.shape_cast %24 : vector<1x128x32xbf16> to vector<128x32xbf16>
    %c160 = arith.constant 160 : index
    %c0_22 = arith.constant 0 : index
    %26 = vector.load %arg2[%c160, %c0_22] : memref<288x64xbf16, #tpu.memory_space<vmem>>, vector<32x64xbf16>
    %cst_23 = arith.constant dense<0.000000e+00> : vector<128x64xf32>
    %27 = tpu.matmul %25, %26, %cst_23 {dimension_numbers = #tpu.dot_dimension_numbers<[1], [0], [0], [1], [0, 0, 1, 1], [], []>} : vector<128x32xbf16>, vector<32x64xbf16>, vector<128x64xf32> -> vector<128x64xf32>
    %28 = arith.addf %23, %27 : vector<128x64xf32>
    %c0_24 = arith.constant 0 : index
    %c47 = arith.constant 47 : index
    %c0_25 = arith.constant 0 : index
    %29 = vector.load %arg1[%c0_24, %c47, %c0_25] : memref<1x192x32xbf16, #tpu.memory_space<vmem>>, vector<1x128x32xbf16>
    %30 = vector.shape_cast %29 : vector<1x128x32xbf16> to vector<128x32xbf16>
    %c192 = arith.constant 192 : index
    %c0_26 = arith.constant 0 : index
    %31 = vector.load %arg2[%c192, %c0_26] : memref<288x64xbf16, #tpu.memory_space<vmem>>, vector<32x64xbf16>
    %cst_27 = arith.constant dense<0.000000e+00> : vector<128x64xf32>
    %32 = tpu.matmul %30, %31, %cst_27 {dimension_numbers = #tpu.dot_dimension_numbers<[1], [0], [0], [1], [0, 0, 1, 1], [], []>} : vector<128x32xbf16>, vector<32x64xbf16>, vector<128x64xf32> -> vector<128x64xf32>
    %33 = arith.addf %28, %32 : vector<128x64xf32>
    %c0_28 = arith.constant 0 : index
    %c48 = arith.constant 48 : index
    %c0_29 = arith.constant 0 : index
    %34 = vector.load %arg1[%c0_28, %c48, %c0_29] : memref<1x192x32xbf16, #tpu.memory_space<vmem>>, vector<1x128x32xbf16>
    %35 = vector.shape_cast %34 : vector<1x128x32xbf16> to vector<128x32xbf16>
    %c224 = arith.constant 224 : index
    %c0_30 = arith.constant 0 : index
    %36 = vector.load %arg2[%c224, %c0_30] : memref<288x64xbf16, #tpu.memory_space<vmem>>, vector<32x64xbf16>
    %cst_31 = arith.constant dense<0.000000e+00> : vector<128x64xf32>
    %37 = tpu.matmul %35, %36, %cst_31 {dimension_numbers = #tpu.dot_dimension_numbers<[1], [0], [0], [1], [0, 0, 1, 1], [], []>} : vector<128x32xbf16>, vector<32x64xbf16>, vector<128x64xf32> -> vector<128x64xf32>
    %38 = arith.addf %33, %37 : vector<128x64xf32>
    %c0_32 = arith.constant 0 : index
    %c49 = arith.constant 49 : index
    %c0_33 = arith.constant 0 : index
    %39 = vector.load %arg1[%c0_32, %c49, %c0_33] : memref<1x192x32xbf16, #tpu.memory_space<vmem>>, vector<1x128x32xbf16>
    %40 = vector.shape_cast %39 : vector<1x128x32xbf16> to vector<128x32xbf16>
    %c256 = arith.constant 256 : index
    %c0_34 = arith.constant 0 : index
    %41 = vector.load %arg2[%c256, %c0_34] : memref<288x64xbf16, #tpu.memory_space<vmem>>, vector<32x64xbf16>
    %cst_35 = arith.constant dense<0.000000e+00> : vector<128x64xf32>
    %42 = tpu.matmul %40, %41, %cst_35 {dimension_numbers = #tpu.dot_dimension_numbers<[1], [0], [0], [1], [0, 0, 1, 1], [], []>} : vector<128x32xbf16>, vector<32x64xbf16>, vector<128x64xf32> -> vector<128x64xf32>
    %43 = arith.addf %38, %42 : vector<128x64xf32>
    %c0_36 = arith.constant 0 : index
    %c0_37 = arith.constant 0 : index
    %44 = vector.load %arg3[%c0_36, %c0_37] : memref<1x64xf32, #tpu.memory_space<vmem>>, vector<1x64xf32>
    %45 = vector.broadcast %44 : vector<1x64xf32> to vector<128x64xf32>
    %46 = arith.addf %43, %45 : vector<128x64xf32>
    %cst_38 = arith.constant 0.000000e+00 : f32
    %47 = vector.broadcast %cst_38 : f32 to vector<128x64xf32>
    %48 = arith.maximumf %46, %47 : vector<128x64xf32>
    %49 = arith.truncf %48 : vector<128x64xf32> to vector<128x64xbf16>
    %c0_39 = arith.constant 0 : index
    %c0_40 = arith.constant 0 : index
    %c0_41 = arith.constant 0 : index
    %50 = vector.load %arg4[%c0_39, %c0_40, %c0_41] : memref<1x128x64xbf16, #tpu.memory_space<vmem>>, vector<1x128x64xbf16>
    %51 = vector.shape_cast %50 : vector<1x128x64xbf16> to vector<128x64xbf16>
    %52 = vector.shape_cast %49 : vector<128x64xbf16> to vector<1x128x64xbf16>
    tpu.vector_store %arg4[%c0_39, %c0_40, %c0_41], %52 {strides = array<i32>} : memref<1x128x64xbf16, #tpu.memory_space<vmem>>, vector<1x128x64xbf16>,
    return
  }
  func.func @transform_0(%arg0: i32) -> (i32, i32, i32) {
    %c0_i32 = arith.constant 0 : i32
    %c0_i32_0 = arith.constant 0 : i32
    %c0_i32_1 = arith.constant 0 : i32
    return %arg0, %c0_i32, %c0_i32_0 : i32, i32, i32
  }
  func.func @transform_1(%arg0: i32) -> (i32, i32) {
    %c0_i32 = arith.constant 0 : i32
    %c0_i32_0 = arith.constant 0 : i32
    %c0_i32_1 = arith.constant 0 : i32
    return %c0_i32, %c0_i32_0 : i32, i32
  }
  func.func @transform_2(%arg0: i32) -> (i32, i32) {
    %c0_i32 = arith.constant 0 : i32
    %c0_i32_0 = arith.constant 0 : i32
    %c0_i32_1 = arith.constant 0 : i32
    return %c0_i32, %c0_i32_0 : i32, i32
  }
  func.func @transform_3(%arg0: i32) -> (i32, i32, i32) {
    %c0_i32 = arith.constant 0 : i32
    %c0_i32_0 = arith.constant 0 : i32
    %c0_i32_1 = arith.constant 0 : i32
    return %arg0, %c0_i32, %c0_i32_0 : i32, i32, i32
  }
}

module attributes {stable_mosaic.version = 11 : i64} {
  func.func @_mm2_kernel(%arg0: i32, %arg1: memref<128x32xbf16, #tpu.memory_space<vmem>>, %arg2: memref<32x32xbf16, #tpu.memory_space<vmem>>, %arg3: memref<1x32xf32, #tpu.memory_space<vmem>>, %arg4: memref<32x8xbf16, #tpu.memory_space<vmem>>, %arg5: memref<1x8xf32, #tpu.memory_space<vmem>>, %arg6: memref<128x8xf32, #tpu.memory_space<vmem>>) attributes {dimension_semantics = [#tpu.dimension_semantics<parallel>], iteration_bounds = array<i64: 1>, scalar_prefetch = 0 : i64, scratch_operands = 0 : i64, tpu.core_type = #tpu.core_type<tc>, window_params = [{transform_indices = @transform_0, window_bounds = array<i64: 128, 32>}, {pipeline_mode = #tpu.pipeline_mode<synchronous>, transform_indices = @transform_1, window_bounds = array<i64: 32, 32>}, {pipeline_mode = #tpu.pipeline_mode<synchronous>, transform_indices = @transform_2, window_bounds = array<i64: 1, 32>}, {pipeline_mode = #tpu.pipeline_mode<synchronous>, transform_indices = @transform_3, window_bounds = array<i64: 32, 8>}, {pipeline_mode = #tpu.pipeline_mode<synchronous>, transform_indices = @transform_4, window_bounds = array<i64: 1, 8>}, {transform_indices = @transform_5, window_bounds = array<i64: 128, 8>}]} {
    %c0 = arith.constant 0 : index
    %c0_0 = arith.constant 0 : index
    %0 = vector.load %arg1[%c0, %c0_0] : memref<128x32xbf16, #tpu.memory_space<vmem>>, vector<128x32xbf16>
    %c0_1 = arith.constant 0 : index
    %c0_2 = arith.constant 0 : index
    %1 = vector.load %arg2[%c0_1, %c0_2] : memref<32x32xbf16, #tpu.memory_space<vmem>>, vector<32x32xbf16>
    %cst = arith.constant dense<0.000000e+00> : vector<128x32xf32>
    %2 = tpu.matmul %0, %1, %cst {dimension_numbers = #tpu.dot_dimension_numbers<[1], [0], [0], [1], [0, 0, 1, 1], [], []>} : vector<128x32xbf16>, vector<32x32xbf16>, vector<128x32xf32> -> vector<128x32xf32>
    %c0_3 = arith.constant 0 : index
    %c0_4 = arith.constant 0 : index
    %3 = vector.load %arg3[%c0_3, %c0_4] : memref<1x32xf32, #tpu.memory_space<vmem>>, vector<1x32xf32>
    %4 = vector.broadcast %3 : vector<1x32xf32> to vector<128x32xf32>
    %5 = arith.addf %2, %4 : vector<128x32xf32>
    %cst_5 = arith.constant 0.000000e+00 : f32
    %6 = vector.broadcast %cst_5 : f32 to vector<128x32xf32>
    %7 = arith.maximumf %5, %6 : vector<128x32xf32>
    %8 = arith.truncf %7 : vector<128x32xf32> to vector<128x32xbf16>
    %c0_6 = arith.constant 0 : index
    %c0_7 = arith.constant 0 : index
    %9 = vector.load %arg4[%c0_6, %c0_7] : memref<32x8xbf16, #tpu.memory_space<vmem>>, vector<32x8xbf16>
    %cst_8 = arith.constant dense<0.000000e+00> : vector<128x8xf32>
    %10 = tpu.matmul %8, %9, %cst_8 {dimension_numbers = #tpu.dot_dimension_numbers<[1], [0], [0], [1], [0, 0, 1, 1], [], []>} : vector<128x32xbf16>, vector<32x8xbf16>, vector<128x8xf32> -> vector<128x8xf32>
    %c0_9 = arith.constant 0 : index
    %c0_10 = arith.constant 0 : index
    %11 = vector.load %arg5[%c0_9, %c0_10] : memref<1x8xf32, #tpu.memory_space<vmem>>, vector<1x8xf32>
    %12 = vector.broadcast %11 : vector<1x8xf32> to vector<128x8xf32>
    %13 = arith.addf %10, %12 : vector<128x8xf32>
    %c0_11 = arith.constant 0 : index
    %c0_12 = arith.constant 0 : index
    %14 = vector.load %arg6[%c0_11, %c0_12] : memref<128x8xf32, #tpu.memory_space<vmem>>, vector<128x8xf32>
    tpu.vector_store %arg6[%c0_11, %c0_12], %13 {strides = array<i32>} : memref<128x8xf32, #tpu.memory_space<vmem>>, vector<128x8xf32>,
    return
  }
  func.func @transform_0(%arg0: i32) -> (i32, i32) {
    %c0_i32 = arith.constant 0 : i32
    %c0_i32_0 = arith.constant 0 : i32
    return %arg0, %c0_i32 : i32, i32
  }
  func.func @transform_1(%arg0: i32) -> (i32, i32) {
    %c0_i32 = arith.constant 0 : i32
    %c0_i32_0 = arith.constant 0 : i32
    %c0_i32_1 = arith.constant 0 : i32
    return %c0_i32, %c0_i32_0 : i32, i32
  }
  func.func @transform_2(%arg0: i32) -> (i32, i32) {
    %c0_i32 = arith.constant 0 : i32
    %c0_i32_0 = arith.constant 0 : i32
    %c0_i32_1 = arith.constant 0 : i32
    return %c0_i32, %c0_i32_0 : i32, i32
  }
  func.func @transform_3(%arg0: i32) -> (i32, i32) {
    %c0_i32 = arith.constant 0 : i32
    %c0_i32_0 = arith.constant 0 : i32
    %c0_i32_1 = arith.constant 0 : i32
    return %c0_i32, %c0_i32_0 : i32, i32
  }
  func.func @transform_4(%arg0: i32) -> (i32, i32) {
    %c0_i32 = arith.constant 0 : i32
    %c0_i32_0 = arith.constant 0 : i32
    %c0_i32_1 = arith.constant 0 : i32
    return %c0_i32, %c0_i32_0 : i32, i32
  }
  func.func @transform_5(%arg0: i32) -> (i32, i32) {
    %c0_i32 = arith.constant 0 : i32
    %c0_i32_0 = arith.constant 0 : i32
    return %arg0, %c0_i32 : i32, i32
  }
}

module attributes {stable_mosaic.version = 11 : i64} {
  func.func @_obj_down_kernel(%arg0: i32, %arg1: memref<16x64xbf16, #tpu.memory_space<vmem>>, %arg2: memref<64x32xbf16, #tpu.memory_space<vmem>>, %arg3: memref<1x32xf32, #tpu.memory_space<vmem>>, %arg4: memref<32x32xbf16, #tpu.memory_space<vmem>>, %arg5: memref<1x32xf32, #tpu.memory_space<vmem>>, %arg6: memref<64x32xbf16, #tpu.memory_space<vmem>>, %arg7: memref<1x32xf32, #tpu.memory_space<vmem>>, %arg8: memref<16x32xbf16, #tpu.memory_space<vmem>>, %arg9: memref<16x32xbf16, #tpu.memory_space<vmem>>) attributes {dimension_semantics = [#tpu.dimension_semantics<arbitrary>], iteration_bounds = array<i64: 1>, scalar_prefetch = 0 : i64, scratch_operands = 0 : i64, tpu.core_type = #tpu.core_type<tc>, window_params = [{pipeline_mode = #tpu.pipeline_mode<synchronous>, transform_indices = @transform_0, window_bounds = array<i64: 16, 64>}, {pipeline_mode = #tpu.pipeline_mode<synchronous>, transform_indices = @transform_1, window_bounds = array<i64: 64, 32>}, {pipeline_mode = #tpu.pipeline_mode<synchronous>, transform_indices = @transform_2, window_bounds = array<i64: 1, 32>}, {pipeline_mode = #tpu.pipeline_mode<synchronous>, transform_indices = @transform_3, window_bounds = array<i64: 32, 32>}, {pipeline_mode = #tpu.pipeline_mode<synchronous>, transform_indices = @transform_4, window_bounds = array<i64: 1, 32>}, {pipeline_mode = #tpu.pipeline_mode<synchronous>, transform_indices = @transform_5, window_bounds = array<i64: 64, 32>}, {pipeline_mode = #tpu.pipeline_mode<synchronous>, transform_indices = @transform_6, window_bounds = array<i64: 1, 32>}, {pipeline_mode = #tpu.pipeline_mode<synchronous>, transform_indices = @transform_7, window_bounds = array<i64: 16, 32>}, {pipeline_mode = #tpu.pipeline_mode<synchronous>, transform_indices = @transform_8, window_bounds = array<i64: 16, 32>}]} {
    %c0 = arith.constant 0 : index
    %c0_0 = arith.constant 0 : index
    %0 = vector.load %arg1[%c0, %c0_0] : memref<16x64xbf16, #tpu.memory_space<vmem>>, vector<16x64xbf16>
    %c0_1 = arith.constant 0 : index
    %c0_2 = arith.constant 0 : index
    %1 = vector.load %arg2[%c0_1, %c0_2] : memref<64x32xbf16, #tpu.memory_space<vmem>>, vector<64x32xbf16>
    %cst = arith.constant dense<0.000000e+00> : vector<16x32xf32>
    %2 = tpu.matmul %0, %1, %cst {dimension_numbers = #tpu.dot_dimension_numbers<[1], [0], [0], [1], [0, 0, 1, 1], [], []>} : vector<16x64xbf16>, vector<64x32xbf16>, vector<16x32xf32> -> vector<16x32xf32>
    %c0_3 = arith.constant 0 : index
    %c0_4 = arith.constant 0 : index
    %3 = vector.load %arg3[%c0_3, %c0_4] : memref<1x32xf32, #tpu.memory_space<vmem>>, vector<1x32xf32>
    %4 = vector.broadcast %3 : vector<1x32xf32> to vector<16x32xf32>
    %5 = arith.addf %2, %4 : vector<16x32xf32>
    %cst_5 = arith.constant 0.000000e+00 : f32
    %6 = vector.broadcast %cst_5 : f32 to vector<16x32xf32>
    %7 = arith.maximumf %5, %6 : vector<16x32xf32>
    %8 = arith.truncf %7 : vector<16x32xf32> to vector<16x32xbf16>
    %c0_6 = arith.constant 0 : index
    %c0_7 = arith.constant 0 : index
    %9 = vector.load %arg4[%c0_6, %c0_7] : memref<32x32xbf16, #tpu.memory_space<vmem>>, vector<32x32xbf16>
    %cst_8 = arith.constant dense<0.000000e+00> : vector<16x32xf32>
    %10 = tpu.matmul %8, %9, %cst_8 {dimension_numbers = #tpu.dot_dimension_numbers<[1], [0], [0], [1], [0, 0, 1, 1], [], []>} : vector<16x32xbf16>, vector<32x32xbf16>, vector<16x32xf32> -> vector<16x32xf32>
    %c0_9 = arith.constant 0 : index
    %c0_10 = arith.constant 0 : index
    %11 = vector.load %arg5[%c0_9, %c0_10] : memref<1x32xf32, #tpu.memory_space<vmem>>, vector<1x32xf32>
    %12 = vector.broadcast %11 : vector<1x32xf32> to vector<16x32xf32>
    %13 = arith.addf %10, %12 : vector<16x32xf32>
    %cst_11 = arith.constant 0.000000e+00 : f32
    %14 = vector.broadcast %cst_11 : f32 to vector<16x32xf32>
    %15 = arith.maximumf %13, %14 : vector<16x32xf32>
    %c0_12 = arith.constant 0 : index
    %c0_13 = arith.constant 0 : index
    %16 = vector.load %arg6[%c0_12, %c0_13] : memref<64x32xbf16, #tpu.memory_space<vmem>>, vector<64x32xbf16>
    %cst_14 = arith.constant dense<0.000000e+00> : vector<16x32xf32>
    %17 = tpu.matmul %0, %16, %cst_14 {dimension_numbers = #tpu.dot_dimension_numbers<[1], [0], [0], [1], [0, 0, 1, 1], [], []>} : vector<16x64xbf16>, vector<64x32xbf16>, vector<16x32xf32> -> vector<16x32xf32>
    %c0_15 = arith.constant 0 : index
    %c0_16 = arith.constant 0 : index
    %18 = vector.load %arg7[%c0_15, %c0_16] : memref<1x32xf32, #tpu.memory_space<vmem>>, vector<1x32xf32>
    %19 = vector.broadcast %18 : vector<1x32xf32> to vector<16x32xf32>
    %20 = arith.addf %17, %19 : vector<16x32xf32>
    %cst_17 = arith.constant 0.000000e+00 : f32
    %21 = vector.broadcast %cst_17 : f32 to vector<16x32xf32>
    %22 = arith.maximumf %20, %21 : vector<16x32xf32>
    %23 = arith.truncf %15 : vector<16x32xf32> to vector<16x32xbf16>
    %c0_18 = arith.constant 0 : index
    %c0_19 = arith.constant 0 : index
    %24 = vector.load %arg8[%c0_18, %c0_19] : memref<16x32xbf16, #tpu.memory_space<vmem>>, vector<16x32xbf16>
    tpu.vector_store %arg8[%c0_18, %c0_19], %23 {strides = array<i32>} : memref<16x32xbf16, #tpu.memory_space<vmem>>, vector<16x32xbf16>,
    %25 = arith.truncf %22 : vector<16x32xf32> to vector<16x32xbf16>
    %c0_20 = arith.constant 0 : index
    %c0_21 = arith.constant 0 : index
    %26 = vector.load %arg9[%c0_20, %c0_21] : memref<16x32xbf16, #tpu.memory_space<vmem>>, vector<16x32xbf16>
    tpu.vector_store %arg9[%c0_20, %c0_21], %25 {strides = array<i32>} : memref<16x32xbf16, #tpu.memory_space<vmem>>, vector<16x32xbf16>,
    return
  }
  func.func @transform_0(%arg0: i32) -> (i32, i32) {
    %c0_i32 = arith.constant 0 : i32
    %c0_i32_0 = arith.constant 0 : i32
    %c0_i32_1 = arith.constant 0 : i32
    return %c0_i32, %c0_i32_0 : i32, i32
  }
  func.func @transform_1(%arg0: i32) -> (i32, i32) {
    %c0_i32 = arith.constant 0 : i32
    %c0_i32_0 = arith.constant 0 : i32
    %c0_i32_1 = arith.constant 0 : i32
    return %c0_i32, %c0_i32_0 : i32, i32
  }
  func.func @transform_2(%arg0: i32) -> (i32, i32) {
    %c0_i32 = arith.constant 0 : i32
    %c0_i32_0 = arith.constant 0 : i32
    %c0_i32_1 = arith.constant 0 : i32
    return %c0_i32, %c0_i32_0 : i32, i32
  }
  func.func @transform_3(%arg0: i32) -> (i32, i32) {
    %c0_i32 = arith.constant 0 : i32
    %c0_i32_0 = arith.constant 0 : i32
    %c0_i32_1 = arith.constant 0 : i32
    return %c0_i32, %c0_i32_0 : i32, i32
  }
  func.func @transform_4(%arg0: i32) -> (i32, i32) {
    %c0_i32 = arith.constant 0 : i32
    %c0_i32_0 = arith.constant 0 : i32
    %c0_i32_1 = arith.constant 0 : i32
    return %c0_i32, %c0_i32_0 : i32, i32
  }
  func.func @transform_5(%arg0: i32) -> (i32, i32) {
    %c0_i32 = arith.constant 0 : i32
    %c0_i32_0 = arith.constant 0 : i32
    %c0_i32_1 = arith.constant 0 : i32
    return %c0_i32, %c0_i32_0 : i32, i32
  }
  func.func @transform_6(%arg0: i32) -> (i32, i32) {
    %c0_i32 = arith.constant 0 : i32
    %c0_i32_0 = arith.constant 0 : i32
    %c0_i32_1 = arith.constant 0 : i32
    return %c0_i32, %c0_i32_0 : i32, i32
  }
  func.func @transform_7(%arg0: i32) -> (i32, i32) {
    %c0_i32 = arith.constant 0 : i32
    %c0_i32_0 = arith.constant 0 : i32
    %c0_i32_1 = arith.constant 0 : i32
    return %c0_i32, %c0_i32_0 : i32, i32
  }
  func.func @transform_8(%arg0: i32) -> (i32, i32) {
    %c0_i32 = arith.constant 0 : i32
    %c0_i32_0 = arith.constant 0 : i32
    %c0_i32_1 = arith.constant 0 : i32
    return %c0_i32, %c0_i32_0 : i32, i32
  }
}

module attributes {stable_mosaic.version = 11 : i64} {
  func.func @_gather_kernel(%arg0: i32, %arg1: i32, %arg2: memref<1x8x64xf32, #tpu.memory_space<vmem>>, %arg3: memref<1x64x64xbf16, #tpu.memory_space<vmem>>, %arg4: memref<1x8x64xbf16, #tpu.memory_space<vmem>>, %arg5: memref<8x1xf32, #tpu.memory_space<vmem>>, %arg6: memref<8x1xf32, #tpu.memory_space<vmem>>, %arg7: memref<8x64xf32, #tpu.memory_space<vmem>>) attributes {dimension_semantics = [#tpu.dimension_semantics<parallel>, #tpu.dimension_semantics<arbitrary>], iteration_bounds = array<i64: 2, 1>, scalar_prefetch = 0 : i64, scratch_operands = 3 : i64, tpu.core_type = #tpu.core_type<tc>, window_params = [{transform_indices = @transform_0, window_bounds = array<i64: 1, 8, 64>}, {transform_indices = @transform_1, window_bounds = array<i64: 1, 64, 64>}, {transform_indices = @transform_2, window_bounds = array<i64: 1, 8, 64>}]} {
    %c0_i32 = arith.constant 0 : i32
    %0 = arith.cmpi eq, %arg1, %c0_i32 : i32
    %1 = arith.extui %0 : i1 to i32
    %c0_i32_0 = arith.constant 0 : i32
    %2 = arith.cmpi ne, %1, %c0_i32_0 : i32
    scf.if %2 {
      %cst_24 = arith.constant 0xFF800000 : f32
      %34 = vector.broadcast %cst_24 : f32 to vector<8x1xf32>
      %c0_25 = arith.constant 0 : index
      %c0_26 = arith.constant 0 : index
      %35 = vector.load %arg5[%c0_25, %c0_26] : memref<8x1xf32, #tpu.memory_space<vmem>>, vector<8x1xf32>
      tpu.vector_store %arg5[%c0_25, %c0_26], %34 {strides = array<i32>} : memref<8x1xf32, #tpu.memory_space<vmem>>, vector<8x1xf32>,
      %cst_27 = arith.constant 0.000000e+00 : f32
      %36 = vector.broadcast %cst_27 : f32 to vector<8x1xf32>
      %c0_28 = arith.constant 0 : index
      %c0_29 = arith.constant 0 : index
      %37 = vector.load %arg6[%c0_28, %c0_29] : memref<8x1xf32, #tpu.memory_space<vmem>>, vector<8x1xf32>
      tpu.vector_store %arg6[%c0_28, %c0_29], %36 {strides = array<i32>} : memref<8x1xf32, #tpu.memory_space<vmem>>, vector<8x1xf32>,
      %cst_30 = arith.constant 0.000000e+00 : f32
      %38 = vector.broadcast %cst_30 : f32 to vector<8x64xf32>
      %c0_31 = arith.constant 0 : index
      %c0_32 = arith.constant 0 : index
      %39 = vector.load %arg7[%c0_31, %c0_32] : memref<8x64xf32, #tpu.memory_space<vmem>>, vector<8x64xf32>
      tpu.vector_store %arg7[%c0_31, %c0_32], %38 {strides = array<i32>} : memref<8x64xf32, #tpu.memory_space<vmem>>, vector<8x64xf32>,
    } else {
    }
    %c0 = arith.constant 0 : index
    %c0_1 = arith.constant 0 : index
    %c0_2 = arith.constant 0 : index
    %3 = vector.load %arg2[%c0, %c0_1, %c0_2] : memref<1x8x64xf32, #tpu.memory_space<vmem>>, vector<1x8x64xf32>
    %4 = vector.shape_cast %3 : vector<1x8x64xf32> to vector<8x64xf32>
    %c0_3 = arith.constant 0 : index
    %c0_4 = arith.constant 0 : index
    %5 = vector.load %arg5[%c0_3, %c0_4] : memref<8x1xf32, #tpu.memory_space<vmem>>, vector<8x1xf32>
    %cst = arith.constant dense<0xFF800000> : vector<8xf32>
    %6 = vector.multi_reduction <maximumf>, %4, %cst [1] : vector<8x64xf32> to vector<8xf32>
    %7 = vector.shape_cast %6 : vector<8xf32> to vector<8x1xf32>
    %8 = arith.maximumf %5, %7 : vector<8x1xf32>
    %c0_5 = arith.constant 0 : index
    %c0_6 = arith.constant 0 : index
    %9 = vector.load %arg5[%c0_5, %c0_6] : memref<8x1xf32, #tpu.memory_space<vmem>>, vector<8x1xf32>
    %10 = arith.subf %9, %8 : vector<8x1xf32>
    %11 = math.exp %10 : vector<8x1xf32>
    %12 = vector.broadcast %8 : vector<8x1xf32> to vector<8x64xf32>
    %13 = arith.subf %4, %12 : vector<8x64xf32>
    %14 = math.exp %13 : vector<8x64xf32>
    %c0_7 = arith.constant 0 : index
    %c0_8 = arith.constant 0 : index
    %15 = vector.load %arg6[%c0_7, %c0_8] : memref<8x1xf32, #tpu.memory_space<vmem>>, vector<8x1xf32>
    %16 = arith.mulf %11, %15 : vector<8x1xf32>
    %cst_9 = arith.constant dense<0.000000e+00> : vector<8xf32>
    %17 = vector.multi_reduction <add>, %14, %cst_9 [1] : vector<8x64xf32> to vector<8xf32>
    %18 = vector.shape_cast %17 : vector<8xf32> to vector<8x1xf32>
    %19 = arith.addf %16, %18 : vector<8x1xf32>
    %c0_10 = arith.constant 0 : index
    %c0_11 = arith.constant 0 : index
    %20 = vector.load %arg6[%c0_10, %c0_11] : memref<8x1xf32, #tpu.memory_space<vmem>>, vector<8x1xf32>
    tpu.vector_store %arg6[%c0_10, %c0_11], %19 {strides = array<i32>} : memref<8x1xf32, #tpu.memory_space<vmem>>, vector<8x1xf32>,
    %c0_12 = arith.constant 0 : index
    %c0_13 = arith.constant 0 : index
    %21 = vector.load %arg7[%c0_12, %c0_13] : memref<8x64xf32, #tpu.memory_space<vmem>>, vector<8x64xf32>
    %22 = vector.broadcast %11 : vector<8x1xf32> to vector<8x64xf32>
    %23 = arith.mulf %22, %21 : vector<8x64xf32>
    %24 = arith.truncf %14 : vector<8x64xf32> to vector<8x64xbf16>
    %c0_14 = arith.constant 0 : index
    %c0_15 = arith.constant 0 : index
    %c0_16 = arith.constant 0 : index
    %25 = vector.load %arg3[%c0_14, %c0_15, %c0_16] : memref<1x64x64xbf16, #tpu.memory_space<vmem>>, vector<1x64x64xbf16>
    %26 = vector.shape_cast %25 : vector<1x64x64xbf16> to vector<64x64xbf16>
    %cst_17 = arith.constant dense<0.000000e+00> : vector<8x64xf32>
    %27 = tpu.matmul %24, %26, %cst_17 {dimension_numbers = #tpu.dot_dimension_numbers<[1], [0], [0], [1], [0, 0, 1, 1], [], []>} : vector<8x64xbf16>, vector<64x64xbf16>, vector<8x64xf32> -> vector<8x64xf32>
    %28 = arith.addf %23, %27 : vector<8x64xf32>
    %c0_18 = arith.constant 0 : index
    %c0_19 = arith.constant 0 : index
    %29 = vector.load %arg7[%c0_18, %c0_19] : memref<8x64xf32, #tpu.memory_space<vmem>>, vector<8x64xf32>
    tpu.vector_store %arg7[%c0_18, %c0_19], %28 {strides = array<i32>} : memref<8x64xf32, #tpu.memory_space<vmem>>, vector<8x64xf32>,
    %c0_20 = arith.constant 0 : index
    %c0_21 = arith.constant 0 : index
    %30 = vector.load %arg5[%c0_20, %c0_21] : memref<8x1xf32, #tpu.memory_space<vmem>>, vector<8x1xf32>
    tpu.vector_store %arg5[%c0_20, %c0_21], %8 {strides = array<i32>} : memref<8x1xf32, #tpu.memory_space<vmem>>, vector<8x1xf32>,
    %c0_i32_22 = arith.constant 0 : i32
    %31 = arith.cmpi eq, %arg1, %c0_i32_22 : i32
    %32 = arith.extui %31 : i1 to i32
    %c0_i32_23 = arith.constant 0 : i32
    %33 = arith.cmpi ne, %32, %c0_i32_23 : i32
    scf.if %33 {
      %c0_24 = arith.constant 0 : index
      %c0_25 = arith.constant 0 : index
      %34 = vector.load %arg7[%c0_24, %c0_25] : memref<8x64xf32, #tpu.memory_space<vmem>>, vector<8x64xf32>
      %c0_26 = arith.constant 0 : index
      %c0_27 = arith.constant 0 : index
      %35 = vector.load %arg6[%c0_26, %c0_27] : memref<8x1xf32, #tpu.memory_space<vmem>>, vector<8x1xf32>
      %36 = vector.broadcast %35 : vector<8x1xf32> to vector<8x64xf32>
      %37 = arith.divf %34, %36 : vector<8x64xf32>
      %38 = arith.truncf %37 : vector<8x64xf32> to vector<8x64xbf16>
      %c0_28 = arith.constant 0 : index
      %c0_29 = arith.constant 0 : index
      %c0_30 = arith.constant 0 : index
      %39 = vector.load %arg4[%c0_28, %c0_29, %c0_30] : memref<1x8x64xbf16, #tpu.memory_space<vmem>>, vector<1x8x64xbf16>
      %40 = vector.shape_cast %39 : vector<1x8x64xbf16> to vector<8x64xbf16>
      %41 = vector.shape_cast %38 : vector<8x64xbf16> to vector<1x8x64xbf16>
      tpu.vector_store %arg4[%c0_28, %c0_29, %c0_30], %41 {strides = array<i32>} : memref<1x8x64xbf16, #tpu.memory_space<vmem>>, vector<1x8x64xbf16>,
    } else {
    }
    return
  }
  func.func @transform_0(%arg0: i32, %arg1: i32) -> (i32, i32, i32) {
    %c0_i32 = arith.constant 0 : i32
    %c0_i32_0 = arith.constant 0 : i32
    return %arg0, %c0_i32, %arg1 : i32, i32, i32
  }
  func.func @transform_1(%arg0: i32, %arg1: i32) -> (i32, i32, i32) {
    %c0_i32 = arith.constant 0 : i32
    %c0_i32_0 = arith.constant 0 : i32
    return %arg0, %arg1, %c0_i32 : i32, i32, i32
  }
  func.func @transform_2(%arg0: i32, %arg1: i32) -> (i32, i32, i32) {
    %c0_i32 = arith.constant 0 : i32
    %c0_i32_0 = arith.constant 0 : i32
    %c0_i32_1 = arith.constant 0 : i32
    return %arg0, %c0_i32, %c0_i32_0 : i32, i32, i32
  }
}

module attributes {stable_mosaic.version = 11 : i64} {
  func.func @_mm2_kernel(%arg0: i32, %arg1: memref<128x64xbf16, #tpu.memory_space<vmem>>, %arg2: memref<64x32xbf16, #tpu.memory_space<vmem>>, %arg3: memref<1x32xf32, #tpu.memory_space<vmem>>, %arg4: memref<32x32xbf16, #tpu.memory_space<vmem>>, %arg5: memref<1x32xf32, #tpu.memory_space<vmem>>, %arg6: memref<128x32xbf16, #tpu.memory_space<vmem>>) attributes {dimension_semantics = [#tpu.dimension_semantics<parallel>], iteration_bounds = array<i64: 1>, scalar_prefetch = 0 : i64, scratch_operands = 0 : i64, tpu.core_type = #tpu.core_type<tc>, window_params = [{transform_indices = @transform_0, window_bounds = array<i64: 128, 64>}, {pipeline_mode = #tpu.pipeline_mode<synchronous>, transform_indices = @transform_1, window_bounds = array<i64: 64, 32>}, {pipeline_mode = #tpu.pipeline_mode<synchronous>, transform_indices = @transform_2, window_bounds = array<i64: 1, 32>}, {pipeline_mode = #tpu.pipeline_mode<synchronous>, transform_indices = @transform_3, window_bounds = array<i64: 32, 32>}, {pipeline_mode = #tpu.pipeline_mode<synchronous>, transform_indices = @transform_4, window_bounds = array<i64: 1, 32>}, {transform_indices = @transform_5, window_bounds = array<i64: 128, 32>}]} {
    %c0 = arith.constant 0 : index
    %c0_0 = arith.constant 0 : index
    %0 = vector.load %arg1[%c0, %c0_0] : memref<128x64xbf16, #tpu.memory_space<vmem>>, vector<128x64xbf16>
    %c0_1 = arith.constant 0 : index
    %c0_2 = arith.constant 0 : index
    %1 = vector.load %arg2[%c0_1, %c0_2] : memref<64x32xbf16, #tpu.memory_space<vmem>>, vector<64x32xbf16>
    %cst = arith.constant dense<0.000000e+00> : vector<128x32xf32>
    %2 = tpu.matmul %0, %1, %cst {dimension_numbers = #tpu.dot_dimension_numbers<[1], [0], [0], [1], [0, 0, 1, 1], [], []>} : vector<128x64xbf16>, vector<64x32xbf16>, vector<128x32xf32> -> vector<128x32xf32>
    %c0_3 = arith.constant 0 : index
    %c0_4 = arith.constant 0 : index
    %3 = vector.load %arg3[%c0_3, %c0_4] : memref<1x32xf32, #tpu.memory_space<vmem>>, vector<1x32xf32>
    %4 = vector.broadcast %3 : vector<1x32xf32> to vector<128x32xf32>
    %5 = arith.addf %2, %4 : vector<128x32xf32>
    %cst_5 = arith.constant 0.000000e+00 : f32
    %6 = vector.broadcast %cst_5 : f32 to vector<128x32xf32>
    %7 = arith.maximumf %5, %6 : vector<128x32xf32>
    %8 = arith.truncf %7 : vector<128x32xf32> to vector<128x32xbf16>
    %c0_6 = arith.constant 0 : index
    %c0_7 = arith.constant 0 : index
    %9 = vector.load %arg4[%c0_6, %c0_7] : memref<32x32xbf16, #tpu.memory_space<vmem>>, vector<32x32xbf16>
    %cst_8 = arith.constant dense<0.000000e+00> : vector<128x32xf32>
    %10 = tpu.matmul %8, %9, %cst_8 {dimension_numbers = #tpu.dot_dimension_numbers<[1], [0], [0], [1], [0, 0, 1, 1], [], []>} : vector<128x32xbf16>, vector<32x32xbf16>, vector<128x32xf32> -> vector<128x32xf32>
    %c0_9 = arith.constant 0 : index
    %c0_10 = arith.constant 0 : index
    %11 = vector.load %arg5[%c0_9, %c0_10] : memref<1x32xf32, #tpu.memory_space<vmem>>, vector<1x32xf32>
    %12 = vector.broadcast %11 : vector<1x32xf32> to vector<128x32xf32>
    %13 = arith.addf %10, %12 : vector<128x32xf32>
    %cst_11 = arith.constant 0.000000e+00 : f32
    %14 = vector.broadcast %cst_11 : f32 to vector<128x32xf32>
    %15 = arith.maximumf %13, %14 : vector<128x32xf32>
    %16 = arith.truncf %15 : vector<128x32xf32> to vector<128x32xbf16>
    %c0_12 = arith.constant 0 : index
    %c0_13 = arith.constant 0 : index
    %17 = vector.load %arg6[%c0_12, %c0_13] : memref<128x32xbf16, #tpu.memory_space<vmem>>, vector<128x32xbf16>
    tpu.vector_store %arg6[%c0_12, %c0_13], %16 {strides = array<i32>} : memref<128x32xbf16, #tpu.memory_space<vmem>>, vector<128x32xbf16>,
    return
  }
  func.func @transform_0(%arg0: i32) -> (i32, i32) {
    %c0_i32 = arith.constant 0 : i32
    %c0_i32_0 = arith.constant 0 : i32
    return %arg0, %c0_i32 : i32, i32
  }
  func.func @transform_1(%arg0: i32) -> (i32, i32) {
    %c0_i32 = arith.constant 0 : i32
    %c0_i32_0 = arith.constant 0 : i32
    %c0_i32_1 = arith.constant 0 : i32
    return %c0_i32, %c0_i32_0 : i32, i32
  }
  func.func @transform_2(%arg0: i32) -> (i32, i32) {
    %c0_i32 = arith.constant 0 : i32
    %c0_i32_0 = arith.constant 0 : i32
    %c0_i32_1 = arith.constant 0 : i32
    return %c0_i32, %c0_i32_0 : i32, i32
  }
  func.func @transform_3(%arg0: i32) -> (i32, i32) {
    %c0_i32 = arith.constant 0 : i32
    %c0_i32_0 = arith.constant 0 : i32
    %c0_i32_1 = arith.constant 0 : i32
    return %c0_i32, %c0_i32_0 : i32, i32
  }
  func.func @transform_4(%arg0: i32) -> (i32, i32) {
    %c0_i32 = arith.constant 0 : i32
    %c0_i32_0 = arith.constant 0 : i32
    %c0_i32_1 = arith.constant 0 : i32
    return %c0_i32, %c0_i32_0 : i32, i32
  }
  func.func @transform_5(%arg0: i32) -> (i32, i32) {
    %c0_i32 = arith.constant 0 : i32
    %c0_i32_0 = arith.constant 0 : i32
    return %arg0, %c0_i32 : i32, i32
  }
}

module attributes {stable_mosaic.version = 11 : i64} {
  func.func @_attn_kernel(%arg0: i32, %arg1: i32, %arg2: memref<1x64x32xbf16, #tpu.memory_space<vmem>>, %arg3: memref<1x8x32xbf16, #tpu.memory_space<vmem>>, %arg4: memref<1x8x32xbf16, #tpu.memory_space<vmem>>, %arg5: memref<1x64x32xbf16, #tpu.memory_space<vmem>>) attributes {dimension_semantics = [#tpu.dimension_semantics<parallel>, #tpu.dimension_semantics<parallel>], iteration_bounds = array<i64: 2, 1>, scalar_prefetch = 0 : i64, scratch_operands = 0 : i64, tpu.core_type = #tpu.core_type<tc>, window_params = [{transform_indices = @transform_0, window_bounds = array<i64: 1, 64, 32>}, {transform_indices = @transform_1, window_bounds = array<i64: 1, 8, 32>}, {transform_indices = @transform_2, window_bounds = array<i64: 1, 8, 32>}, {transform_indices = @transform_3, window_bounds = array<i64: 1, 64, 32>}]} {
    %c0 = arith.constant 0 : index
    %c0_0 = arith.constant 0 : index
    %c0_1 = arith.constant 0 : index
    %0 = vector.load %arg2[%c0, %c0_0, %c0_1] : memref<1x64x32xbf16, #tpu.memory_space<vmem>>, vector<1x64x32xbf16>
    %1 = vector.shape_cast %0 : vector<1x64x32xbf16> to vector<64x32xbf16>
    %c0_2 = arith.constant 0 : index
    %c0_3 = arith.constant 0 : index
    %c0_4 = arith.constant 0 : index
    %2 = vector.load %arg3[%c0_2, %c0_3, %c0_4] : memref<1x8x32xbf16, #tpu.memory_space<vmem>>, vector<1x8x32xbf16>
    %3 = vector.shape_cast %2 : vector<1x8x32xbf16> to vector<8x32xbf16>
    %cst = arith.constant dense<0.000000e+00> : vector<64x8xf32>
    %4 = tpu.matmul %1, %3, %cst {dimension_numbers = #tpu.dot_dimension_numbers<[1], [1], [0], [0], [0, 0, 1, 0], [], []>} : vector<64x32xbf16>, vector<8x32xbf16>, vector<64x8xf32> -> vector<64x8xf32>
    %cst_5 = arith.constant dense<0xFF800000> : vector<64xf32>
    %5 = vector.multi_reduction <maximumf>, %4, %cst_5 [1] : vector<64x8xf32> to vector<64xf32>
    %6 = vector.shape_cast %5 : vector<64xf32> to vector<64x1xf32>
    %7 = vector.broadcast %6 : vector<64x1xf32> to vector<64x8xf32>
    %8 = arith.subf %4, %7 : vector<64x8xf32>
    %9 = math.exp %8 : vector<64x8xf32>
    %cst_6 = arith.constant dense<0.000000e+00> : vector<64xf32>
    %10 = vector.multi_reduction <add>, %9, %cst_6 [1] : vector<64x8xf32> to vector<64xf32>
    %11 = vector.shape_cast %10 : vector<64xf32> to vector<64x1xf32>
    %12 = vector.broadcast %11 : vector<64x1xf32> to vector<64x8xf32>
    %13 = arith.divf %9, %12 : vector<64x8xf32>
    %14 = arith.truncf %13 : vector<64x8xf32> to vector<64x8xbf16>
    %c0_7 = arith.constant 0 : index
    %c0_8 = arith.constant 0 : index
    %c0_9 = arith.constant 0 : index
    %15 = vector.load %arg4[%c0_7, %c0_8, %c0_9] : memref<1x8x32xbf16, #tpu.memory_space<vmem>>, vector<1x8x32xbf16>
    %16 = vector.shape_cast %15 : vector<1x8x32xbf16> to vector<8x32xbf16>
    %cst_10 = arith.constant dense<0.000000e+00> : vector<64x32xf32>
    %17 = tpu.matmul %14, %16, %cst_10 {dimension_numbers = #tpu.dot_dimension_numbers<[1], [0], [0], [1], [0, 0, 1, 1], [], []>} : vector<64x8xbf16>, vector<8x32xbf16>, vector<64x32xf32> -> vector<64x32xf32>
    %18 = arith.truncf %17 : vector<64x32xf32> to vector<64x32xbf16>
    %c0_11 = arith.constant 0 : index
    %c0_12 = arith.constant 0 : index
    %c0_13 = arith.constant 0 : index
    %19 = vector.load %arg5[%c0_11, %c0_12, %c0_13] : memref<1x64x32xbf16, #tpu.memory_space<vmem>>, vector<1x64x32xbf16>
    %20 = vector.shape_cast %19 : vector<1x64x32xbf16> to vector<64x32xbf16>
    %21 = vector.shape_cast %18 : vector<64x32xbf16> to vector<1x64x32xbf16>
    tpu.vector_store %arg5[%c0_11, %c0_12, %c0_13], %21 {strides = array<i32>} : memref<1x64x32xbf16, #tpu.memory_space<vmem>>, vector<1x64x32xbf16>,
    return
  }
  func.func @transform_0(%arg0: i32, %arg1: i32) -> (i32, i32, i32) {
    %c0_i32 = arith.constant 0 : i32
    %c0_i32_0 = arith.constant 0 : i32
    return %arg0, %arg1, %c0_i32 : i32, i32, i32
  }
  func.func @transform_1(%arg0: i32, %arg1: i32) -> (i32, i32, i32) {
    %c0_i32 = arith.constant 0 : i32
    %c0_i32_0 = arith.constant 0 : i32
    %c0_i32_1 = arith.constant 0 : i32
    return %arg0, %c0_i32, %c0_i32_0 : i32, i32, i32
  }
  func.func @transform_2(%arg0: i32, %arg1: i32) -> (i32, i32, i32) {
    %c0_i32 = arith.constant 0 : i32
    %c0_i32_0 = arith.constant 0 : i32
    %c0_i32_1 = arith.constant 0 : i32
    return %arg0, %c0_i32, %c0_i32_0 : i32, i32, i32
  }
  func.func @transform_3(%arg0: i32, %arg1: i32) -> (i32, i32, i32) {
    %c0_i32 = arith.constant 0 : i32
    %c0_i32_0 = arith.constant 0 : i32
    return %arg0, %arg1, %c0_i32 : i32, i32, i32
  }
}

module attributes {stable_mosaic.version = 11 : i64} {
  func.func @_fuse_cls_kernel(%arg0: i32, %arg1: memref<128x32xbf16, #tpu.memory_space<vmem>>, %arg2: memref<128x64xbf16, #tpu.memory_space<vmem>>, %arg3: memref<32x64xbf16, #tpu.memory_space<vmem>>, %arg4: memref<1x64xf32, #tpu.memory_space<vmem>>, %arg5: memref<64x64xbf16, #tpu.memory_space<vmem>>, %arg6: memref<64x64xbf16, #tpu.memory_space<vmem>>, %arg7: memref<1x64xf32, #tpu.memory_space<vmem>>, %arg8: memref<64x8xbf16, #tpu.memory_space<vmem>>, %arg9: memref<1x8xf32, #tpu.memory_space<vmem>>, %arg10: memref<128x8xf32, #tpu.memory_space<vmem>>) attributes {dimension_semantics = [#tpu.dimension_semantics<parallel>], iteration_bounds = array<i64: 1>, scalar_prefetch = 0 : i64, scratch_operands = 0 : i64, tpu.core_type = #tpu.core_type<tc>, window_params = [{transform_indices = @transform_0, window_bounds = array<i64: 128, 32>}, {transform_indices = @transform_1, window_bounds = array<i64: 128, 64>}, {pipeline_mode = #tpu.pipeline_mode<synchronous>, transform_indices = @transform_2, window_bounds = array<i64: 32, 64>}, {pipeline_mode = #tpu.pipeline_mode<synchronous>, transform_indices = @transform_3, window_bounds = array<i64: 1, 64>}, {pipeline_mode = #tpu.pipeline_mode<synchronous>, transform_indices = @transform_4, window_bounds = array<i64: 64, 64>}, {pipeline_mode = #tpu.pipeline_mode<synchronous>, transform_indices = @transform_5, window_bounds = array<i64: 64, 64>}, {pipeline_mode = #tpu.pipeline_mode<synchronous>, transform_indices = @transform_6, window_bounds = array<i64: 1, 64>}, {pipeline_mode = #tpu.pipeline_mode<synchronous>, transform_indices = @transform_7, window_bounds = array<i64: 64, 8>}, {pipeline_mode = #tpu.pipeline_mode<synchronous>, transform_indices = @transform_8, window_bounds = array<i64: 1, 8>}, {transform_indices = @transform_9, window_bounds = array<i64: 128, 8>}]} {
    %c0 = arith.constant 0 : index
    %c0_0 = arith.constant 0 : index
    %0 = vector.load %arg1[%c0, %c0_0] : memref<128x32xbf16, #tpu.memory_space<vmem>>, vector<128x32xbf16>
    %c0_1 = arith.constant 0 : index
    %c0_2 = arith.constant 0 : index
    %1 = vector.load %arg3[%c0_1, %c0_2] : memref<32x64xbf16, #tpu.memory_space<vmem>>, vector<32x64xbf16>
    %cst = arith.constant dense<0.000000e+00> : vector<128x64xf32>
    %2 = tpu.matmul %0, %1, %cst {dimension_numbers = #tpu.dot_dimension_numbers<[1], [0], [0], [1], [0, 0, 1, 1], [], []>} : vector<128x32xbf16>, vector<32x64xbf16>, vector<128x64xf32> -> vector<128x64xf32>
    %c0_3 = arith.constant 0 : index
    %c0_4 = arith.constant 0 : index
    %3 = vector.load %arg4[%c0_3, %c0_4] : memref<1x64xf32, #tpu.memory_space<vmem>>, vector<1x64xf32>
    %4 = vector.broadcast %3 : vector<1x64xf32> to vector<128x64xf32>
    %5 = arith.addf %2, %4 : vector<128x64xf32>
    %cst_5 = arith.constant 0.000000e+00 : f32
    %6 = vector.broadcast %cst_5 : f32 to vector<128x64xf32>
    %7 = arith.maximumf %5, %6 : vector<128x64xf32>
    %8 = arith.truncf %7 : vector<128x64xf32> to vector<128x64xbf16>
    %c0_6 = arith.constant 0 : index
    %c0_7 = arith.constant 0 : index
    %9 = vector.load %arg5[%c0_6, %c0_7] : memref<64x64xbf16, #tpu.memory_space<vmem>>, vector<64x64xbf16>
    %cst_8 = arith.constant dense<0.000000e+00> : vector<128x64xf32>
    %10 = tpu.matmul %8, %9, %cst_8 {dimension_numbers = #tpu.dot_dimension_numbers<[1], [0], [0], [1], [0, 0, 1, 1], [], []>} : vector<128x64xbf16>, vector<64x64xbf16>, vector<128x64xf32> -> vector<128x64xf32>
    %c0_9 = arith.constant 0 : index
    %c0_10 = arith.constant 0 : index
    %11 = vector.load %arg2[%c0_9, %c0_10] : memref<128x64xbf16, #tpu.memory_space<vmem>>, vector<128x64xbf16>
    %c0_11 = arith.constant 0 : index
    %c0_12 = arith.constant 0 : index
    %12 = vector.load %arg6[%c0_11, %c0_12] : memref<64x64xbf16, #tpu.memory_space<vmem>>, vector<64x64xbf16>
    %cst_13 = arith.constant dense<0.000000e+00> : vector<128x64xf32>
    %13 = tpu.matmul %11, %12, %cst_13 {dimension_numbers = #tpu.dot_dimension_numbers<[1], [0], [0], [1], [0, 0, 1, 1], [], []>} : vector<128x64xbf16>, vector<64x64xbf16>, vector<128x64xf32> -> vector<128x64xf32>
    %14 = arith.addf %10, %13 : vector<128x64xf32>
    %c0_14 = arith.constant 0 : index
    %c0_15 = arith.constant 0 : index
    %15 = vector.load %arg7[%c0_14, %c0_15] : memref<1x64xf32, #tpu.memory_space<vmem>>, vector<1x64xf32>
    %16 = vector.broadcast %15 : vector<1x64xf32> to vector<128x64xf32>
    %17 = arith.addf %14, %16 : vector<128x64xf32>
    %cst_16 = arith.constant 0.000000e+00 : f32
    %18 = vector.broadcast %cst_16 : f32 to vector<128x64xf32>
    %19 = arith.maximumf %17, %18 : vector<128x64xf32>
    %20 = arith.truncf %19 : vector<128x64xf32> to vector<128x64xbf16>
    %c0_17 = arith.constant 0 : index
    %c0_18 = arith.constant 0 : index
    %21 = vector.load %arg8[%c0_17, %c0_18] : memref<64x8xbf16, #tpu.memory_space<vmem>>, vector<64x8xbf16>
    %cst_19 = arith.constant dense<0.000000e+00> : vector<128x8xf32>
    %22 = tpu.matmul %20, %21, %cst_19 {dimension_numbers = #tpu.dot_dimension_numbers<[1], [0], [0], [1], [0, 0, 1, 1], [], []>} : vector<128x64xbf16>, vector<64x8xbf16>, vector<128x8xf32> -> vector<128x8xf32>
    %c0_20 = arith.constant 0 : index
    %c0_21 = arith.constant 0 : index
    %23 = vector.load %arg9[%c0_20, %c0_21] : memref<1x8xf32, #tpu.memory_space<vmem>>, vector<1x8xf32>
    %24 = vector.broadcast %23 : vector<1x8xf32> to vector<128x8xf32>
    %25 = arith.addf %22, %24 : vector<128x8xf32>
    %c0_22 = arith.constant 0 : index
    %c0_23 = arith.constant 0 : index
    %26 = vector.load %arg10[%c0_22, %c0_23] : memref<128x8xf32, #tpu.memory_space<vmem>>, vector<128x8xf32>
    tpu.vector_store %arg10[%c0_22, %c0_23], %25 {strides = array<i32>} : memref<128x8xf32, #tpu.memory_space<vmem>>, vector<128x8xf32>,
    return
  }
  func.func @transform_0(%arg0: i32) -> (i32, i32) {
    %c0_i32 = arith.constant 0 : i32
    %c0_i32_0 = arith.constant 0 : i32
    return %arg0, %c0_i32 : i32, i32
  }
  func.func @transform_1(%arg0: i32) -> (i32, i32) {
    %c0_i32 = arith.constant 0 : i32
    %c0_i32_0 = arith.constant 0 : i32
    return %arg0, %c0_i32 : i32, i32
  }
  func.func @transform_2(%arg0: i32) -> (i32, i32) {
    %c0_i32 = arith.constant 0 : i32
    %c0_i32_0 = arith.constant 0 : i32
    %c0_i32_1 = arith.constant 0 : i32
    return %c0_i32, %c0_i32_0 : i32, i32
  }
  func.func @transform_3(%arg0: i32) -> (i32, i32) {
    %c0_i32 = arith.constant 0 : i32
    %c0_i32_0 = arith.constant 0 : i32
    %c0_i32_1 = arith.constant 0 : i32
    return %c0_i32, %c0_i32_0 : i32, i32
  }
  func.func @transform_4(%arg0: i32) -> (i32, i32) {
    %c0_i32 = arith.constant 0 : i32
    %c0_i32_0 = arith.constant 0 : i32
    %c0_i32_1 = arith.constant 0 : i32
    return %c0_i32, %c0_i32_0 : i32, i32
  }
  func.func @transform_5(%arg0: i32) -> (i32, i32) {
    %c0_i32 = arith.constant 0 : i32
    %c0_i32_0 = arith.constant 0 : i32
    %c0_i32_1 = arith.constant 0 : i32
    return %c0_i32, %c0_i32_0 : i32, i32
  }
  func.func @transform_6(%arg0: i32) -> (i32, i32) {
    %c0_i32 = arith.constant 0 : i32
    %c0_i32_0 = arith.constant 0 : i32
    %c0_i32_1 = arith.constant 0 : i32
    return %c0_i32, %c0_i32_0 : i32, i32
  }
  func.func @transform_7(%arg0: i32) -> (i32, i32) {
    %c0_i32 = arith.constant 0 : i32
    %c0_i32_0 = arith.constant 0 : i32
    %c0_i32_1 = arith.constant 0 : i32
    return %c0_i32, %c0_i32_0 : i32, i32
  }
  func.func @transform_8(%arg0: i32) -> (i32, i32) {
    %c0_i32 = arith.constant 0 : i32
    %c0_i32_0 = arith.constant 0 : i32
    %c0_i32_1 = arith.constant 0 : i32
    return %c0_i32, %c0_i32_0 : i32, i32
  }
  func.func @transform_9(%arg0: i32) -> (i32, i32) {
    %c0_i32 = arith.constant 0 : i32
    %c0_i32_0 = arith.constant 0 : i32
    return %arg0, %c0_i32 : i32, i32
  }
}

module attributes {stable_mosaic.version = 11 : i64} {
  func.func @_resize_kernel(%arg0: i32, %arg1: memref<1x8x8xf32, #tpu.memory_space<vmem>>, %arg2: memref<32x8xf32, #tpu.memory_space<vmem>>, %arg3: memref<32x8xf32, #tpu.memory_space<vmem>>, %arg4: memref<1x32x32xf32, #tpu.memory_space<vmem>>) attributes {dimension_semantics = [#tpu.dimension_semantics<parallel>], iteration_bounds = array<i64: 16>, scalar_prefetch = 0 : i64, scratch_operands = 0 : i64, tpu.core_type = #tpu.core_type<tc>, window_params = [{transform_indices = @transform_0, window_bounds = array<i64: 1, 8, 8>}, {pipeline_mode = #tpu.pipeline_mode<synchronous>, transform_indices = @transform_1, window_bounds = array<i64: 32, 8>}, {pipeline_mode = #tpu.pipeline_mode<synchronous>, transform_indices = @transform_2, window_bounds = array<i64: 32, 8>}, {transform_indices = @transform_3, window_bounds = array<i64: 1, 32, 32>}]} {
    %c0 = arith.constant 0 : index
    %c0_0 = arith.constant 0 : index
    %c0_1 = arith.constant 0 : index
    %0 = vector.load %arg1[%c0, %c0_0, %c0_1] : memref<1x8x8xf32, #tpu.memory_space<vmem>>, vector<1x8x8xf32>
    %1 = vector.shape_cast %0 : vector<1x8x8xf32> to vector<8x8xf32>
    %c0_2 = arith.constant 0 : index
    %c0_3 = arith.constant 0 : index
    %2 = vector.load %arg3[%c0_2, %c0_3] : memref<32x8xf32, #tpu.memory_space<vmem>>, vector<32x8xf32>
    %cst = arith.constant dense<0.000000e+00> : vector<8x32xf32>
    %3 = tpu.matmul %1, %2, %cst {dimension_numbers = #tpu.dot_dimension_numbers<[1], [1], [0], [0], [0, 0, 1, 0], [], []>} : vector<8x8xf32>, vector<32x8xf32>, vector<8x32xf32> -> vector<8x32xf32>
    %c0_4 = arith.constant 0 : index
    %c0_5 = arith.constant 0 : index
    %4 = vector.load %arg2[%c0_4, %c0_5] : memref<32x8xf32, #tpu.memory_space<vmem>>, vector<32x8xf32>
    %cst_6 = arith.constant dense<0.000000e+00> : vector<32x32xf32>
    %5 = tpu.matmul %4, %3, %cst_6 {dimension_numbers = #tpu.dot_dimension_numbers<[1], [0], [0], [1], [0, 0, 1, 1], [], []>} : vector<32x8xf32>, vector<8x32xf32>, vector<32x32xf32> -> vector<32x32xf32>
    %c0_7 = arith.constant 0 : index
    %c0_8 = arith.constant 0 : index
    %c0_9 = arith.constant 0 : index
    %6 = vector.load %arg4[%c0_7, %c0_8, %c0_9] : memref<1x32x32xf32, #tpu.memory_space<vmem>>, vector<1x32x32xf32>
    %7 = vector.shape_cast %6 : vector<1x32x32xf32> to vector<32x32xf32>
    %8 = vector.shape_cast %5 : vector<32x32xf32> to vector<1x32x32xf32>
    tpu.vector_store %arg4[%c0_7, %c0_8, %c0_9], %8 {strides = array<i32>} : memref<1x32x32xf32, #tpu.memory_space<vmem>>, vector<1x32x32xf32>,
    return
  }
  func.func @transform_0(%arg0: i32) -> (i32, i32, i32) {
    %c0_i32 = arith.constant 0 : i32
    %c0_i32_0 = arith.constant 0 : i32
    %c0_i32_1 = arith.constant 0 : i32
    return %arg0, %c0_i32, %c0_i32_0 : i32, i32, i32
  }
  func.func @transform_1(%arg0: i32) -> (i32, i32) {
    %c0_i32 = arith.constant 0 : i32
    %c0_i32_0 = arith.constant 0 : i32
    %c0_i32_1 = arith.constant 0 : i32
    return %c0_i32, %c0_i32_0 : i32, i32
  }
  func.func @transform_2(%arg0: i32) -> (i32, i32) {
    %c0_i32 = arith.constant 0 : i32
    %c0_i32_0 = arith.constant 0 : i32
    %c0_i32_1 = arith.constant 0 : i32
    return %c0_i32, %c0_i32_0 : i32, i32
  }
  func.func @transform_3(%arg0: i32) -> (i32, i32, i32) {
    %c0_i32 = arith.constant 0 : i32
    %c0_i32_0 = arith.constant 0 : i32
    %c0_i32_1 = arith.constant 0 : i32
    return %arg0, %c0_i32, %c0_i32_0 : i32, i32, i32
  }
}

</mosaic_0001>

<bundles_post_ra>
// kernel: ocrnet_forward.10
= control target key start
LH: loop header
LB: loop body
LE: loop exit
PB: predicated region body
PF: predicated region fallthrough
CT: control target
= control target key end

     0   :  { %s3624_s12 = smov 0   ;;  %s4156_s0 = inlined_call_operand.vmem [shape: bf16[2,432,12], index: 0, kind: input, shape index: {}]   ;;  %s4157_s1 = inlined_call_operand.vmem [shape: bf16[48,16], index: 1, kind: input, shape index: {}]   ;;  %s4158_s2 = inlined_call_operand.vmem [shape: f32[1,16], index: 2, kind: input, shape index: {}]   ;;  %s4159_s3 = inlined_call_operand.vmem [shape: bf16[2,384,16], index: 3, kind: output, shape index: {}]  }
   0x1 LB: > { %s2780_s13 = sadd.s32 4294967295, %s3602_s12   ;;  %p2784_p0 = scmp.ge.s32.totalorder %s3602_s12, 1  ;;  %s3602_s12 = sphi %s3624_s12, %s13_s12  }
   0x2   : > { %p137_p1 = scmp.lt.s32.totalorder %s3602_s12, 3 }
   0x4   : > { %p138_p2 = pnand %p2784_p0, %p137_p1 }
   0x5   : > { %vm624_vm0 = vcmask (!%p138_p2), 1045504   ;;  %p161_p3 = scmp.lt.s32.totalorder (!%p138_p2), %s2780_s13, 1  ;;  %v3518_v0 = vld [vmem:[%s4157_s1 + $0xc] sm:$0x3f] (!%p138_p2)   ;;  %v3521_v1 = vld [vmem:[%s4157_s1 + $0x4] sm:$0xfc] (!%p138_p2)  }
   0x6   : > { %141 = sbr.rel (%p138_p2) target bundleno = 434 (0x1b2), region = 32  ;;  %3506 = vmatprep.subr.msk.bf16.mxu0 (!%p138_p2), %vm624_vm0, %v3518_v0  ;;  %v1382_v2 = vsel (!%p138_p2), %vm624_vm0, %v3518_v0, 0  ;;  %v550_v3 = vrot.slane (!%p138_p2), %v3521_v1, 2  ;;  %v3524_v4 = vld [vmem:[%s4157_s1] sm:$0x3f] (!%p138_p2)   ;;  %vm551_vm1 = vcmask (!%p138_p2), 97280  }
   0x7   : > { %3261 = vmatpush3.bf16.msra.mxu0 (!%p138_p2), %v1382_v2  ;;  %v3525_v5 = vld [vmem:[%s4157_s1 + $0x10] sm:$0xfc] (!%p138_p2)   ;;  %vm348_vm2 = vsmask.f32 (!%p138_p2), 7424  ;;  %v907_v14 = vsel (!%p138_p2), %vm624_vm0, %v3524_v4, 0  ;;  %vm2676_vm3 = vcmask (!%p138_p2), 125952  }
   0x8   : > { %3504 = vmatprep.subr.msk.bf16.mxu1 (!%p138_p2), %vm624_vm0, %v550_v3  ;;  %v626_v6 = vsel (!%p138_p2), %vm624_vm0, %v550_v3, 0  ;;  %v2032_v8 = vrot.slane (!%p138_p2), %v3525_v5, 2 }
   0x9   : > { %3161 = vmatpush3.bf16.msra.mxu1 (!%p138_p2), %v626_v6 }
   0xa   : > { %3505 = vmatprep.subr.msk.bf16.mxu1 (!%p138_p2), %vm624_vm0, %v3524_v4  ;;  %3507 = vmatprep.subr.msk.bf16.mxu0 (!%p138_p2), %vm624_vm0, %v2032_v8  ;;  %v2106_v12 = vsel (!%p138_p2), %vm624_vm0, %v2032_v8, 0 }
   0xd   : > { %s4161_s13 = smov (!%p161_p3, %s2780_s13), 1 }
   0xe   : > { %s3508_s18 = smul.u32 216, %s4161_s13 }
   0xf   : > { %s3509_s28 = smul.u32 192, %s4161_s13 }
  0x10   : > { %s3652_s25 = scalar_lea.vmem %s4156_s0, %s3508_s18 }
  0x11   : > { %v3519_v7 = vld [vmem:[%s3652_s25 + $0xc] sm:$0xff]   ;;  %v3520_v9 = vld [vmem:[%s3652_s25 + $0x14] sm:$0xff]   ;;  %v3663_v10 = vld [vmem:[%s3652_s25] sm:$0xff]   ;;  %s4010_s4 = scalar_lea.vmem %s4159_s3, %s3509_s28 }
  0x12   : > { %3262 = vmatprep.mubr.msk.bf16.mxu0 %vm551_vm1, %v3519_v7  ;;  %v3666_v11 = vld [vmem:[%s3652_s25 + $0x8] sm:$0xff]   ;;  %v3670_v13 = vld [vmem:[%s3652_s25 + $0x10] sm:$0xff]   ;;  %v350_v15 = vshrl.u32 %v3663_v10, 16  ;;  %v352_v16 = vshll.u32 %v3663_v10, 16  ;;  %v3527_v20 = vld [vmem:[%s3652_s25 + $0x1c] sm:$0xff]  }
  0x13   : > { %3263 = vmatmul.mubr.msk.bf16.vlgmr.msra.gmra.mrb[0].mxu0 %vm551_vm1, %v3520_v9  ;;  %v357_v17 = vshll.u32 %v3666_v11, 16  ;;  %v361_v18 = vshrl.u32 %v3666_v11, 16  ;;  %v365_v19 = vshll.u32 %v3670_v13, 16  ;;  %v3528_v23 = vld [vmem:[%s3652_s25 + $0x24] sm:$0xff]   ;;  %v3681_v24 = vld [vmem:[%s3652_s25 + $0x18] sm:$0xff]   ;;  %v369_v26 = vshrl.u32 %v3670_v13, 16 }
  0x14   : > { %3311 = vmatpush3.bf16.msra.mxu0 %v2106_v12  ;;  %v354_v21 = vrot.slane %v352_v16, 1  ;;  %3266 = vmatprep.mubr.msk.bf16.mxu0 %vm551_vm1, %v3527_v20  ;;  %v373_v29 = vshll.u32 %v3681_v24, 16  ;;  %v3687_v30 = vld [vmem:[%s3652_s25 + $0x20] sm:$0xff]   ;;  %v377_v32 = vshrl.u32 %v3681_v24, 16  ;;  %v3531_v33 = vld [vmem:[%s3652_s25 + $0x2c] sm:$0xff]   ;;  %v3532_v44 = vld [vmem:[%s3652_s25 + $0x34] sm:$0xff]  }
  0x15   : > { %v359_v22 = vrot.slane %v357_v17, 1  ;;  %v367_v25 = vrot.slane %v365_v19, 1  ;;  %v381_v37 = vshll.u32 %v3687_v30, 16  ;;  %v385_v38 = vshrl.u32 %v3687_v30, 16  ;;  %v3701_v41 = vld [vmem:[%s3652_s25 + $0x28] sm:$0xff]   ;;  %v3705_v43 = vld [vmem:[%s3652_s25 + $0x30] sm:$0xff]  }
  0x16   : > { %v355_v27 = vor.u32 %v354_v21, %v350_v15  ;;  %v375_v36 = vrot.slane %v373_v29, 1  ;;  %v389_v46 = vshll.u32 %v3701_v41, 16  ;;  %v3535_v47 = vld [vmem:[%s3652_s25 + $0x3c] sm:$0xff]   ;;  %v397_v50 = vshll.u32 %v3705_v43, 16  ;;  %v3536_v59 = vld [vmem:[%s3652_s25 + $0x44] sm:$0xff]   ;;  %v3539_v63 = vld [vmem:[%s3652_s25 + $0x4c] sm:$0xff]  }
  0x17   : > { %v363_v28 = vor.u32 %v361_v18, %v359_v22  ;;  %v371_v31 = vor.u32 %v369_v26, %v367_v25  ;;  %v383_v40 = vrot.slane %v381_v37, 1  ;;  %v3711_v48 = vld [vmem:[%s3652_s25 + $0x38] sm:$0xff]   ;;  %v393_v52 = vshrl.u32 %v3701_v41, 16  ;;  %v3723_v57 = vld [vmem:[%s3652_s25 + $0x40] sm:$0xff]   ;;  %v3728_v62 = vld [vmem:[%s3652_s25 + $0x48] sm:$0xff]  }
  0x18   : > { %v360_v34 = vsel %vm348_vm2, %v355_v27, %v359_v22  ;;  %v379_v42 = vor.u32 %v377_v32, %v375_v36  ;;  %v391_v49 = vrot.slane %v389_v46, 1  ;;  %v401_v54 = vshrl.u32 %v3705_v43, 16  ;;  %v3741_v7 = vld [vmem:[%s3652_s25 + $0x50] sm:$0xff]   ;;  %v3746_v15 = vld [vmem:[%s3652_s25 + $0x58] sm:$0xff]   ;;  %v3544_v27 = vld [vmem:[%s3652_s25 + $0x64] sm:$0xff]  }
  0x19   : > { %v368_v35 = vsel %vm348_vm2, %v363_v28, %v367_v25  ;;  %3162 = vmatprep.mubr.msk.bf16.mxu1 %vm551_vm1, %v360_v34  ;;  %v376_v39 = vsel %vm348_vm2, %v371_v31, %v375_v36  ;;  %v387_v45 = vor.u32 %v385_v38, %v383_v40  ;;  %v405_v55 = vshll.u32 %v3711_v48, 16  ;;  %v3540_v9 = vld [vmem:[%s3652_s25 + $0x54] sm:$0xff]   ;;  %v3543_v16 = vld [vmem:[%s3652_s25 + $0x5c] sm:$0xff]   ;;  %v3764_v31 = vld [vmem:[%s3652_s25 + $0x68] sm:$0xff]  }
  0x1a   : > { %3163 = vmatmul.mubr.msk.bf16.vlgmr.msra.gmra.mrb[0].mxu1 %vm551_vm1, %v368_v35  ;;  %v384_v51 = vsel %vm348_vm2, %v379_v42, %v383_v40  ;;  %v399_v56 = vrot.slane %v397_v50, 1  ;;  %v395_v58 = vor.u32 %v393_v52, %v391_v49  ;;  %v413_v0 = vshll.u32 %v3723_v57, 16  ;;  %v3759_v25 = vld [vmem:[%s3652_s25 + $0x60] sm:$0xff]   ;;  %v3547_v32 = vld [vmem:[%s3652_s25 + $0x6c] sm:$0xff]  }
  0x1b   : > { %3267 = vmatmul.mubr.msk.bf16.gmra.mrb[4].mxu0 %vm551_vm1, %v3528_v23  ;;  %3211 = vmatpush3.bf16.msra.mxu1 %v907_v14  ;;  %v392_v53 = vsel %vm348_vm2, %v387_v45, %v391_v49  ;;  %v407_v61 = vrot.slane %v405_v55, 1  ;;  %v409_v2 = vshrl.u32 %v3711_v48, 16  ;;  %v417_v4 = vshrl.u32 %v3723_v57, 16  ;;  %v3777_v40 = vld [vmem:[%s3652_s25 + $0x70] sm:$0xff]   ;;  %v3551_v49 = vld [vmem:[%s3652_s25 + $0x7c] sm:$0xff]  }
  0x1c   : > { %3270 = vmatprep.mubr.msk.bf16.mxu0 %vm551_vm1, %v3531_v33  ;;  %3166 = vmatprep.mubr.msk.bf16.mxu1 %vm551_vm1, %v376_v39  ;;  %v403_v60 = vor.u32 %v401_v54, %v399_v56  ;;  %v400_v1 = vsel %vm348_vm2, %v395_v58, %v399_v56  ;;  %v421_v5 = vshll.u32 %v3728_v62, 16  ;;  %v415_v6 = vrot.slane %v413_v0, 1  ;;  %v3548_v45 = vld [vmem:[%s3652_s25 + $0x74] sm:$0xff]   ;;  %v3795_v58 = vld [vmem:[%s3652_s25 + $0x80] sm:$0xff]  }
  0x1d   : > { %v411_v8 = vor.u32 %v409_v2, %v407_v61  ;;  %v429_v17 = vshll.u32 %v3741_v7, 16  ;;  %v425_v19 = vshrl.u32 %v3728_v62, 16  ;;  %v433_v21 = vshrl.u32 %v3741_v7, 16 }
  0x1e   : > { %v408_v3 = vsel %vm348_vm2, %v403_v60, %v407_v61  ;;  %v419_v12 = vor.u32 %v417_v4, %v415_v6  ;;  %v423_v14 = vrot.slane %v421_v5, 1  ;;  %v437_v22 = vshll.u32 %v3746_v15, 16  ;;  %v3552_v60 = vld [vmem:[%s3652_s25 + $0x84] sm:$0xff]  }
  0x1f   : > { %v416_v18 = vsel %vm348_vm2, %v411_v8, %v415_v6  ;;  %v431_v23 = vrot.slane %v429_v17, 1  ;;  %v445_v33 = vshll.u32 %v3759_v25, 16  ;;  %v441_v35 = vshrl.u32 %v3746_v15, 16 }
  0x20   : > { %v424_v20 = vsel %vm348_vm2, %v419_v12, %v423_v14  ;;  %v427_v26 = vor.u32 %v425_v19, %v423_v14  ;;  %v439_v29 = vrot.slane %v437_v22, 1  ;;  %v449_v37 = vshrl.u32 %v3759_v25, 16  ;;  %v3818_v19 = vld [vmem:[%s3652_s25 + $0x98] sm:$0xff]  }
  0x21   : > { %v435_v28 = vor.u32 %v433_v21, %v431_v23  ;;  %v453_v38 = vshll.u32 %v3764_v31, 16  ;;  %v447_v39 = vrot.slane %v445_v33, 1  ;;  %v461_v50 = vshll.u32 %v3777_v40, 16  ;;  %v3559_v21 = vld [vmem:[%s3652_s25 + $0x9c] sm:$0xff]  }
  0x22   : > { %3167 = vmatmul.mubr.msk.bf16.gmra.mrb[4].mxu1 %vm551_vm1, %v384_v51  ;;  %v432_v34 = vsel %vm348_vm2, %v427_v26, %v431_v23  ;;  %v443_v42 = vor.u32 %v441_v35, %v439_v29  ;;  %v457_v52 = vshrl.u32 %v3764_v31, 16  ;;  %v465_v55 = vshrl.u32 %v3777_v40, 16 }
  0x23   : > { %3271 = vmatmul.mubr.msk.bf16.gmra.mrb[8].mxu0 %vm551_vm1, %v3532_v44  ;;  %3170 = vmatprep.mubr.msk.bf16.mxu1 %vm551_vm1, %v392_v53  ;;  %v440_v36 = vsel %vm348_vm2, %v435_v28, %v439_v29  ;;  %v3781_v44 = vld [vmem:[%s3652_s25 + $0x78] sm:$0xff]   ;;  %v451_v46 = vor.u32 %v449_v37, %v447_v39  ;;  %v463_v56 = vrot.slane %v461_v50, 1  ;;  %v477_v2 = vshll.u32 %v3795_v58, 16  ;;  %v3830_v29 = vld [vmem:[%s3652_s25 + $0xa0] sm:$0xff]   ;;  %v3836_v37 = vld [vmem:[%s3652_s25 + $0xa8] sm:$0xff]  }
  0x24   : > { %3274 = vmatprep.mubr.msk.bf16.mxu0 %vm551_vm1, %v3535_v47  ;;  %v455_v47 = vrot.slane %v453_v38, 1  ;;  %v448_v51 = vsel %vm348_vm2, %v443_v42, %v447_v39  ;;  %v469_v53 = vshll.u32 %v3781_v44, 16  ;;  %v473_v4 = vshrl.u32 %v3781_v44, 16  ;;  %v3563_v39 = vld [vmem:[%s3652_s25 + $0xac] sm:$0xff]  }
  0x25   : > { %v467_v0 = vor.u32 %v465_v55, %v463_v56  ;;  %v481_v6 = vshrl.u32 %v3795_v58, 16  ;;  %v479_v12 = vrot.slane %v477_v2, 1  ;;  %v501_v28 = vshll.u32 %v3818_v19, 16  ;;  %v3571_v42 = vld [vmem:[%s3652_s25 + $0xc] sm:$0xff]  }
  0x26   : > { %v456_v54 = vsel %vm348_vm2, %v451_v46, %v455_v47  ;;  %v471_v61 = vrot.slane %v469_v53, 1  ;;  %v509_v38 = vshll.u32 %v3830_v29, 16  ;;  %v505_v46 = vshrl.u32 %v3818_v19, 16  ;;  %v3572_v53 = vld [vmem:[%s3652_s25 + $0x14] sm:$0xff]  }
  0x27   : > { %v483_v17 = vor.u32 %v481_v6, %v479_v12  ;;  %v517_v50 = vshll.u32 %v3836_v37, 16  ;;  %v1832_v2 = vshrl.u32 %v3571_v42, 16  ;;  %v521_v6 = vshrl.u32 %v3836_v37, 16 }
  0x28   : > { %v472_v5 = vsel %vm348_vm2, %v467_v0, %v471_v61  ;;  %v475_v14 = vor.u32 %v473_v4, %v471_v61  ;;  %v3856_v61 = vld [vmem:[%s3652_s25 + $0xb8] sm:$0xff]   ;;  %v1839_v4 = vshll.u32 %v3572_v53, 16 }
  0x2a   : > { %3171 = vmatmul.mubr.msk.bf16.gmra.mrb[8].mxu1 %vm551_vm1, %v400_v1  ;;  %v3555_v1 = vld [vmem:[%s3652_s25 + $0x8c] sm:$0xff]   ;;  %v480_v22 = vsel %vm348_vm2, %v475_v14, %v479_v12  ;;  %v533_v14 = vshll.u32 %v3856_v61, 16 }
  0x2b   : > { %3275 = vmatmul.mubr.msk.bf16.gmra.mrb[12].mxu0 %vm551_vm1, %v3536_v59  ;;  %3174 = vmatprep.mubr.msk.bf16.mxu1 %vm551_vm1, %v408_v3  ;;  %v459_v59 = vor.u32 %v457_v52, %v455_v47  ;;  %v3849_v52 = vld [vmem:[%s3652_s25 + $0xb0] sm:$0xff]  }
  0x2c   : > { %3278 = vmatprep.mubr.msk.bf16.mxu0 %vm551_vm1, %v3539_v63  ;;  %v3800_v63 = vld [vmem:[%s3652_s25 + $0x88] sm:$0xff]   ;;  %v525_v0 = vshll.u32 %v3849_v52, 16  ;;  %v529_v12 = vshrl.u32 %v3849_v52, 16 }
  0x2d   : > { %v464_v3 = vsel %vm348_vm2, %v459_v59, %v463_v56  ;;  %v485_v8 = vshll.u32 %v3800_v63, 16  ;;  %v489_v23 = vshrl.u32 %v3800_v63, 16  ;;  %v3564_v56 = vld [vmem:[%s3652_s25 + $0xb4] sm:$0xff]  }
  0x32   : > { %3175 = vmatmul.mubr.msk.bf16.gmra.mrb[12].mxu1 %vm551_vm1, %v416_v18  ;;  %v487_v18 = vrot.slane %v485_v8, 1 }
  0x33   : > { %3279 = vmatmul.mubr.msk.bf16.gmra.mrb[16].mxu0 %vm551_vm1, %v3540_v9  ;;  %3178 = vmatprep.mubr.msk.bf16.mxu1 %vm551_vm1, %v424_v20  ;;  %v3812_v9 = vld [vmem:[%s3652_s25 + $0x90] sm:$0xff]  }
  0x34   : > { %3282 = vmatprep.mubr.msk.bf16.mxu0 %vm551_vm1, %v3543_v16  ;;  %v3556_v16 = vld [vmem:[%s3652_s25 + $0x94] sm:$0xff]   ;;  %v493_v20 = vshll.u32 %v3812_v9, 16  ;;  %v488_v26 = vsel %vm348_vm2, %v483_v17, %v487_v18  ;;  %v491_v33 = vor.u32 %v489_v23, %v487_v18  ;;  %v3570_v17 = vld [vmem:[%s3652_s25 + $0xc0] ss:$0 sps:$4 sm:$0x11]   ;;  %v527_v18 = vrot.slane %v525_v0, 1 }
  0x3a   : > { %3179 = vmatmul.mubr.msk.bf16.gmra.mrb[16].mxu1 %vm551_vm1, %v432_v34  ;;  %v3560_v34 = vld [vmem:[%s3652_s25 + $0xa4] sm:$0xff]  }
  0x3b   : > { %3283 = vmatmul.mubr.msk.bf16.gmra.mrb[20].mxu0 %vm551_vm1, %v3544_v27  ;;  %3182 = vmatprep.mubr.msk.bf16.mxu1 %vm551_vm1, %v440_v36  ;;  %v497_v27 = vshrl.u32 %v3812_v9, 16  ;;  %v503_v36 = vrot.slane %v501_v28, 1  ;;  %v535_v28 = vrot.slane %v533_v14, 1  ;;  %v3578_v14 = vld [vmem:[%s3652_s25 + $0x44] sm:$0xff]  }
  0x3c   : > { %3286 = vmatprep.mubr.msk.bf16.mxu0 %vm551_vm1, %v3547_v32  ;;  %v495_v32 = vrot.slane %v493_v20, 1 }
  0x3d   : > { %v507_v55 = vor.u32 %v505_v46, %v503_v36 }
  0x3e   : > { %v499_v35 = vor.u32 %v497_v27, %v495_v32  ;;  %v531_v27 = vor.u32 %v529_v12, %v527_v18 }
  0x40   : > { %v504_v47 = vsel %vm348_vm2, %v499_v35, %v503_v36 }
  0x42   : > { %3183 = vmatmul.mubr.msk.bf16.gmra.mrb[20].mxu1 %vm551_vm1, %v448_v51  ;;  %v511_v51 = vrot.slane %v509_v38, 1 }
  0x43   : > { %3287 = vmatmul.mubr.msk.bf16.gmra.mrb[24].mxu0 %vm551_vm1, %v3548_v45  ;;  %3186 = vmatprep.mubr.msk.bf16.mxu1 %vm551_vm1, %v456_v54  ;;  %v496_v45 = vsel %vm348_vm2, %v491_v33, %v495_v32  ;;  %v1834_v54 = vshll.u32 %v3571_v42, 16  ;;  %v1843_v33 = vshrl.u32 %v3572_v53, 16  ;;  %v541_v42 = vshll.u32 %v3570_v17, 16  ;;  %v3576_v53 = vld [vmem:[%s3652_s25 + $0x34] sm:$0xff]  }
  0x44   : > { %3290 = vmatprep.mubr.msk.bf16.mxu0 %vm551_vm1, %v3551_v49  ;;  %v513_v49 = vshrl.u32 %v3830_v29, 16 }
  0x46   : > { %v515_v59 = vor.u32 %v513_v49, %v511_v51 }
  0x4a   : > { %3187 = vmatmul.mubr.msk.bf16.gmra.mrb[24].mxu1 %vm551_vm1, %v464_v3  ;;  %v1836_v3 = vrot.slane %v1834_v54, 1 }
  0x4b   : > { %3291 = vmatmul.mubr.msk.bf16.gmra.mrb[28].mxu0 %vm551_vm1, %v3552_v60  ;;  %3190 = vmatprep.mubr.msk.bf16.mxu1 %vm551_vm1, %v472_v5  ;;  %v519_v60 = vrot.slane %v517_v50, 1  ;;  %v512_v5 = vsel %vm348_vm2, %v507_v55, %v511_v51  ;;  %v543_v55 = vrot.slane %v541_v42, 1 }
  0x4c   : > { %3294 = vmatprep.mubr.msk.bf16.mxu0 %vm551_vm1, %v3555_v1  ;;  %v3567_v1 = vld [vmem:[%s3652_s25 + $0xbc] sm:$0xff]   ;;  %v1837_v20 = vor.u32 %v1836_v3, %v1832_v2  ;;  %v1871_v2 = vshll.u32 %v3576_v53, 16 }
  0x4d   : > { %v520_v8 = vsel %vm348_vm2, %v515_v59, %v519_v60  ;;  %v523_v23 = vor.u32 %v521_v6, %v519_v60 }
  0x4e   : > { %v1873_v12 = vrot.slane %v1871_v2, 1 }
  0x4f   : > { %v528_v38 = vsel %vm348_vm2, %v523_v23, %v527_v18  ;;  %v1875_v18 = vshrl.u32 %v3576_v53, 16 }
  0x52   : > { %3191 = vmatmul.mubr.msk.bf16.gmra.mrb[28].mxu1 %vm551_vm1, %v480_v22  ;;  %v3574_v22 = vld [vmem:[%s3652_s25 + $0x24] sm:$0xff]  }
  0x53   : > { %3295 = vmatmul.mubr.msk.bf16.gmra.mrb[32].mxu0 %vm551_vm1, %v3556_v16  ;;  %3194 = vmatprep.mubr.msk.bf16.mxu1 %vm551_vm1, %v488_v26  ;;  %v3573_v16 = vld [vmem:[%s3652_s25 + $0x1c] sm:$0xff]   ;;  %v3568_v26 = vld [vmem:[%s3652_s25 + $0xc4] sm:$0xff]   ;;  %v1855_v36 = vshll.u32 %v3574_v22, 16  ;;  %v1859_v60 = vshrl.u32 %v3574_v22, 16  ;;  %v1887_v22 = vshll.u32 %v3578_v14, 16 }
  0x54   : > { %3298 = vmatprep.mubr.msk.bf16.mxu0 %vm551_vm1, %v3559_v21  ;;  %v1841_v21 = vrot.slane %v1839_v4, 1  ;;  %v1847_v32 = vshll.u32 %v3573_v16, 16  ;;  %v1851_v35 = vshrl.u32 %v3573_v16, 16 }
  0x55   : > { %v1857_v51 = vrot.slane %v1855_v36, 1 }
  0x56   : > { %v1849_v46 = vrot.slane %v1847_v32, 1  ;;  %v1845_v49 = vor.u32 %v1843_v33, %v1841_v21  ;;  %v3580_v32 = vld [vmem:[%s3652_s25 + $0x54] sm:$0xff]  }
  0x57   : > { %v1861_v6 = vor.u32 %v1859_v60, %v1857_v51 }
  0x58   : > { %v1853_v50 = vor.u32 %v1851_v35, %v1849_v46  ;;  %v1850_v59 = vsel %vm348_vm2, %v1845_v49, %v1849_v46  ;;  %v1891_v35 = vshrl.u32 %v3578_v14, 16 }
  0x5a   : > { %3195 = vmatmul.mubr.msk.bf16.gmra.mrb[32].mxu1 %vm551_vm1, %v496_v45  ;;  %v536_v45 = vsel %vm348_vm2, %v531_v27, %v535_v28  ;;  %v1858_v0 = vsel %vm348_vm2, %v1853_v50, %v1857_v51  ;;  %v1877_v27 = vor.u32 %v1875_v18, %v1873_v12  ;;  %v1907_v51 = vshrl.u32 %v3580_v32, 16 }
  0x5b   : > { %3299 = vmatmul.mubr.msk.bf16.gmra.mrb[36].mxu0 %vm551_vm1, %v3560_v34  ;;  %3198 = vmatprep.mubr.msk.bf16.mxu1 %vm551_vm1, %v504_v47  ;;  %v1842_v34 = vsel %vm348_vm2, %v1837_v20, %v1841_v21  ;;  %v3575_v47 = vld [vmem:[%s3652_s25 + $0x2c] sm:$0xff]  }
  0x5c   : > { %3302 = vmatprep.mubr.msk.bf16.mxu0 %vm551_vm1, %v3563_v39  ;;  %v537_v39 = vshrl.u32 %v3856_v61, 16 }
  0x5e   : > { %v539_v54 = vor.u32 %v537_v39, %v535_v28  ;;  %v1889_v28 = vrot.slane %v1887_v22, 1  ;;  %v1903_v39 = vshll.u32 %v3580_v32, 16 }
  0x60   : > { %v544_v3 = vsel %vm348_vm2, %v539_v54, %v543_v55  ;;  %v1905_v46 = vrot.slane %v1903_v39, 1 }
  0x62   : > { %3199 = vmatmul.mubr.msk.bf16.gmra.mrb[36].mxu1 %vm551_vm1, %v512_v5  ;;  %v3577_v5 = vld [vmem:[%s3652_s25 + $0x3c] sm:$0xff]  }
  0x63   : > { %3303 = vmatmul.mubr.msk.bf16.gmra.mrb[40].mxu0 %vm551_vm1, %v3564_v56  ;;  %3202 = vmatprep.mubr.msk.bf16.mxu1 %vm551_vm1, %v520_v8  ;;  %v1863_v56 = vshll.u32 %v3575_v47, 16  ;;  %v1879_v16 = vshll.u32 %v3577_v5, 16  ;;  %v1883_v21 = vshrl.u32 %v3577_v5, 16 }
  0x64   : > { %3306 = vmatprep.mubr.msk.bf16.mxu0 %vm551_vm1, %v3567_v1  ;;  %v1867_v1 = vshrl.u32 %v3575_v47, 16  ;;  %v3582_v47 = vld [vmem:[%s3652_s25 + $0x64] sm:$0xff]  }
  0x65   : > { %v1865_v4 = vrot.slane %v1863_v56, 1  ;;  %v1881_v23 = vrot.slane %v1879_v16, 1  ;;  %v1919_v55 = vshll.u32 %v3582_v47, 16  ;;  %v3586_v16 = vld [vmem:[%s3652_s25 + $0x84] sm:$0xff]  }
  0x67   : > { %v1869_v8 = vor.u32 %v1867_v1, %v1865_v4  ;;  %v1866_v17 = vsel %vm348_vm2, %v1861_v6, %v1865_v4  ;;  %v1921_v60 = vrot.slane %v1919_v55, 1 }
  0x69   : > { %v1874_v20 = vsel %vm348_vm2, %v1869_v8, %v1873_v12  ;;  %v3585_v12 = vld [vmem:[%s3652_s25 + $0x7c] sm:$0xff]  }
  0x6a   : > { %3203 = vmatmul.mubr.msk.bf16.gmra.mrb[40].mxu1 %vm551_vm1, %v528_v38  ;;  %v1947_v22 = vshrl.u32 %v3585_v12, 16 }
  0x6b   : > { %3307 = vmatmul.mubr.msk.bf16.gmra.mrb[44].mxu0 %vm551_vm1, %v3568_v26  ;;  %3206 = vmatprep.mubr.msk.bf16.mxu1 %vm551_vm1, %v536_v45  ;;  %v3579_v26 = vld [vmem:[%s3652_s25 + $0x4c] sm:$0xff]   ;;  %v3581_v45 = vld [vmem:[%s3652_s25 + $0x5c] sm:$0xff]  }
  0x6c   : > { %3312 = vmatprep.mubr.msk.bf16.mxu0 %vm551_vm1, %v1842_v34  ;;  %v1895_v33 = vshll.u32 %v3579_v26, 16  ;;  %v1882_v34 = vsel %vm348_vm2, %v1877_v27, %v1881_v23  ;;  %v1899_v38 = vshrl.u32 %v3579_v26, 16  ;;  %v1911_v49 = vshll.u32 %v3581_v45, 16  ;;  %v3587_v27 = vld [vmem:[%s3652_s25 + $0x8c] sm:$0xff]  }
  0x6d   : > { %v1915_v54 = vshrl.u32 %v3581_v45, 16  ;;  %v1959_v32 = vshll.u32 %v3587_v27, 16 }
  0x6e   : > { %v1897_v42 = vrot.slane %v1895_v33, 1  ;;  %v1913_v56 = vrot.slane %v1911_v49, 1 }
  0x6f   : > { %v1961_v39 = vrot.slane %v1959_v32, 1  ;;  %v4001_v32 = vld [vmem:[%s4158_s2] ss:$0 sm:$0xff] }
  0x72   : > { %3207 = vmatmul.mubr.msk.bf16.gmra.mrb[44].mxu1 %vm551_vm1, %v544_v3  ;;  %v1923_v3 = vshrl.u32 %v3582_v47, 16 }
  0x73   : > { %3313 = vmatmul.mubr.msk.bf16.vlgmr.msra.gmra.mrb[0].mxu0 %vm551_vm1, %v1850_v59  ;;  %3212 = vmatprep.mubr.msk.bf16.mxu1 %vm551_vm1, %v3663_v10  ;;  %v1885_v10 = vor.u32 %v1883_v21, %v1881_v23  ;;  %v3583_v59 = vld [vmem:[%s3652_s25 + $0x6c] sm:$0xff]   ;;  %v1951_v23 = vshll.u32 %v3586_v16, 16 }
  0x74   : > { %3316 = vmatprep.mubr.msk.bf16.mxu0 %vm551_vm1, %v1858_v0  ;;  %v3584_v0 = vld [vmem:[%s3652_s25 + $0x74] sm:$0xff]   ;;  %v1927_v1 = vshll.u32 %v3583_v59, 16  ;;  %v1931_v5 = vshrl.u32 %v3583_v59, 16 }
  0x75   : > { %v1890_v36 = vsel %vm348_vm2, %v1885_v10, %v1889_v28  ;;  %v1935_v6 = vshll.u32 %v3584_v0, 16  ;;  %v1953_v10 = vrot.slane %v1951_v23, 1 }
  0x76   : > { %v1929_v8 = vrot.slane %v1927_v1, 1 }
  0x77   : > { %v1937_v14 = vrot.slane %v1935_v6, 1 }
  0x7a   : > { %3213 = vmatmul.mubr.msk.bf16.vlgmr.msra.gmra.mrb[0].mxu1 %vm551_vm1, %v3666_v11  ;;  %v1893_v11 = vor.u32 %v1891_v35, %v1889_v28  ;;  %v3588_v28 = vld [vmem:[%s3652_s25 + $0x94] sm:$0xff]  }
  0x7b   : > { %3317 = vmatmul.mubr.msk.bf16.gmra.mrb[4].mxu0 %vm551_vm1, %v1866_v17  ;;  %3216 = vmatprep.mubr.msk.bf16.mxu1 %vm551_vm1, %v3670_v13  ;;  %v1901_v13 = vor.u32 %v1899_v38, %v1897_v42  ;;  %v1943_v17 = vshll.u32 %v3585_v12, 16  ;;  %v1967_v38 = vshll.u32 %v3588_v28, 16  ;;  %v1971_v47 = vshrl.u32 %v3588_v28, 16 }
  0x7c   : > { %3320 = vmatprep.mubr.msk.bf16.mxu0 %vm551_vm1, %v1874_v20  ;;  %v1898_v50 = vsel %vm348_vm2, %v1893_v11, %v1897_v42  ;;  %v1939_v20 = vshrl.u32 %v3584_v0, 16  ;;  %v3589_v42 = vld [vmem:[%s3652_s25 + $0x9c] sm:$0xff]   ;;  %v3590_v11 = vld [vmem:[%s3652_s25 + $0xa4] sm:$0xff]  }
  0x7d   : > { %v1906_v53 = vsel %vm348_vm2, %v1901_v13, %v1905_v46  ;;  %v1945_v26 = vrot.slane %v1943_v17, 1  ;;  %v1969_v45 = vrot.slane %v1967_v38, 1  ;;  %v1975_v13 = vshll.u32 %v3589_v42, 16  ;;  %v3595_v17 = vld [vmem:[%s3652_s25 + $0xcc] ss:$0 sps:$4 sm:$0x11]  }
  0x82   : > { %3217 = vmatmul.mubr.msk.bf16.gmra.mrb[4].mxu1 %vm551_vm1, %v3681_v24  ;;  %v1909_v24 = vor.u32 %v1907_v51, %v1905_v46  ;;  %v1983_v51 = vshll.u32 %v3590_v11, 16 }
  0x83   : > { %3321 = vmatmul.mubr.msk.bf16.gmra.mrb[8].mxu0 %vm551_vm1, %v1882_v34  ;;  %3220 = vmatprep.mubr.msk.bf16.mxu1 %vm551_vm1, %v3687_v30  ;;  %v1917_v30 = vor.u32 %v1915_v54, %v1913_v56  ;;  %v1955_v34 = vshrl.u32 %v3586_v16, 16  ;;  %v3591_v54 = vld [vmem:[%s3652_s25 + $0xac] sm:$0xff]  }
  0x84   : > { %3324 = vmatprep.mubr.msk.bf16.mxu0 %vm551_vm1, %v1890_v36  ;;  %v1914_v2 = vsel %vm348_vm2, %v1909_v24, %v1913_v56  ;;  %v1963_v36 = vshrl.u32 %v3587_v27, 16  ;;  %v1985_v55 = vrot.slane %v1983_v51, 1  ;;  %v3592_v56 = vld [vmem:[%s3652_s25 + $0xb4] sm:$0xff]   ;;  %v1991_v59 = vshll.u32 %v3591_v54, 16 }
  0x85   : > { %v1922_v4 = vsel %vm348_vm2, %v1917_v30, %v1921_v60  ;;  %v1987_v30 = vshrl.u32 %v3590_v11, 16  ;;  %v1995_v0 = vshrl.u32 %v3591_v54, 16  ;;  %v1999_v1 = vshll.u32 %v3592_v56, 16 }
  0x86   : > { %v2003_v12 = vshrl.u32 %v3592_v56, 16 }
  0x8a   : > { %3221 = vmatmul.mubr.msk.bf16.gmra.mrb[8].mxu1 %vm551_vm1, %v3701_v41  ;;  %v1925_v41 = vor.u32 %v1923_v3, %v1921_v60  ;;  %v3593_v3 = vld [vmem:[%s3652_s25 + $0xbc] sm:$0xff]  }
  0x8b   : > { %3325 = vmatmul.mubr.msk.bf16.gmra.mrb[12].mxu0 %vm551_vm1, %v1898_v50  ;;  %3224 = vmatprep.mubr.msk.bf16.mxu1 %vm551_vm1, %v3705_v43  ;;  %v1933_v43 = vor.u32 %v1931_v5, %v1929_v8  ;;  %v1979_v50 = vshrl.u32 %v3589_v42, 16  ;;  %v3594_v5 = vld [vmem:[%s3652_s25 + $0xc4] sm:$0xff]   ;;  %v2007_v6 = vshll.u32 %v3593_v3, 16 }
  0x8c   : > { %3328 = vmatprep.mubr.msk.bf16.mxu0 %vm551_vm1, %v1906_v53  ;;  %v1930_v18 = vsel %vm348_vm2, %v1925_v41, %v1929_v8  ;;  %v1977_v53 = vrot.slane %v1975_v13, 1 }
  0x8d   : > { %v1938_v21 = vsel %vm348_vm2, %v1933_v43, %v1937_v14  ;;  %v2011_v43 = vshrl.u32 %v3593_v3, 16  ;;  %v2009_v16 = vrot.slane %v2007_v6, 1 }
  0x92   : > { %3225 = vmatmul.mubr.msk.bf16.gmra.mrb[12].mxu1 %vm551_vm1, %v3711_v48  ;;  %v1941_v48 = vor.u32 %v1939_v20, %v1937_v14  ;;  %v2015_v14 = vshll.u32 %v3594_v5, 16 }
  0x93   : > { %3329 = vmatmul.mubr.msk.bf16.gmra.mrb[16].mxu0 %vm551_vm1, %v1914_v2  ;;  %3228 = vmatprep.mubr.msk.bf16.mxu1 %vm551_vm1, %v3723_v57  ;;  %v1949_v57 = vor.u32 %v1947_v22, %v1945_v26  ;;  %v1993_v2 = vrot.slane %v1991_v59, 1  ;;  %v2023_v22 = vshll.u32 %v3595_v17, 16 }
  0x94   : > { %3332 = vmatprep.mubr.msk.bf16.mxu0 %vm551_vm1, %v1922_v4  ;;  %v1946_v33 = vsel %vm348_vm2, %v1941_v48, %v1945_v26  ;;  %v2001_v4 = vrot.slane %v1999_v1, 1 }
  0x95   : > { %v1954_v35 = vsel %vm348_vm2, %v1949_v57, %v1953_v10  ;;  %v2025_v27 = vrot.slane %v2023_v22, 1 }
  0x9a   : > { %3229 = vmatmul.mubr.msk.bf16.gmra.mrb[16].mxu1 %vm551_vm1, %v3728_v62  ;;  %v1957_v62 = vor.u32 %v1955_v34, %v1953_v10 }
  0x9b   : > { %3333 = vmatmul.mubr.msk.bf16.gmra.mrb[20].mxu0 %vm551_vm1, %v1930_v18  ;;  %3232 = vmatprep.mubr.msk.bf16.mxu1 %vm551_vm1, %v3741_v7  ;;  %v1965_v7 = vor.u32 %v1963_v36, %v1961_v39  ;;  %v2013_v18 = vor.u32 %v2011_v43, %v2009_v16 }
  0x9c   : > { %3336 = vmatprep.mubr.msk.bf16.mxu0 %vm551_vm1, %v1938_v21  ;;  %v1962_v46 = vsel %vm348_vm2, %v1957_v62, %v1961_v39  ;;  %v2019_v21 = vshrl.u32 %v3594_v5, 16 }
  0x9d   : > { %v1970_v49 = vsel %vm348_vm2, %v1965_v7, %v1969_v45 }
  0xa2   : > { %3233 = vmatmul.mubr.msk.bf16.gmra.mrb[20].mxu1 %vm551_vm1, %v3746_v15  ;;  %v1973_v15 = vor.u32 %v1971_v47, %v1969_v45 }
  0xa3   : > { %3337 = vmatmul.mubr.msk.bf16.gmra.mrb[24].mxu0 %vm551_vm1, %v1946_v33  ;;  %3236 = vmatprep.mubr.msk.bf16.mxu1 %vm551_vm1, %v3759_v25  ;;  %v1981_v25 = vor.u32 %v1979_v50, %v1977_v53 }
  0xa4   : > { %3340 = vmatprep.mubr.msk.bf16.mxu0 %vm551_vm1, %v1954_v35  ;;  %v1978_v24 = vsel %vm348_vm2, %v1973_v15, %v1977_v53 }
  0xa5   : > { %v1986_v60 = vsel %vm348_vm2, %v1981_v25, %v1985_v55 }
  0xaa   : > { %3237 = vmatmul.mubr.msk.bf16.gmra.mrb[24].mxu1 %vm551_vm1, %v3764_v31  ;;  %v1989_v31 = vor.u32 %v1987_v30, %v1985_v55 }
  0xab   : > { %3341 = vmatmul.mubr.msk.bf16.gmra.mrb[28].mxu0 %vm551_vm1, %v1962_v46  ;;  %3240 = vmatprep.mubr.msk.bf16.mxu1 %vm551_vm1, %v3777_v40  ;;  %v1997_v40 = vor.u32 %v1995_v0, %v1993_v2 }
  0xac   : > { %3344 = vmatprep.mubr.msk.bf16.mxu0 %vm551_vm1, %v1970_v49  ;;  %v1994_v8 = vsel %vm348_vm2, %v1989_v31, %v1993_v2 }
  0xad   : > { %v2002_v41 = vsel %vm348_vm2, %v1997_v40, %v2001_v4 }
  0xb2   : > { %3241 = vmatmul.mubr.msk.bf16.gmra.mrb[28].mxu1 %vm551_vm1, %v3781_v44  ;;  %v2005_v44 = vor.u32 %v2003_v12, %v2001_v4 }
  0xb3   : > { %3345 = vmatmul.mubr.msk.bf16.gmra.mrb[32].mxu0 %vm551_vm1, %v1978_v24  ;;  %3244 = vmatprep.mubr.msk.bf16.mxu1 %vm551_vm1, %v3795_v58  ;;  %v2017_v58 = vrot.slane %v2015_v14, 1 }
  0xb4   : > { %3348 = vmatprep.mubr.msk.bf16.mxu0 %vm551_vm1, %v1986_v60  ;;  %v2010_v20 = vsel %vm348_vm2, %v2005_v44, %v2009_v16 }
  0xb5   : > { %v2018_v23 = vsel %vm348_vm2, %v2013_v18, %v2017_v58  ;;  %v2021_v26 = vor.u32 %v2019_v21, %v2017_v58 }
  0xba   : > { %3245 = vmatmul.mubr.msk.bf16.gmra.mrb[32].mxu1 %vm551_vm1, %v3800_v63  ;;  %v2026_v63 = vsel %vm348_vm2, %v2021_v26, %v2025_v27 }
  0xbb   : > { %3349 = vmatmul.mubr.msk.bf16.gmra.mrb[36].mxu0 %vm551_vm1, %v1994_v8  ;;  %3248 = vmatprep.mubr.msk.bf16.mxu1 %vm551_vm1, %v3812_v9 }
  0xbc   : > { %3352 = vmatprep.mubr.msk.bf16.mxu0 %vm551_vm1, %v2002_v41 }
  0xc2   : > { %3249 = vmatmul.mubr.msk.bf16.gmra.mrb[36].mxu1 %vm551_vm1, %v3818_v19 }
  0xc3   : > { %3353 = vmatmul.mubr.msk.bf16.gmra.mrb[40].mxu0 %vm551_vm1, %v2010_v20  ;;  %3252 = vmatprep.mubr.msk.bf16.mxu1 %vm551_vm1, %v3830_v29 }
  0xc4   : > { %3356 = vmatprep.mubr.msk.bf16.mxu0 %vm551_vm1, %v2018_v23 }
  0xca   : > { %3253 = vmatmul.mubr.msk.bf16.gmra.mrb[40].mxu1 %vm551_vm1, %v3836_v37 }
  0xcb   : > { %3357 = vmatmul.mubr.msk.bf16.gmra.mrb[44].mxu0 %vm551_vm1, %v2026_v63  ;;  %3256 = vmatprep.mubr.msk.bf16.mxu1 %vm551_vm1, %v3849_v52 }
  0xd2   : > { %3257 = vmatmul.mubr.msk.bf16.gmra.mrb[44].mxu1 %vm551_vm1, %v3856_v61 }
 0x146   : > { %v3314_v9 = vpop.f32.mrb[0].mxu0 }
 0x147   : > { %v2142_v48 = vpop.f32.mrb[1].mxu0 }
 0x148   : > { %v3315_v19 = vpop.f32.mrb[2].mxu0 }
 0x149   : > { %v2145_v57 = vpop.f32.mrb[3].mxu0 }
 0x14d   : > { %v3214_v28 = vpop.f32.mrb[0].mxu1 }
 0x14e   : > { %v3318_v10 = vpop.f32.mrb[4].mxu0  ;;  %v3360_v37 = vadd.f32 %v3314_v9, %v3214_v28  ;;  %v943_v34 = vpop.f32.mrb[1].mxu1 }
 0x14f   : > { %v2158_v29 = vpop.f32.mrb[5].mxu0  ;;  %v3361_v52 = vadd.f32 %v2142_v48, %v943_v34  ;;  %v3215_v36 = vpop.f32.mrb[2].mxu1 }
 0x150   : > { %v3319_v33 = vpop.f32.mrb[6].mxu0  ;;  %v2390_v61 = vadd.f32 %v3360_v37, %v4001_v32  ;;  %v3362_v38 = vadd.f32 %v3315_v19, %v3215_v36  ;;  %v946_v39 = vpop.f32.mrb[3].mxu1 }
 0x151   : > { %v2161_v35 = vpop.f32.mrb[7].mxu0  ;;  %v2388_v42 = vadd.f32 %v3361_v52, %v4001_v32  ;;  %v3363_v62 = vadd.f32 %v2145_v57, %v946_v39 }
 0x152   : > { %v2438_v7 = vmax.f32 %v2390_v61, 0.0  ;;  %v2391_v45 = vadd.f32 %v3362_v38, %v4001_v32 }
 0x153   : > { %v2436_v11 = vmax.f32 %v2388_v42, 0.0  ;;  %v2389_v13 = vadd.f32 %v3363_v62, %v4001_v32 }
 0x154   : > { %v3014_v47 = vpack.c.bf16 %v2438_v7, %v2438_v7  ;;  %v2439_v49 = vmax.f32 %v2391_v45, 0.0 }
 0x155   : > { %v3012_v51 = vpack.c.bf16 %v2436_v11, %v2436_v11  ;;  %v2437_v53 = vmax.f32 %v2389_v13, 0.0  ;;  %v3218_v54 = vpop.f32.mrb[4].mxu1 }
 0x156   : > { %v3322_v46 = vpop.f32.mrb[8].mxu0  ;;  %2679 = vst.msk [vmem:[%s4010_s4 + $0x8] sm:$0xf] %vm2676_vm3, %v3014_v47  ;;  %v3015_v25 = vpack.c.bf16 %v2439_v49, %v2439_v49  ;;  %v3364_v55 = vadd.f32 %v3318_v10, %v3218_v54  ;;  %v959_v56 = vpop.f32.mrb[5].mxu1 }
 0x157   : > { %v2174_v50 = vpop.f32.mrb[9].mxu0  ;;  %2677 = vst.msk [vmem:[%s4010_s4] sm:$0xf] %vm2676_vm3, %v3012_v51  ;;  %v3013_v24 = vpack.c.bf16 %v2437_v53, %v2437_v53  ;;  %v3365_v30 = vadd.f32 %v2158_v29, %v959_v56  ;;  %v3219_v60 = vpop.f32.mrb[6].mxu1 }
 0x158   : > { %v3323_v15 = vpop.f32.mrb[10].mxu0  ;;  %2680 = vst.msk [vmem:[%s4010_s4 + $0xc] sm:$0xf] %vm2676_vm3, %v3015_v25  ;;  %v2394_v0 = vadd.f32 %v3364_v55, %v4001_v32  ;;  %v3366_v1 = vadd.f32 %v3319_v33, %v3219_v60  ;;  %v962_v2 = vpop.f32.mrb[7].mxu1 }
 0x159   : > { %v2177_v59 = vpop.f32.mrb[11].mxu0  ;;  %2678 = vst.msk [vmem:[%s4010_s4 + $0x4] sm:$0xf] %vm2676_vm3, %v3013_v24  ;;  %v2392_v3 = vadd.f32 %v3365_v30, %v4001_v32  ;;  %v3367_v31 = vadd.f32 %v2161_v35, %v962_v2 }
 0x15a   : > { %v2442_v40 = vmax.f32 %v2394_v0, 0.0  ;;  %v2395_v4 = vadd.f32 %v3366_v1, %v4001_v32 }
 0x15b   : > { %v2440_v5 = vmax.f32 %v2392_v3, 0.0  ;;  %v2393_v6 = vadd.f32 %v3367_v31, %v4001_v32 }
 0x15c   : > { %v3018_v12 = vpack.c.bf16 %v2442_v40, %v2442_v40  ;;  %v2443_v41 = vmax.f32 %v2395_v4, 0.0 }
 0x15d   : > { %v3016_v14 = vpack.c.bf16 %v2440_v5, %v2440_v5  ;;  %v2441_v16 = vmax.f32 %v2393_v6, 0.0  ;;  %v3222_v44 = vpop.f32.mrb[8].mxu1 }
 0x15e   : > { %v3326_v8 = vpop.f32.mrb[12].mxu0  ;;  %2683 = vst.msk [vmem:[%s4010_s4 + $0x18] sm:$0xf] %vm2676_vm3, %v3018_v12  ;;  %v3019_v18 = vpack.c.bf16 %v2443_v41, %v2443_v41  ;;  %v3368_v58 = vadd.f32 %v3322_v46, %v3222_v44  ;;  %v975_v20 = vpop.f32.mrb[9].mxu1 }
 0x15f   : > { %v2190_v43 = vpop.f32.mrb[13].mxu0  ;;  %2681 = vst.msk [vmem:[%s4010_s4 + $0x10] sm:$0xf] %vm2676_vm3, %v3016_v14  ;;  %v3017_v22 = vpack.c.bf16 %v2441_v16, %v2441_v16  ;;  %v3369_v23 = vadd.f32 %v2174_v50, %v975_v20  ;;  %v3223_v26 = vpop.f32.mrb[10].mxu1 }
 0x160   : > { %v3327_v17 = vpop.f32.mrb[14].mxu0  ;;  %2684 = vst.msk [vmem:[%s4010_s4 + $0x1c] sm:$0xf] %vm2676_vm3, %v3019_v18  ;;  %v2398_v27 = vadd.f32 %v3368_v58, %v4001_v32  ;;  %v3370_v63 = vadd.f32 %v3323_v15, %v3223_v26  ;;  %v978_v9 = vpop.f32.mrb[11].mxu1 }
 0x161   : > { %v2193_v21 = vpop.f32.mrb[15].mxu0  ;;  %2682 = vst.msk [vmem:[%s4010_s4 + $0x14] sm:$0xf] %vm2676_vm3, %v3017_v22  ;;  %v2396_v48 = vadd.f32 %v3369_v23, %v4001_v32  ;;  %v3371_v19 = vadd.f32 %v2177_v59, %v978_v9 }
 0x162   : > { %v2446_v57 = vmax.f32 %v2398_v27, 0.0  ;;  %v2399_v10 = vadd.f32 %v3370_v63, %v4001_v32 }
 0x163   : > { %v2444_v29 = vmax.f32 %v2396_v48, 0.0  ;;  %v2397_v28 = vadd.f32 %v3371_v19, %v4001_v32 }
 0x164   : > { %v3022_v37 = vpack.c.bf16 %v2446_v57, %v2446_v57  ;;  %v2447_v34 = vmax.f32 %v2399_v10, 0.0 }
 0x165   : > { %v3020_v52 = vpack.c.bf16 %v2444_v29, %v2444_v29  ;;  %v2445_v36 = vmax.f32 %v2397_v28, 0.0  ;;  %v3226_v61 = vpop.f32.mrb[12].mxu1 }
 0x166   : > { %v3330_v33 = vpop.f32.mrb[16].mxu0  ;;  %2687 = vst.msk [vmem:[%s4010_s4 + $0x28] sm:$0xf] %vm2676_vm3, %v3022_v37  ;;  %v3023_v39 = vpack.c.bf16 %v2447_v34, %v2447_v34  ;;  %v3372_v42 = vadd.f32 %v3326_v8, %v3226_v61  ;;  %v991_v62 = vpop.f32.mrb[13].mxu1 }
 0x167   : > { %v2206_v35 = vpop.f32.mrb[17].mxu0  ;;  %2685 = vst.msk [vmem:[%s4010_s4 + $0x20] sm:$0xf] %vm2676_vm3, %v3020_v52  ;;  %v3021_v45 = vpack.c.bf16 %v2445_v36, %v2445_v36  ;;  %v3373_v11 = vadd.f32 %v2190_v43, %v991_v62  ;;  %v3227_v13 = vpop.f32.mrb[14].mxu1 }
 0x168   : > { %v3331_v38 = vpop.f32.mrb[18].mxu0  ;;  %2688 = vst.msk [vmem:[%s4010_s4 + $0x2c] sm:$0xf] %vm2676_vm3, %v3023_v39  ;;  %v2402_v46 = vadd.f32 %v3372_v42, %v4001_v32  ;;  %v3374_v47 = vadd.f32 %v3327_v17, %v3227_v13  ;;  %v994_v49 = vpop.f32.mrb[15].mxu1 }
 0x169   : > { %v2209_v7 = vpop.f32.mrb[19].mxu0  ;;  %2686 = vst.msk [vmem:[%s4010_s4 + $0x24] sm:$0xf] %vm2676_vm3, %v3021_v45  ;;  %v2400_v50 = vadd.f32 %v3373_v11, %v4001_v32  ;;  %v3375_v51 = vadd.f32 %v2193_v21, %v994_v49 }
 0x16a   : > { %v2450_v53 = vmax.f32 %v2402_v46, 0.0  ;;  %v2403_v54 = vadd.f32 %v3374_v47, %v4001_v32 }
 0x16b   : > { %v2448_v15 = vmax.f32 %v2400_v50, 0.0  ;;  %v2401_v25 = vadd.f32 %v3375_v51, %v4001_v32 }
 0x16c   : > { %v3026_v56 = vpack.c.bf16 %v2450_v53, %v2450_v53  ;;  %v2451_v59 = vmax.f32 %v2403_v54, 0.0 }
 0x16d   : > { %v3024_v30 = vpack.c.bf16 %v2448_v15, %v2448_v15  ;;  %v2449_v60 = vmax.f32 %v2401_v25, 0.0  ;;  %v3230_v0 = vpop.f32.mrb[16].mxu1 }
 0x16e   : > { %v3334_v55 = vpop.f32.mrb[20].mxu0  ;;  %2691 = vst.msk [vmem:[%s4010_s4 + $0x38] sm:$0xf] %vm2676_vm3, %v3026_v56  ;;  %v3027_v2 = vpack.c.bf16 %v2451_v59, %v2451_v59  ;;  %v3376_v3 = vadd.f32 %v3330_v33, %v3230_v0  ;;  %v1007_v31 = vpop.f32.mrb[17].mxu1 }
 0x16f   : > { %v2222_v24 = vpop.f32.mrb[21].mxu0  ;;  %2689 = vst.msk [vmem:[%s4010_s4 + $0x30] sm:$0xf] %vm2676_vm3, %v3024_v30  ;;  %v3025_v4 = vpack.c.bf16 %v2449_v60, %v2449_v60  ;;  %v3377_v5 = vadd.f32 %v2206_v35, %v1007_v31  ;;  %v3231_v6 = vpop.f32.mrb[18].mxu1 }
 0x170   : > { %v3335_v1 = vpop.f32.mrb[22].mxu0  ;;  %2692 = vst.msk [vmem:[%s4010_s4 + $0x3c] sm:$0xf] %vm2676_vm3, %v3027_v2  ;;  %v2406_v8 = vadd.f32 %v3376_v3, %v4001_v32  ;;  %v3378_v12 = vadd.f32 %v3331_v38, %v3231_v6  ;;  %v1010_v41 = vpop.f32.mrb[19].mxu1 }
 0x171   : > { %v2225_v40 = vpop.f32.mrb[23].mxu0  ;;  %2690 = vst.msk [vmem:[%s4010_s4 + $0x34] sm:$0xf] %vm2676_vm3, %v3025_v4  ;;  %v2404_v43 = vadd.f32 %v3377_v5, %v4001_v32  ;;  %v3379_v14 = vadd.f32 %v2209_v7, %v1010_v41 }
 0x172   : > { %v2454_v16 = vmax.f32 %v2406_v8, 0.0  ;;  %v2407_v44 = vadd.f32 %v3378_v12, %v4001_v32 }
 0x173   : > { %v2452_v17 = vmax.f32 %v2404_v43, 0.0  ;;  %v2405_v18 = vadd.f32 %v3379_v14, %v4001_v32 }
 0x174   : > { %v3030_v20 = vpack.c.bf16 %v2454_v16, %v2454_v16  ;;  %v2455_v21 = vmax.f32 %v2407_v44, 0.0 }
 0x175   : > { %v3028_v23 = vpack.c.bf16 %v2452_v17, %v2452_v17  ;;  %v2453_v26 = vmax.f32 %v2405_v18, 0.0  ;;  %v3234_v27 = vpop.f32.mrb[20].mxu1 }
 0x176   : > { %v3338_v58 = vpop.f32.mrb[24].mxu0  ;;  %2695 = vst.msk [vmem:[%s4010_s4 + $0x48] sm:$0xf] %vm2676_vm3, %v3030_v20  ;;  %v3031_v9 = vpack.c.bf16 %v2455_v21, %v2455_v21  ;;  %v3380_v48 = vadd.f32 %v3334_v55, %v3234_v27  ;;  %v1023_v19 = vpop.f32.mrb[21].mxu1 }
 0x177   : > { %v2238_v22 = vpop.f32.mrb[25].mxu0  ;;  %2693 = vst.msk [vmem:[%s4010_s4 + $0x40] sm:$0xf] %vm2676_vm3, %v3028_v23  ;;  %v3029_v10 = vpack.c.bf16 %v2453_v26, %v2453_v26  ;;  %v3381_v29 = vadd.f32 %v2222_v24, %v1023_v19  ;;  %v3235_v28 = vpop.f32.mrb[22].mxu1 }
 0x178   : > { %v3339_v63 = vpop.f32.mrb[26].mxu0  ;;  %2696 = vst.msk [vmem:[%s4010_s4 + $0x4c] sm:$0xf] %vm2676_vm3, %v3031_v9  ;;  %v2410_v33 = vadd.f32 %v3380_v48, %v4001_v32  ;;  %v3382_v37 = vadd.f32 %v3335_v1, %v3235_v28  ;;  %v1026_v34 = vpop.f32.mrb[23].mxu1 }
 0x179   : > { %v2241_v57 = vpop.f32.mrb[27].mxu0  ;;  %2694 = vst.msk [vmem:[%s4010_s4 + $0x44] sm:$0xf] %vm2676_vm3, %v3029_v10  ;;  %v2408_v35 = vadd.f32 %v3381_v29, %v4001_v32  ;;  %v3383_v52 = vadd.f32 %v2225_v40, %v1026_v34 }
 0x17a   : > { %v2458_v36 = vmax.f32 %v2410_v33, 0.0  ;;  %v2411_v61 = vadd.f32 %v3382_v37, %v4001_v32 }
 0x17b   : > { %v2456_v38 = vmax.f32 %v2408_v35, 0.0  ;;  %v2409_v39 = vadd.f32 %v3383_v52, %v4001_v32 }
 0x17c   : > { %v3034_v62 = vpack.c.bf16 %v2458_v36, %v2458_v36  ;;  %v2459_v7 = vmax.f32 %v2411_v61, 0.0 }
 0x17d   : > { %v3032_v11 = vpack.c.bf16 %v2456_v38, %v2456_v38  ;;  %v2457_v13 = vmax.f32 %v2409_v39, 0.0  ;;  %v3238_v46 = vpop.f32.mrb[24].mxu1 }
 0x17e   : > { %v3342_v42 = vpop.f32.mrb[28].mxu0  ;;  %2699 = vst.msk [vmem:[%s4010_s4 + $0x58] sm:$0xf] %vm2676_vm3, %v3034_v62  ;;  %v3035_v49 = vpack.c.bf16 %v2459_v7, %v2459_v7  ;;  %v3384_v50 = vadd.f32 %v3338_v58, %v3238_v46  ;;  %v1039_v51 = vpop.f32.mrb[25].mxu1 }
 0x17f   : > { %v2254_v45 = vpop.f32.mrb[29].mxu0  ;;  %2697 = vst.msk [vmem:[%s4010_s4 + $0x50] sm:$0xf] %vm2676_vm3, %v3032_v11  ;;  %v3033_v54 = vpack.c.bf16 %v2457_v13, %v2457_v13  ;;  %v3385_v15 = vadd.f32 %v2238_v22, %v1039_v51  ;;  %v3239_v25 = vpop.f32.mrb[26].mxu1 }
 0x180   : > { %v3343_v47 = vpop.f32.mrb[30].mxu0  ;;  %2700 = vst.msk [vmem:[%s4010_s4 + $0x5c] sm:$0xf] %vm2676_vm3, %v3035_v49  ;;  %v2414_v55 = vadd.f32 %v3384_v50, %v4001_v32  ;;  %v3386_v56 = vadd.f32 %v3339_v63, %v3239_v25  ;;  %v1042_v59 = vpop.f32.mrb[27].mxu1 }
 0x181   : > { %v2257_v53 = vpop.f32.mrb[31].mxu0  ;;  %2698 = vst.msk [vmem:[%s4010_s4 + $0x54] sm:$0xf] %vm2676_vm3, %v3033_v54  ;;  %v2412_v24 = vadd.f32 %v3385_v15, %v4001_v32  ;;  %v3387_v30 = vadd.f32 %v2241_v57, %v1042_v59 }
 0x182   : > { %v2462_v60 = vmax.f32 %v2414_v55, 0.0  ;;  %v2415_v0 = vadd.f32 %v3386_v56, %v4001_v32 }
 0x183   : > { %v2460_v1 = vmax.f32 %v2412_v24, 0.0  ;;  %v2413_v2 = vadd.f32 %v3387_v30, %v4001_v32 }
 0x184   : > { %v3038_v31 = vpack.c.bf16 %v2462_v60, %v2462_v60  ;;  %v2463_v40 = vmax.f32 %v2415_v0, 0.0 }
 0x185   : > { %v3036_v5 = vpack.c.bf16 %v2460_v1, %v2460_v1  ;;  %v2461_v6 = vmax.f32 %v2413_v2, 0.0  ;;  %v3242_v8 = vpop.f32.mrb[28].mxu1 }
 0x186   : > { %v3346_v3 = vpop.f32.mrb[32].mxu0  ;;  %2703 = vst.msk [vmem:[%s4010_s4 + $0x68] sm:$0xf] %vm2676_vm3, %v3038_v31  ;;  %v3039_v41 = vpack.c.bf16 %v2463_v40, %v2463_v40  ;;  %v3388_v43 = vadd.f32 %v3342_v42, %v3242_v8  ;;  %v1055_v14 = vpop.f32.mrb[29].mxu1 }
 0x187   : > { %v2270_v4 = vpop.f32.mrb[33].mxu0  ;;  %2701 = vst.msk [vmem:[%s4010_s4 + $0x60] sm:$0xf] %vm2676_vm3, %v3036_v5  ;;  %v3037_v44 = vpack.c.bf16 %v2461_v6, %v2461_v6  ;;  %v3389_v17 = vadd.f32 %v2254_v45, %v1055_v14  ;;  %v3243_v18 = vpop.f32.mrb[30].mxu1 }
 0x188   : > { %v3347_v12 = vpop.f32.mrb[34].mxu0  ;;  %2704 = vst.msk [vmem:[%s4010_s4 + $0x6c] sm:$0xf] %vm2676_vm3, %v3039_v41  ;;  %v2418_v58 = vadd.f32 %v3388_v43, %v4001_v32  ;;  %v3390_v20 = vadd.f32 %v3343_v47, %v3243_v18  ;;  %v1058_v21 = vpop.f32.mrb[31].mxu1 }
 0x189   : > { %v2273_v16 = vpop.f32.mrb[35].mxu0  ;;  %2702 = vst.msk [vmem:[%s4010_s4 + $0x64] sm:$0xf] %vm2676_vm3, %v3037_v44  ;;  %v2416_v22 = vadd.f32 %v3389_v17, %v4001_v32  ;;  %v3391_v23 = vadd.f32 %v2257_v53, %v1058_v21 }
 0x18a   : > { %v2466_v26 = vmax.f32 %v2418_v58, 0.0  ;;  %v2419_v27 = vadd.f32 %v3390_v20, %v4001_v32 }
 0x18b   : > { %v2464_v63 = vmax.f32 %v2416_v22, 0.0  ;;  %v2417_v9 = vadd.f32 %v3391_v23, %v4001_v32 }
 0x18c   : > { %v3042_v19 = vpack.c.bf16 %v2466_v26, %v2466_v26  ;;  %v2467_v57 = vmax.f32 %v2419_v27, 0.0 }
 0x18d   : > { %v3040_v29 = vpack.c.bf16 %v2464_v63, %v2464_v63  ;;  %v2465_v28 = vmax.f32 %v2417_v9, 0.0  ;;  %v3246_v33 = vpop.f32.mrb[32].mxu1 }
 0x18e   : > { %v3350_v48 = vpop.f32.mrb[36].mxu0  ;;  %2707 = vst.msk [vmem:[%s4010_s4 + $0x78] sm:$0xf] %vm2676_vm3, %v3042_v19  ;;  %v3043_v34 = vpack.c.bf16 %v2467_v57, %v2467_v57  ;;  %v3392_v35 = vadd.f32 %v3346_v3, %v3246_v33  ;;  %v1071_v52 = vpop.f32.mrb[33].mxu1 }
 0x18f   : > { %v2286_v10 = vpop.f32.mrb[37].mxu0  ;;  %2705 = vst.msk [vmem:[%s4010_s4 + $0x70] sm:$0xf] %vm2676_vm3, %v3040_v29  ;;  %v3041_v61 = vpack.c.bf16 %v2465_v28, %v2465_v28  ;;  %v3393_v38 = vadd.f32 %v2270_v4, %v1071_v52  ;;  %v3247_v39 = vpop.f32.mrb[34].mxu1 }
 0x190   : > { %v3351_v37 = vpop.f32.mrb[38].mxu0  ;;  %2708 = vst.msk [vmem:[%s4010_s4 + $0x7c] sm:$0xf] %vm2676_vm3, %v3043_v34  ;;  %v2422_v42 = vadd.f32 %v3392_v35, %v4001_v32  ;;  %v3394_v62 = vadd.f32 %v3347_v12, %v3247_v39  ;;  %v1074_v7 = vpop.f32.mrb[35].mxu1 }
 0x191   : > { %v2289_v36 = vpop.f32.mrb[39].mxu0  ;;  %2706 = vst.msk [vmem:[%s4010_s4 + $0x74] sm:$0xf] %vm2676_vm3, %v3041_v61  ;;  %v2420_v45 = vadd.f32 %v3393_v38, %v4001_v32  ;;  %v3395_v11 = vadd.f32 %v2273_v16, %v1074_v7 }
 0x192   : > { %v2470_v13 = vmax.f32 %v2422_v42, 0.0  ;;  %v2423_v46 = vadd.f32 %v3394_v62, %v4001_v32 }
 0x193   : > { %v2468_v47 = vmax.f32 %v2420_v45, 0.0  ;;  %v2421_v49 = vadd.f32 %v3395_v11, %v4001_v32 }
 0x194   : > { %v3046_v51 = vpack.c.bf16 %v2470_v13, %v2470_v13  ;;  %v2471_v53 = vmax.f32 %v2423_v46, 0.0 }
 0x195   : > { %v3044_v15 = vpack.c.bf16 %v2468_v47, %v2468_v47  ;;  %v2469_v25 = vmax.f32 %v2421_v49, 0.0  ;;  %v3250_v55 = vpop.f32.mrb[36].mxu1 }
 0x196   : > { %v3354_v50 = vpop.f32.mrb[40].mxu0  ;;  %2711 = vst.msk [vmem:[%s4010_s4 + $0x88] sm:$0xf] %vm2676_vm3, %v3046_v51  ;;  %v3047_v59 = vpack.c.bf16 %v2471_v53, %v2471_v53  ;;  %v3396_v24 = vadd.f32 %v3350_v48, %v3250_v55  ;;  %v1087_v30 = vpop.f32.mrb[37].mxu1 }
 0x197   : > { %v2302_v54 = vpop.f32.mrb[41].mxu0  ;;  %2709 = vst.msk [vmem:[%s4010_s4 + $0x80] sm:$0xf] %vm2676_vm3, %v3044_v15  ;;  %v3045_v0 = vpack.c.bf16 %v2469_v25, %v2469_v25  ;;  %v3397_v1 = vadd.f32 %v2286_v10, %v1087_v30  ;;  %v3251_v2 = vpop.f32.mrb[38].mxu1 }
 0x198   : > { %v3355_v56 = vpop.f32.mrb[42].mxu0  ;;  %2712 = vst.msk [vmem:[%s4010_s4 + $0x8c] sm:$0xf] %vm2676_vm3, %v3047_v59  ;;  %v2426_v3 = vadd.f32 %v3396_v24, %v4001_v32  ;;  %v3398_v31 = vadd.f32 %v3351_v37, %v3251_v2  ;;  %v1090_v40 = vpop.f32.mrb[39].mxu1 }
 0x199   : > { %v2305_v60 = vpop.f32.mrb[43].mxu0  ;;  %2710 = vst.msk [vmem:[%s4010_s4 + $0x84] sm:$0xf] %vm2676_vm3, %v3045_v0  ;;  %v2424_v4 = vadd.f32 %v3397_v1, %v4001_v32  ;;  %v3399_v5 = vadd.f32 %v2289_v36, %v1090_v40 }
 0x19a   : > { %v2474_v6 = vmax.f32 %v2426_v3, 0.0  ;;  %v2427_v8 = vadd.f32 %v3398_v31, %v4001_v32 }
 0x19b   : > { %v2472_v12 = vmax.f32 %v2424_v4, 0.0  ;;  %v2425_v41 = vadd.f32 %v3399_v5, %v4001_v32 }
 0x19c   : > { %v3050_v14 = vpack.c.bf16 %v2474_v6, %v2474_v6  ;;  %v2475_v16 = vmax.f32 %v2427_v8, 0.0 }
 0x19d   : > { %v3048_v17 = vpack.c.bf16 %v2472_v12, %v2472_v12  ;;  %v2473_v18 = vmax.f32 %v2425_v41, 0.0  ;;  %v3254_v58 = vpop.f32.mrb[40].mxu1 }
 0x19e   : > { %v3358_v43 = vpop.f32.mrb[44].mxu0  ;;  %2715 = vst.msk [vmem:[%s4010_s4 + $0x98] sm:$0xf] %vm2676_vm3, %v3050_v14  ;;  %v3051_v21 = vpack.c.bf16 %v2475_v16, %v2475_v16  ;;  %v3400_v22 = vadd.f32 %v3354_v50, %v3254_v58  ;;  %v1103_v23 = vpop.f32.mrb[41].mxu1 }
 0x19f   : > { %v2318_v44 = vpop.f32.mrb[45].mxu0  ;;  %2713 = vst.msk [vmem:[%s4010_s4 + $0x90] sm:$0xf] %vm2676_vm3, %v3048_v17  ;;  %v3049_v27 = vpack.c.bf16 %v2473_v18, %v2473_v18  ;;  %v3401_v63 = vadd.f32 %v2302_v54, %v1103_v23  ;;  %v3255_v9 = vpop.f32.mrb[42].mxu1 }
 0x1a0   : > { %v3359_v20 = vpop.f32.mrb[46].mxu0  ;;  %2716 = vst.msk [vmem:[%s4010_s4 + $0x9c] sm:$0xf] %vm2676_vm3, %v3051_v21  ;;  %v2430_v48 = vadd.f32 %v3400_v22, %v4001_v32  ;;  %v3402_v19 = vadd.f32 %v3355_v56, %v3255_v9  ;;  %v1106_v57 = vpop.f32.mrb[43].mxu1 }
 0x1a1   : > { %v2321_v26 = vpop.f32.mrb[47].mxu0  ;;  %2714 = vst.msk [vmem:[%s4010_s4 + $0x94] sm:$0xf] %vm2676_vm3, %v3049_v27  ;;  %v2428_v10 = vadd.f32 %v3401_v63, %v4001_v32  ;;  %v3403_v29 = vadd.f32 %v2305_v60, %v1106_v57 }
 0x1a2   : > { %v2478_v28 = vmax.f32 %v2430_v48, 0.0  ;;  %v2431_v33 = vadd.f32 %v3402_v19, %v4001_v32 }
 0x1a3   : > { %v2476_v37 = vmax.f32 %v2428_v10, 0.0  ;;  %v2429_v34 = vadd.f32 %v3403_v29, %v4001_v32 }
 0x1a4   : > { %v3054_v35 = vpack.c.bf16 %v2478_v28, %v2478_v28  ;;  %v2479_v52 = vmax.f32 %v2431_v33, 0.0 }
 0x1a5   : > { %v3052_v36 = vpack.c.bf16 %v2476_v37, %v2476_v37  ;;  %v2477_v61 = vmax.f32 %v2429_v34, 0.0  ;;  %v3258_v38 = vpop.f32.mrb[44].mxu1 }
 0x1a6   : > { %2719 = vst.msk [vmem:[%s4010_s4 + $0xa8] sm:$0xf] %vm2676_vm3, %v3054_v35  ;;  %v3055_v39 = vpack.c.bf16 %v2479_v52, %v2479_v52  ;;  %v3404_v42 = vadd.f32 %v3358_v43, %v3258_v38  ;;  %v1119_v62 = vpop.f32.mrb[45].mxu1 }
 0x1a7   : > { %2717 = vst.msk [vmem:[%s4010_s4 + $0xa0] sm:$0xf] %vm2676_vm3, %v3052_v36  ;;  %v3053_v7 = vpack.c.bf16 %v2477_v61, %v2477_v61  ;;  %v3405_v45 = vadd.f32 %v2318_v44, %v1119_v62  ;;  %v3259_v11 = vpop.f32.mrb[46].mxu1 }
 0x1a8   : > { %2720 = vst.msk [vmem:[%s4010_s4 + $0xac] sm:$0xf] %vm2676_vm3, %v3055_v39  ;;  %v2434_v13 = vadd.f32 %v3404_v42, %v4001_v32  ;;  %v3406_v46 = vadd.f32 %v3359_v20, %v3259_v11  ;;  %v1122_v47 = vpop.f32.mrb[47].mxu1 }
 0x1a9   : > { %2718 = vst.msk [vmem:[%s4010_s4 + $0xa4] sm:$0xf] %vm2676_vm3, %v3053_v7  ;;  %v2432_v49 = vadd.f32 %v3405_v45, %v4001_v32  ;;  %v3407_v50 = vadd.f32 %v2321_v26, %v1122_v47 }
 0x1aa   : > { %v2482_v51 = vmax.f32 %v2434_v13, 0.0  ;;  %v2435_v53 = vadd.f32 %v3406_v46, %v4001_v32 }
 0x1ab   : > { %v2480_v54 = vmax.f32 %v2432_v49, 0.0  ;;  %v2433_v15 = vadd.f32 %v3407_v50, %v4001_v32 }
 0x1ac   : > { %v3058_v25 = vpack.c.bf16 %v2482_v51, %v2482_v51  ;;  %v2483_v55 = vmax.f32 %v2435_v53, 0.0 }
 0x1ad   : > { %v3056_v56 = vpack.c.bf16 %v2480_v54, %v2480_v54  ;;  %v2481_v59 = vmax.f32 %v2433_v15, 0.0 }
 0x1ae   : > { %2723 = vst.msk [vmem:[%s4010_s4 + $0xb8] sm:$0xf] %vm2676_vm3, %v3058_v25  ;;  %v3059_v24 = vpack.c.bf16 %v2483_v55, %v2483_v55 }
 0x1af   : > { %2721 = vst.msk [vmem:[%s4010_s4 + $0xb0] sm:$0xf] %vm2676_vm3, %v3056_v56  ;;  %v3057_v30 = vpack.c.bf16 %v2481_v59, %v2481_v59 }
 0x1b0   : > { %2724 = vst.msk [vmem:[%s4010_s4 + $0xbc] sm:$0xf] %vm2676_vm3, %v3059_v24 }
 0x1b1   : > { %2722 = vst.msk [vmem:[%s4010_s4 + $0xb4] sm:$0xf] %vm2676_vm3, %v3057_v30 }
 0x1b2 PF: > { %s13_s12 = sadd.s32 1, %s3602_s12  }
 0x1b3   : > { %p10_p4 = scmp.ge.s32.totalorder %s13_s12, 4  }
 0x1b5   :  { %12 = sbr.rel (!%p10_p4) target bundleno = 1 (0x1), region = 62 }

// kernel: ocrnet_forward.11
= control target key start
LH: loop header
LB: loop body
LE: loop exit
PB: predicated region body
PF: predicated region fallthrough
CT: control target
= control target key end

     0   :  { %s1686_s12 = smov 0   ;;  %s1926_s0 = inlined_call_operand.vmem [shape: bf16[2,160,64], index: 0, kind: input, shape index: {}]   ;;  %s1927_s1 = inlined_call_operand.vmem [shape: bf16[256,32], index: 1, kind: input, shape index: {}]   ;;  %s1928_s2 = inlined_call_operand.vmem [shape: f32[1,32], index: 2, kind: input, shape index: {}]   ;;  %s1929_s3 = inlined_call_operand.vmem [shape: bf16[2,128,32], index: 3, kind: output, shape index: {}]  }
   0x1 LB: > { %s1297_s13 = sadd.s32 4294967295, %s1664_s12   ;;  %p1301_p0 = scmp.ge.s32.totalorder %s1664_s12, 1  ;;  %s1664_s12 = sphi %s1686_s12, %s13_s12  }
   0x2   : > { %p137_p1 = scmp.lt.s32.totalorder %s1664_s12, 3 }
   0x4   : > { %p138_p2 = pnand %p1301_p0, %p137_p1 }
   0x5   : > { %v1616_v0 = vld [vmem:[%s1927_s1 + $0x20] sm:$0xff] (!%p138_p2)   ;;  %p161_p3 = scmp.lt.s32.totalorder (!%p138_p2), %s1297_s13, 1  ;;  %v1618_v2 = vld [vmem:[%s1927_s1 + $0x28] sm:$0xff] (!%p138_p2)   ;;  %v1620_v4 = vld [vmem:[%s1927_s1 + $0x30] sm:$0xff] (!%p138_p2)   ;;  %vm248_vm0 = vsmask.f32 (!%p138_p2), 7424 }
   0x6   : > { %141 = sbr.rel (%p138_p2) target bundleno = 306 (0x132), region = 32  ;;  %v1617_v1 = vld [vmem:[%s1927_s1 + $0x40] sm:$0xff] (!%p138_p2)   ;;  %1463 = vmatprep.subr.bf16.mxu1 (!%p138_p2), %v1616_v0  ;;  %v1619_v3 = vld [vmem:[%s1927_s1 + $0x48] sm:$0xff] (!%p138_p2)   ;;  %v1621_v5 = vld [vmem:[%s1927_s1 + $0x50] sm:$0xff] (!%p138_p2)   ;;  %vm341_vm1 = vcmask (!%p138_p2), 523264   ;;  %vm1225_vm2 = vcmask (!%p138_p2), 257024  }
   0x7   : > { %1511 = vmatprep.subr.bf16.mxu0 (!%p138_p2), %v1617_v1  ;;  %1464 = vmatpush3.bf16.msra.mxu1 (!%p138_p2), %v1616_v0  ;;  %v1622_v6 = vld [vmem:[%s1927_s1 + $0x38] sm:$0xff] (!%p138_p2)   ;;  %v1628_v18 = vld [vmem:[%s1927_s1] sm:$0xff] (!%p138_p2)   ;;  %v1634_v34 = vld [vmem:[%s1927_s1 + $0x8] sm:$0xff] (!%p138_p2)  }
   0x8   : > { %1512 = vmatpush3.bf16.msra.mxu0 (!%p138_p2), %v1617_v1  ;;  %1465 = vmatprep.subr.bf16.mxu1 (!%p138_p2), %v1618_v2  ;;  %v1623_v7 = vld [vmem:[%s1927_s1 + $0x58] sm:$0xff] (!%p138_p2)   ;;  %v1630_v21 = vld [vmem:[%s1927_s1 + $0x60] sm:$0xff] (!%p138_p2)   ;;  %v1636_v37 = vld [vmem:[%s1927_s1 + $0x68] sm:$0xff] (!%p138_p2)  }
   0x9   : > { %1513 = vmatprep.subr.bf16.mxu0 (!%p138_p2), %v1619_v3  ;;  %v1640_v50 = vld [vmem:[%s1927_s1 + $0x10] sm:$0xff] (!%p138_p2)   ;;  %v1646_v0 = vld [vmem:[%s1927_s1 + $0x18] sm:$0xff] (!%p138_p2)  }
   0xa   : > { %v1642_v53 = vld [vmem:[%s1927_s1 + $0x70] sm:$0xff] (!%p138_p2)  }
   0xb   : > { %1466 = vmatpush3.bf16.msra.mxu1 (!%p138_p2), %v1618_v2 }
   0xc   : > { %1514 = vmatpush3.bf16.msra.mxu0 (!%p138_p2), %v1619_v3  ;;  %1467 = vmatprep.subr.bf16.mxu1 (!%p138_p2), %v1620_v4 }
   0xd   : > { %s1931_s13 = smov (!%p161_p3, %s1297_s13), 1  ;;  %1515 = vmatprep.subr.bf16.mxu0 %v1621_v5 }
   0xe   : > { %s1607_s24 = smul.u32 80, %s1931_s13  ;;  %s1398_s27 = sshll.u32 %s1931_s13, 6 }
   0xf   : > { %1468 = vmatpush3.bf16.msra.mxu1 %v1620_v4  ;;  %s1876_s30 = scalar_lea.vmem %s1929_s3, %s1398_s27 }
  0x10   : > { %s1721_s4 = scalar_lea.vmem %s1926_s0, %s1607_s24  ;;  %1516 = vmatpush3.bf16.msra.mxu0 %v1621_v5  ;;  %1469 = vmatprep.subr.bf16.mxu1 %v1622_v6  ;;  %v1648_v5 = vld [vmem:[%s1927_s1 + $0x78] sm:$0xff]  }
  0x11   : > { %v1727_v8 = vld [vmem:[%s1721_s4] sm:$0xff]   ;;  %v1730_v9 = vld [vmem:[%s1721_s4 + $0x8] sm:$0xff]   ;;  %v1738_v15 = vld [vmem:[%s1721_s4 + $0x10] sm:$0xff]   ;;  %1517 = vmatprep.subr.bf16.mxu0 %v1623_v7 }
  0x12   : > { %v1626_v10 = vld [vmem:[%s1721_s4 + $0x8] sm:$0xff]   ;;  %v250_v11 = vshrl.u32 %v1727_v8, 16  ;;  %v252_v12 = vshll.u32 %v1727_v8, 16  ;;  %v257_v13 = vshll.u32 %v1730_v9, 16  ;;  %v261_v14 = vshrl.u32 %v1730_v9, 16  ;;  %v1629_v19 = vld [vmem:[%s1721_s4 + $0x10] sm:$0xff]  }
  0x13   : > { %1519 = vmatprep.mubr.msk.bf16.mxu0 %vm341_vm1, %v1626_v10  ;;  %v265_v20 = vshll.u32 %v1738_v15, 16  ;;  %1470 = vmatpush3.bf16.msra.mxu1 %v1622_v6  ;;  %v1750_v25 = vld [vmem:[%s1721_s4 + $0x18] sm:$0xff]   ;;  %v269_v26 = vshrl.u32 %v1738_v15, 16  ;;  %v1759_v32 = vld [vmem:[%s1721_s4 + $0x20] sm:$0xff]   ;;  %v1775_v42 = vld [vmem:[%s1721_s4 + $0x28] sm:$0xff]  }
  0x14   : > { %v254_v16 = vrot.slane %v252_v12, 1  ;;  %v259_v17 = vrot.slane %v257_v13, 1  ;;  %1518 = vmatpush3.bf16.msra.mxu0 %v1623_v7  ;;  %1487 = vmatprep.subr.bf16.mxu1 %v1628_v18  ;;  %v1632_v27 = vld [vmem:[%s1721_s4 + $0x18] sm:$0xff]   ;;  %v273_v31 = vshll.u32 %v1750_v25, 16  ;;  %v277_v33 = vshrl.u32 %v1750_v25, 16  ;;  %v1635_v38 = vld [vmem:[%s1721_s4 + $0x20] sm:$0xff]  }
  0x15   : > { %v267_v24 = vrot.slane %v265_v20, 1  ;;  %1535 = vmatprep.subr.bf16.mxu0 %v1630_v21  ;;  %v281_v36 = vshll.u32 %v1759_v32, 16  ;;  %v285_v43 = vshrl.u32 %v1759_v32, 16  ;;  %v1638_v44 = vld [vmem:[%s1721_s4 + $0x28] sm:$0xff]   ;;  %v289_v47 = vshll.u32 %v1775_v42, 16  ;;  %v1783_v48 = vld [vmem:[%s1721_s4 + $0x30] sm:$0xff]  }
  0x16   : > { %v255_v22 = vor.u32 %v254_v16, %v250_v11  ;;  %v263_v23 = vor.u32 %v261_v14, %v259_v17  ;;  %v275_v35 = vrot.slane %v273_v31, 1  ;;  %v293_v49 = vshrl.u32 %v1775_v42, 16  ;;  %v1798_v57 = vld [vmem:[%s1721_s4 + $0x38] sm:$0xff]   ;;  %v1641_v59 = vld [vmem:[%s1721_s4 + $0x30] sm:$0xff]   ;;  %v1649_v7 = vld [vmem:[%s1721_s4 + $0x8] sm:$0xff]  }
  0x17   : > { %v271_v30 = vor.u32 %v269_v26, %v267_v24  ;;  %1520 = vmatmul.mubr.msk.bf16.vlgmr.msra.gmra.mrb[0].mxu0 %vm341_vm1, %v1629_v19  ;;  %v283_v41 = vrot.slane %v281_v36, 1  ;;  %v291_v51 = vrot.slane %v289_v47, 1  ;;  %v297_v52 = vshll.u32 %v1783_v48, 16  ;;  %v1644_v62 = vld [vmem:[%s1721_s4 + $0x38] sm:$0xff]   ;;  %v1650_v10 = vld [vmem:[%s1721_s4 + $0x10] sm:$0xff]   ;;  %v1647_v20 = vld [vmem:[%s1721_s4 + $0x40] sm:$0xff]  }
  0x18   : > { %v260_v28 = vsel %vm248_vm0, %v255_v22, %v259_v17  ;;  %v268_v29 = vsel %vm248_vm0, %v263_v23, %v267_v24  ;;  %1536 = vmatpush3.bf16.msra.mxu0 %v1630_v21  ;;  %1523 = vmatprep.mubr.msk.bf16.mxu0 %vm341_vm1, %v1632_v27  ;;  %v279_v40 = vor.u32 %v277_v33, %v275_v35  ;;  %v301_v58 = vshrl.u32 %v1783_v48, 16  ;;  %v1645_v63 = vld [vmem:[%s1721_s4 + $0x40] ss:$0 sps:$4 sm:$0x11]   ;;  %v1651_v16 = vld [vmem:[%s1721_s4 + $0x18] sm:$0xff]   ;;  %v1653_v31 = vld [vmem:[%s1721_s4 + $0x28] sm:$0xff]  }
  0x19   : > { %1471 = vmatprep.mubr.msk.bf16.mxu1 %vm341_vm1, %v260_v28  ;;  %v276_v39 = vsel %vm248_vm0, %v271_v30, %v275_v35  ;;  %1537 = vmatprep.subr.bf16.mxu0 %v1636_v37  ;;  %v287_v46 = vor.u32 %v285_v43, %v283_v41  ;;  %v295_v55 = vor.u32 %v293_v49, %v291_v51  ;;  %v299_v56 = vrot.slane %v297_v52, 1  ;;  %v1654_v36 = vld [vmem:[%s1721_s4 + $0x30] sm:$0xff]   ;;  %v1656_v49 = vld [vmem:[%s1721_s4 + $0x40] sm:$0xff]  }
  0x1a   : > { %1472 = vmatmul.mubr.msk.bf16.vlgmr.msra.gmra.mrb[0].mxu1 %vm341_vm1, %v268_v29  ;;  %v284_v45 = vsel %vm248_vm0, %v279_v40, %v283_v41  ;;  %v305_v61 = vshll.u32 %v1798_v57, 16  ;;  %v309_v3 = vshrl.u32 %v1798_v57, 16  ;;  %v313_v4 = vshll.u32 %v1645_v63, 16 }
  0x1b   : > { %1488 = vmatpush3.bf16.msra.mxu1 %v1628_v18  ;;  %1475 = vmatprep.mubr.msk.bf16.mxu1 %vm341_vm1, %v276_v39  ;;  %v292_v54 = vsel %vm248_vm0, %v287_v46, %v291_v51  ;;  %v303_v60 = vor.u32 %v301_v58, %v299_v56  ;;  %v300_v1 = vsel %vm248_vm0, %v295_v55, %v299_v56  ;;  %v894_v13 = vshrl.u32 %v1649_v7, 16  ;;  %v1652_v18 = vld [vmem:[%s1721_s4 + $0x20] sm:$0xff]   ;;  %v1657_v56 = vld [vmem:[%s1721_s4 + $0x48] ss:$0 sps:$4 sm:$0x11]  }
  0x1c   : > { %1489 = vmatprep.subr.bf16.mxu1 %v1634_v34  ;;  %1538 = vmatpush3.bf16.msra.mxu0 %v1636_v37  ;;  %v307_v2 = vrot.slane %v305_v61, 1  ;;  %v315_v12 = vrot.slane %v313_v4, 1  ;;  %v896_v14 = vshll.u32 %v1649_v7, 16  ;;  %v901_v17 = vshll.u32 %v1650_v10, 16 }
  0x1d   : > { %1539 = vmatprep.subr.bf16.mxu0 %v1642_v53  ;;  %v909_v22 = vshll.u32 %v1651_v16, 16  ;;  %v905_v26 = vshrl.u32 %v1650_v10, 16  ;;  %v913_v27 = vshrl.u32 %v1651_v16, 16  ;;  %v917_v28 = vshll.u32 %v1652_v18, 16 }
  0x1e   : > { %v308_v6 = vsel %vm248_vm0, %v303_v60, %v307_v2  ;;  %v311_v11 = vor.u32 %v309_v3, %v307_v2  ;;  %v898_v19 = vrot.slane %v896_v14, 1  ;;  %v903_v21 = vrot.slane %v901_v17, 1 }
  0x1f   : > { %1490 = vmatpush3.bf16.msra.mxu1 %v1634_v34  ;;  %1524 = vmatmul.mubr.msk.bf16.gmra.mrb[4].mxu0 %vm341_vm1, %v1635_v38  ;;  %v911_v30 = vrot.slane %v909_v22, 1  ;;  %v919_v35 = vrot.slane %v917_v28, 1  ;;  %v925_v37 = vshll.u32 %v1653_v31, 16  ;;  %v921_v39 = vshrl.u32 %v1652_v18, 16 }
  0x20   : > { %1491 = vmatprep.subr.bf16.mxu1 %v1640_v50  ;;  %1527 = vmatprep.mubr.msk.bf16.mxu0 %vm341_vm1, %v1638_v44  ;;  %v316_v23 = vsel %vm248_vm0, %v311_v11, %v315_v12  ;;  %v899_v24 = vor.u32 %v898_v19, %v894_v13  ;;  %v907_v33 = vor.u32 %v905_v26, %v903_v21  ;;  %v929_v41 = vshrl.u32 %v1653_v31, 16  ;;  %v1655_v44 = vld [vmem:[%s1721_s4 + $0x38] sm:$0xff]  }
  0x21   : > { %1540 = vmatpush3.bf16.msra.mxu0 %v1642_v53  ;;  %v915_v34 = vor.u32 %v913_v27, %v911_v30  ;;  %v933_v43 = vshll.u32 %v1654_v36, 16  ;;  %v937_v52 = vshrl.u32 %v1654_v36, 16  ;;  %v945_v53 = vshrl.u32 %v1655_v44, 16 }
  0x22   : > { %1476 = vmatmul.mubr.msk.bf16.gmra.mrb[4].mxu1 %vm341_vm1, %v284_v45  ;;  %1541 = vmatprep.subr.bf16.mxu0 %v1648_v5  ;;  %v904_v29 = vsel %vm248_vm0, %v899_v24, %v903_v21  ;;  %v912_v38 = vsel %vm248_vm0, %v907_v33, %v911_v30  ;;  %v923_v45 = vor.u32 %v921_v39, %v919_v35  ;;  %v953_v61 = vshrl.u32 %v1656_v49, 16 }
  0x23   : > { %1479 = vmatprep.mubr.msk.bf16.mxu1 %vm341_vm1, %v292_v54  ;;  %1492 = vmatpush3.bf16.msra.mxu1 %v1640_v50  ;;  %v920_v40 = vsel %vm248_vm0, %v915_v34, %v919_v35  ;;  %v935_v47 = vrot.slane %v933_v43, 1  ;;  %v941_v50 = vshll.u32 %v1655_v44, 16  ;;  %v949_v54 = vshll.u32 %v1656_v49, 16 }
  0x24   : > { %1493 = vmatprep.subr.bf16.mxu1 %v1646_v0 }
  0x25   : > { %1542 = vmatpush3.bf16.msra.mxu0 %v1648_v5  ;;  %v939_v55 = vor.u32 %v937_v52, %v935_v47 }
  0x27   : > { %1494 = vmatpush3.bf16.msra.mxu1 %v1646_v0  ;;  %1528 = vmatmul.mubr.msk.bf16.gmra.mrb[8].mxu0 %vm341_vm1, %v1641_v59  ;;  %v951_v59 = vrot.slane %v949_v54, 1 }
  0x28   : > { %1531 = vmatprep.mubr.msk.bf16.mxu0 %vm341_vm1, %v1644_v62  ;;  %v957_v62 = vshll.u32 %v1657_v56, 16 }
  0x2a   : > { %1480 = vmatmul.mubr.msk.bf16.gmra.mrb[8].mxu1 %vm341_vm1, %v300_v1 }
  0x2b   : > { %1483 = vmatprep.mubr.msk.bf16.mxu1 %vm341_vm1, %v308_v6 }
  0x2f   : > { %1532 = vmatmul.mubr.msk.bf16.gmra.mrb[12].mxu0 %vm341_vm1, %v1647_v20 }
  0x30   : > { %1543 = vmatprep.mubr.msk.bf16.mxu0 %vm341_vm1, %v904_v29 }
  0x32   : > { %1484 = vmatmul.mubr.msk.bf16.gmra.mrb[12].mxu1 %vm341_vm1, %v316_v23 }
  0x33   : > { %1495 = vmatprep.mubr.msk.bf16.mxu1 %vm341_vm1, %v1727_v8  ;;  %v927_v8 = vrot.slane %v925_v37, 1 }
  0x35   : > { %v931_v46 = vor.u32 %v929_v41, %v927_v8  ;;  %v928_v51 = vsel %vm248_vm0, %v923_v45, %v927_v8 }
  0x37   : > { %1544 = vmatmul.mubr.msk.bf16.vlgmr.msra.gmra.mrb[0].mxu0 %vm341_vm1, %v912_v38 }
  0x38   : > { %1547 = vmatprep.mubr.msk.bf16.mxu0 %vm341_vm1, %v920_v40 }
  0x3a   : > { %1496 = vmatmul.mubr.msk.bf16.vlgmr.msra.gmra.mrb[0].mxu1 %vm341_vm1, %v1730_v9  ;;  %v936_v9 = vsel %vm248_vm0, %v931_v46, %v935_v47 }
  0x3b   : > { %1499 = vmatprep.mubr.msk.bf16.mxu1 %vm341_vm1, %v1738_v15  ;;  %v943_v15 = vrot.slane %v941_v50, 1 }
  0x3d   : > { %v947_v58 = vor.u32 %v945_v53, %v943_v15  ;;  %v944_v60 = vsel %vm248_vm0, %v939_v55, %v943_v15 }
  0x3f   : > { %1548 = vmatmul.mubr.msk.bf16.gmra.mrb[4].mxu0 %vm341_vm1, %v928_v51  ;;  %v952_v63 = vsel %vm248_vm0, %v947_v58, %v951_v59 }
  0x40   : > { %1551 = vmatprep.mubr.msk.bf16.mxu0 %vm341_vm1, %v936_v9 }
  0x42   : > { %1500 = vmatmul.mubr.msk.bf16.gmra.mrb[4].mxu1 %vm341_vm1, %v1750_v25  ;;  %v955_v25 = vor.u32 %v953_v61, %v951_v59 }
  0x43   : > { %1503 = vmatprep.mubr.msk.bf16.mxu1 %vm341_vm1, %v1759_v32  ;;  %v959_v32 = vrot.slane %v957_v62, 1 }
  0x45   : > { %v960_v0 = vsel %vm248_vm0, %v955_v25, %v959_v32 }
  0x47   : > { %1552 = vmatmul.mubr.msk.bf16.gmra.mrb[8].mxu0 %vm341_vm1, %v944_v60 }
  0x48   : > { %1555 = vmatprep.mubr.msk.bf16.mxu0 %vm341_vm1, %v952_v63 }
  0x4a   : > { %1504 = vmatmul.mubr.msk.bf16.gmra.mrb[8].mxu1 %vm341_vm1, %v1775_v42  ;;  %v1867_v42 = vld [vmem:[%s1928_s2] ss:$0 sm:$0xff] }
  0x4b   : > { %1507 = vmatprep.mubr.msk.bf16.mxu1 %vm341_vm1, %v1783_v48 }
  0x4f   : > { %1556 = vmatmul.mubr.msk.bf16.gmra.mrb[12].mxu0 %vm341_vm1, %v960_v0 }
  0x52   : > { %1508 = vmatmul.mubr.msk.bf16.gmra.mrb[12].mxu1 %vm341_vm1, %v1798_v57 }
 0x10a   : > { %v1545_v2 = vpop.f32.mrb[0].mxu0 }
 0x10b   : > { %v1043_v4 = vpop.f32.mrb[1].mxu0 }
 0x10c   : > { %v1546_v7 = vpop.f32.mrb[2].mxu0 }
 0x10d   : > { %v1497_v1 = vpop.f32.mrb[0].mxu1  ;;  %v1046_v12 = vpop.f32.mrb[3].mxu0 }
 0x10e   : > { %v1559_v48 = vadd.f32 %v1545_v2, %v1497_v1  ;;  %v537_v3 = vpop.f32.mrb[1].mxu1 }
 0x10f   : > { %v1560_v5 = vadd.f32 %v1043_v4, %v537_v3  ;;  %v1498_v6 = vpop.f32.mrb[2].mxu1 }
 0x110   : > { %v1131_v10 = vadd.f32 %v1559_v48, %v1867_v42  ;;  %v1561_v11 = vadd.f32 %v1546_v7, %v1498_v6  ;;  %v540_v57 = vpop.f32.mrb[3].mxu1 }
 0x111   : > { %v1129_v13 = vadd.f32 %v1560_v5, %v1867_v42  ;;  %v1562_v14 = vadd.f32 %v1046_v12, %v540_v57 }
 0x112   : > { %v1147_v16 = vmax.f32 %v1131_v10, 0.0  ;;  %v1132_v17 = vadd.f32 %v1561_v11, %v1867_v42  ;;  %v1549_v26 = vpop.f32.mrb[4].mxu0 }
 0x113   : > { %v1145_v18 = vmax.f32 %v1129_v13, 0.0  ;;  %v1130_v19 = vadd.f32 %v1562_v14, %v1867_v42  ;;  %v1059_v30 = vpop.f32.mrb[5].mxu0 }
 0x114   : > { %v1401_v20 = vpack.c.bf16 %v1147_v16, %v1147_v16  ;;  %v1148_v21 = vmax.f32 %v1132_v17, 0.0  ;;  %v1550_v35 = vpop.f32.mrb[6].mxu0 }
 0x115   : > { %v1399_v22 = vpack.c.bf16 %v1145_v18, %v1145_v18  ;;  %v1146_v23 = vmax.f32 %v1130_v19, 0.0  ;;  %v1501_v24 = vpop.f32.mrb[4].mxu1  ;;  %v1062_v39 = vpop.f32.mrb[7].mxu0 }
 0x116   : > { %1228 = vst.msk [vmem:[%s1876_s30 + $0x8] sm:$0xf] %vm1225_vm2, %v1401_v20  ;;  %v1402_v27 = vpack.c.bf16 %v1148_v21, %v1148_v21  ;;  %v1563_v28 = vadd.f32 %v1549_v26, %v1501_v24  ;;  %v553_v29 = vpop.f32.mrb[5].mxu1 }
 0x117   : > { %1226 = vst.msk [vmem:[%s1876_s30] sm:$0xf] %vm1225_vm2, %v1399_v22  ;;  %v1400_v31 = vpack.c.bf16 %v1146_v23, %v1146_v23  ;;  %v1564_v33 = vadd.f32 %v1059_v30, %v553_v29  ;;  %v1502_v34 = vpop.f32.mrb[6].mxu1 }
 0x118   : > { %1229 = vst.msk [vmem:[%s1876_s30 + $0xc] sm:$0xf] %vm1225_vm2, %v1402_v27  ;;  %v1135_v36 = vadd.f32 %v1563_v28, %v1867_v42  ;;  %v1565_v37 = vadd.f32 %v1550_v35, %v1502_v34  ;;  %v556_v38 = vpop.f32.mrb[7].mxu1 }
 0x119   : > { %1227 = vst.msk [vmem:[%s1876_s30 + $0x4] sm:$0xf] %vm1225_vm2, %v1400_v31  ;;  %v1133_v40 = vadd.f32 %v1564_v33, %v1867_v42  ;;  %v1566_v41 = vadd.f32 %v1062_v39, %v556_v38 }
 0x11a   : > { %v1151_v43 = vmax.f32 %v1135_v36, 0.0  ;;  %v1136_v8 = vadd.f32 %v1565_v37, %v1867_v42  ;;  %v1553_v52 = vpop.f32.mrb[8].mxu0 }
 0x11b   : > { %v1149_v44 = vmax.f32 %v1133_v40, 0.0  ;;  %v1134_v45 = vadd.f32 %v1566_v41, %v1867_v42  ;;  %v1075_v15 = vpop.f32.mrb[9].mxu0 }
 0x11c   : > { %v1405_v46 = vpack.c.bf16 %v1151_v43, %v1151_v43  ;;  %v1152_v47 = vmax.f32 %v1136_v8, 0.0  ;;  %v1554_v59 = vpop.f32.mrb[10].mxu0 }
 0x11d   : > { %v1403_v49 = vpack.c.bf16 %v1149_v44, %v1149_v44  ;;  %v1150_v50 = vmax.f32 %v1134_v45, 0.0  ;;  %v1505_v51 = vpop.f32.mrb[8].mxu1  ;;  %v1078_v63 = vpop.f32.mrb[11].mxu0 }
 0x11e   : > { %1232 = vst.msk [vmem:[%s1876_s30 + $0x18] sm:$0xf] %vm1225_vm2, %v1405_v46  ;;  %v1406_v9 = vpack.c.bf16 %v1152_v47, %v1152_v47  ;;  %v1567_v53 = vadd.f32 %v1553_v52, %v1505_v51  ;;  %v569_v54 = vpop.f32.mrb[9].mxu1 }
 0x11f   : > { %1230 = vst.msk [vmem:[%s1876_s30 + $0x10] sm:$0xf] %vm1225_vm2, %v1403_v49  ;;  %v1404_v55 = vpack.c.bf16 %v1150_v50, %v1150_v50  ;;  %v1568_v56 = vadd.f32 %v1075_v15, %v569_v54  ;;  %v1506_v58 = vpop.f32.mrb[10].mxu1 }
 0x120   : > { %1233 = vst.msk [vmem:[%s1876_s30 + $0x1c] sm:$0xf] %vm1225_vm2, %v1406_v9  ;;  %v1139_v60 = vadd.f32 %v1567_v53, %v1867_v42  ;;  %v1569_v61 = vadd.f32 %v1554_v59, %v1506_v58  ;;  %v572_v62 = vpop.f32.mrb[11].mxu1 }
 0x121   : > { %1231 = vst.msk [vmem:[%s1876_s30 + $0x14] sm:$0xf] %vm1225_vm2, %v1404_v55  ;;  %v1137_v25 = vadd.f32 %v1568_v56, %v1867_v42  ;;  %v1570_v32 = vadd.f32 %v1078_v63, %v572_v62 }
 0x122   : > { %v1155_v0 = vmax.f32 %v1139_v60, 0.0  ;;  %v1140_v1 = vadd.f32 %v1569_v61, %v1867_v42  ;;  %v1557_v10 = vpop.f32.mrb[12].mxu0 }
 0x123   : > { %v1153_v2 = vmax.f32 %v1137_v25, 0.0  ;;  %v1138_v48 = vadd.f32 %v1570_v32, %v1867_v42  ;;  %v1091_v13 = vpop.f32.mrb[13].mxu0 }
 0x124   : > { %v1409_v3 = vpack.c.bf16 %v1155_v0, %v1155_v0  ;;  %v1156_v4 = vmax.f32 %v1140_v1, 0.0  ;;  %v1558_v18 = vpop.f32.mrb[14].mxu0 }
 0x125   : > { %v1407_v5 = vpack.c.bf16 %v1153_v2, %v1153_v2  ;;  %v1154_v6 = vmax.f32 %v1138_v48, 0.0  ;;  %v1509_v7 = vpop.f32.mrb[12].mxu1  ;;  %v1094_v22 = vpop.f32.mrb[15].mxu0 }
 0x126   : > { %1236 = vst.msk [vmem:[%s1876_s30 + $0x28] sm:$0xf] %vm1225_vm2, %v1409_v3  ;;  %v1410_v11 = vpack.c.bf16 %v1156_v4, %v1156_v4  ;;  %v1571_v57 = vadd.f32 %v1557_v10, %v1509_v7  ;;  %v585_v12 = vpop.f32.mrb[13].mxu1 }
 0x127   : > { %1234 = vst.msk [vmem:[%s1876_s30 + $0x20] sm:$0xf] %vm1225_vm2, %v1407_v5  ;;  %v1408_v14 = vpack.c.bf16 %v1154_v6, %v1154_v6  ;;  %v1572_v16 = vadd.f32 %v1091_v13, %v585_v12  ;;  %v1510_v17 = vpop.f32.mrb[14].mxu1 }
 0x128   : > { %1237 = vst.msk [vmem:[%s1876_s30 + $0x2c] sm:$0xf] %vm1225_vm2, %v1410_v11  ;;  %v1143_v19 = vadd.f32 %v1571_v57, %v1867_v42  ;;  %v1573_v20 = vadd.f32 %v1558_v18, %v1510_v17  ;;  %v588_v21 = vpop.f32.mrb[15].mxu1 }
 0x129   : > { %1235 = vst.msk [vmem:[%s1876_s30 + $0x24] sm:$0xf] %vm1225_vm2, %v1408_v14  ;;  %v1141_v23 = vadd.f32 %v1572_v16, %v1867_v42  ;;  %v1574_v24 = vadd.f32 %v1094_v22, %v588_v21 }
 0x12a   : > { %v1159_v26 = vmax.f32 %v1143_v19, 0.0  ;;  %v1144_v27 = vadd.f32 %v1573_v20, %v1867_v42 }
 0x12b   : > { %v1157_v28 = vmax.f32 %v1141_v23, 0.0  ;;  %v1142_v29 = vadd.f32 %v1574_v24, %v1867_v42 }
 0x12c   : > { %v1413_v30 = vpack.c.bf16 %v1159_v26, %v1159_v26  ;;  %v1160_v31 = vmax.f32 %v1144_v27, 0.0 }
 0x12d   : > { %v1411_v33 = vpack.c.bf16 %v1157_v28, %v1157_v28  ;;  %v1158_v34 = vmax.f32 %v1142_v29, 0.0 }
 0x12e   : > { %1240 = vst.msk [vmem:[%s1876_s30 + $0x38] sm:$0xf] %vm1225_vm2, %v1413_v30  ;;  %v1414_v35 = vpack.c.bf16 %v1160_v31, %v1160_v31 }
 0x12f   : > { %1238 = vst.msk [vmem:[%s1876_s30 + $0x30] sm:$0xf] %vm1225_vm2, %v1411_v33  ;;  %v1412_v36 = vpack.c.bf16 %v1158_v34, %v1158_v34 }
 0x130   : > { %1241 = vst.msk [vmem:[%s1876_s30 + $0x3c] sm:$0xf] %vm1225_vm2, %v1414_v35 }
 0x131   : > { %1239 = vst.msk [vmem:[%s1876_s30 + $0x34] sm:$0xf] %vm1225_vm2, %v1412_v36 }
 0x132 PF: > { %s13_s12 = sadd.s32 1, %s1664_s12  }
 0x133   : > { %p10_p4 = scmp.ge.s32.totalorder %s13_s12, 4  }
 0x135   :  { %12 = sbr.rel (!%p10_p4) target bundleno = 1 (0x1), region = 62 }

// kernel: ocrnet_forward.13
= control target key start
LH: loop header
LB: loop body
LE: loop exit
PB: predicated region body
PF: predicated region fallthrough
CT: control target
= control target key end

     0   :  { %vm100_vm0 = vcmask 261120   ;;  %vm390_vm1 = vcmask 64512   ;;  %s665_s1 = inlined_call_operand.vmem [shape: bf16[32,32], index: 1, kind: input, shape index: {}]   ;;  %s666_s0 = inlined_call_operand.vmem [shape: bf16[128,32], index: 0, kind: input, shape index: {}]   ;;  %s667_s3 = inlined_call_operand.vmem [shape: bf16[32,8], index: 3, kind: input, shape index: {}]   ;;  %s668_s2 = inlined_call_operand.vmem [shape: f32[1,32], index: 2, kind: input, shape index: {}]   ;;  %s669_s4 = inlined_call_operand.vmem [shape: f32[1,8], index: 4, kind: input, shape index: {}]   ;;  %s670_s5 = inlined_call_operand.vmem [shape: f32[128,8], index: 5, kind: output, shape index: {}]  }
   0x1   :  { %v501_v0 = vld [vmem:[%s665_s1] sm:$0xff]   ;;  %v502_v1 = vld [vmem:[%s665_s1 + $0x8] sm:$0xff]   ;;  %v505_v4 = vld [vmem:[%s666_s0 + $0x10] sm:$0xff]  }
   0x2   :  { %461 = vmatprep.subr.bf16.mxu0 %v501_v0  ;;  %v503_v2 = vld [vmem:[%s666_s0] sm:$0xff]   ;;  %v504_v3 = vld [vmem:[%s666_s0 + $0x8] sm:$0xff]   ;;  %v506_v5 = vld [vmem:[%s666_s0 + $0x18] sm:$0xff]  }
   0x3   :  { %462 = vmatpush3.bf16.msra.mxu0 %v501_v0  ;;  %465 = vmatprep.mubr.msk.bf16.mxu0 %vm100_vm0, %v503_v2  ;;  %v507_v6 = vld [vmem:[%s666_s0 + $0x20] sm:$0xff]   ;;  %v508_v7 = vld [vmem:[%s666_s0 + $0x28] sm:$0xff]   ;;  %v509_v8 = vld [vmem:[%s666_s0 + $0x30] sm:$0xff]  }
   0x4   :  { %463 = vmatprep.subr.bf16.mxu0 %v502_v1  ;;  %v510_v9 = vld [vmem:[%s666_s0 + $0x38] sm:$0xff]   ;;  %v511_v10 = vld [vmem:[%s667_s3] sm:$0xff]   ;;  %v512_v11 = vld [vmem:[%s667_s3 + $0x8] sm:$0xff]  }
   0x5   :  { %481 = vmatprep.subr.bf16.mxu1 %v511_v10  ;;  %v411_v12 = vld [vmem:[%s668_s2] ss:$0 sm:$0xff] }
   0x6   :  { %482 = vmatpush3.bf16.msra.mxu1 %v511_v10 }
   0x7   :  { %464 = vmatpush3.bf16.msra.mxu0 %v502_v1  ;;  %483 = vmatprep.subr.bf16.mxu1 %v512_v11 }
   0xa   :  { %466 = vmatmul.mubr.msk.bf16.vlgmr.msra.gmra.mrb[0].mxu0 %vm100_vm0, %v504_v3  ;;  %484 = vmatpush3.bf16.msra.mxu1 %v512_v11 }
   0xb   :  { %469 = vmatprep.mubr.msk.bf16.mxu0 %vm100_vm0, %v505_v4 }
  0x12   :  { %470 = vmatmul.mubr.msk.bf16.gmra.mrb[4].mxu0 %vm100_vm0, %v506_v5  ;;  %v430_v5 = vld [vmem:[%s669_s4] ss:$0 sm:$0xff] }
  0x13   :  { %473 = vmatprep.mubr.msk.bf16.mxu0 %vm100_vm0, %v507_v6 }
  0x1a   :  { %474 = vmatmul.mubr.msk.bf16.gmra.mrb[8].mxu0 %vm100_vm0, %v508_v7 }
  0x1b   :  { %477 = vmatprep.mubr.msk.bf16.mxu0 %vm100_vm0, %v509_v8 }
  0x22   :  { %478 = vmatmul.mubr.msk.bf16.gmra.mrb[12].mxu0 %vm100_vm0, %v510_v9 }
  0xdd   :  { %v467_v13 = vpop.f32.mrb[0].mxu0 }
  0xde   :  { %v168_v14 = vadd.f32 %v467_v13, %v411_v12  ;;  %v159_v15 = vpop.f32.mrb[1].mxu0 }
  0xdf   :  { %v160_v16 = vadd.f32 %v411_v12, %v159_v15  ;;  %v468_v17 = vpop.f32.mrb[2].mxu0 }
  0xe0   :  { %v171_v18 = vadd.f32 %v468_v17, %v411_v12  ;;  %v162_v19 = vpop.f32.mrb[3].mxu0  ;;  %v224_v21 = vmax.f32 %v168_v14, 0.0 }
  0xe1   :  { %v163_v20 = vadd.f32 %v411_v12, %v162_v19  ;;  %v222_v23 = vmax.f32 %v160_v16, 0.0 }
  0xe2   :  { %v225_v22 = vmax.f32 %v171_v18, 0.0 }
  0xe3   :  { %v223_v24 = vmax.f32 %v163_v20, 0.0 }
  0xe4   :  { %v239_v25 = vpack.c.bf16 %v225_v22, %v224_v21 }
  0xe5   :  { %v471_v26 = vpop.f32.mrb[4].mxu0  ;;  %v238_v27 = vpack.c.bf16 %v223_v24, %v222_v23 }
  0xe6   :  { %v184_v28 = vadd.f32 %v471_v26, %v411_v12  ;;  %v175_v29 = vpop.f32.mrb[5].mxu0 }
  0xe7   :  { %v176_v30 = vadd.f32 %v411_v12, %v175_v29  ;;  %v472_v31 = vpop.f32.mrb[6].mxu0  ;;  %485 = vmatprep.mubr.msk.bf16.mxu1 %vm100_vm0, %v238_v27 }
  0xe8   :  { %v187_v32 = vadd.f32 %v472_v31, %v411_v12  ;;  %v178_v33 = vpop.f32.mrb[7].mxu0  ;;  %486 = vmatmul.mubr.msk.bf16.vlgmr.msra.gmra.mrb[0].mxu1 %vm100_vm0, %v239_v25  ;;  %v228_v35 = vmax.f32 %v184_v28, 0.0 }
  0xe9   :  { %v179_v34 = vadd.f32 %v411_v12, %v178_v33  ;;  %v226_v37 = vmax.f32 %v176_v30, 0.0 }
  0xea   :  { %v229_v36 = vmax.f32 %v187_v32, 0.0 }
  0xeb   :  { %v227_v38 = vmax.f32 %v179_v34, 0.0 }
  0xec   :  { %v241_v39 = vpack.c.bf16 %v229_v36, %v228_v35 }
  0xed   :  { %v240_v40 = vpack.c.bf16 %v227_v38, %v226_v37  ;;  %v475_v41 = vpop.f32.mrb[8].mxu0 }
  0xee   :  { %v200_v42 = vadd.f32 %v475_v41, %v411_v12  ;;  %v191_v43 = vpop.f32.mrb[9].mxu0 }
  0xef   :  { %v192_v44 = vadd.f32 %v411_v12, %v191_v43  ;;  %v476_v45 = vpop.f32.mrb[10].mxu0  ;;  %489 = vmatprep.mubr.msk.bf16.mxu1 %vm100_vm0, %v240_v40 }
  0xf0   :  { %v203_v46 = vadd.f32 %v476_v45, %v411_v12  ;;  %v194_v47 = vpop.f32.mrb[11].mxu0  ;;  %490 = vmatmul.mubr.msk.bf16.gmra.mrb[4].mxu1 %vm100_vm0, %v241_v39  ;;  %v232_v49 = vmax.f32 %v200_v42, 0.0 }
  0xf1   :  { %v195_v48 = vadd.f32 %v411_v12, %v194_v47  ;;  %v230_v51 = vmax.f32 %v192_v44, 0.0 }
  0xf2   :  { %v233_v50 = vmax.f32 %v203_v46, 0.0 }
  0xf3   :  { %v231_v52 = vmax.f32 %v195_v48, 0.0 }
  0xf4   :  { %v243_v53 = vpack.c.bf16 %v233_v50, %v232_v49 }
  0xf5   :  { %v242_v54 = vpack.c.bf16 %v231_v52, %v230_v51  ;;  %v479_v55 = vpop.f32.mrb[12].mxu0 }
  0xf6   :  { %v216_v56 = vadd.f32 %v479_v55, %v411_v12  ;;  %v207_v57 = vpop.f32.mrb[13].mxu0 }
  0xf7   :  { %v208_v58 = vadd.f32 %v411_v12, %v207_v57  ;;  %v480_v59 = vpop.f32.mrb[14].mxu0  ;;  %493 = vmatprep.mubr.msk.bf16.mxu1 %vm100_vm0, %v242_v54 }
  0xf8   :  { %v219_v60 = vadd.f32 %v480_v59, %v411_v12  ;;  %v210_v61 = vpop.f32.mrb[15].mxu0  ;;  %494 = vmatmul.mubr.msk.bf16.gmra.mrb[8].mxu1 %vm100_vm0, %v243_v53  ;;  %v236_v63 = vmax.f32 %v216_v56, 0.0 }
  0xf9   :  { %v211_v62 = vadd.f32 %v411_v12, %v210_v61  ;;  %v234_v1 = vmax.f32 %v208_v58, 0.0 }
  0xfa   :  { %v237_v0 = vmax.f32 %v219_v60, 0.0 }
  0xfb   :  { %v235_v2 = vmax.f32 %v211_v62, 0.0 }
  0xfc   :  { %v245_v3 = vpack.c.bf16 %v237_v0, %v236_v63 }
  0xfd   :  { %v244_v4 = vpack.c.bf16 %v235_v2, %v234_v1 }
  0xff   :  { %497 = vmatprep.mubr.msk.bf16.mxu1 %vm100_vm0, %v244_v4 }
 0x100   :  { %498 = vmatmul.mubr.msk.bf16.gmra.mrb[12].mxu1 %vm100_vm0, %v245_v3 }
 0x1bb   :  { %v487_v6 = vpop.f32.mrb[0].mxu1 }
 0x1bc   :  { %v336_v7 = vadd.f32 %v487_v6, %v430_v5  ;;  %v327_v8 = vpop.f32.mrb[1].mxu1 }
 0x1bd   :  { %v328_v9 = vadd.f32 %v430_v5, %v327_v8  ;;  %v488_v10 = vpop.f32.mrb[2].mxu1 }
 0x1be   :  { %393 = vst.msk [vmem:[%s670_s5 + $0x10] sm:$0xff] %vm390_vm1, %v336_v7  ;;  %v339_v11 = vadd.f32 %v488_v10, %v430_v5  ;;  %v330_v12 = vpop.f32.mrb[3].mxu1 }
 0x1bf   :  { %391 = vst.msk [vmem:[%s670_s5] sm:$0xff] %vm390_vm1, %v328_v9  ;;  %v331_v13 = vadd.f32 %v430_v5, %v330_v12 }
 0x1c0   :  { %394 = vst.msk [vmem:[%s670_s5 + $0x18] sm:$0xff] %vm390_vm1, %v339_v11 }
 0x1c1   :  { %392 = vst.msk [vmem:[%s670_s5 + $0x8] sm:$0xff] %vm390_vm1, %v331_v13 }
 0x1c3   :  { %v491_v14 = vpop.f32.mrb[4].mxu1 }
 0x1c4   :  { %v352_v15 = vadd.f32 %v491_v14, %v430_v5  ;;  %v343_v16 = vpop.f32.mrb[5].mxu1 }
 0x1c5   :  { %v344_v17 = vadd.f32 %v430_v5, %v343_v16  ;;  %v492_v18 = vpop.f32.mrb[6].mxu1 }
 0x1c6   :  { %397 = vst.msk [vmem:[%s670_s5 + $0x30] sm:$0xff] %vm390_vm1, %v352_v15  ;;  %v355_v19 = vadd.f32 %v492_v18, %v430_v5  ;;  %v346_v20 = vpop.f32.mrb[7].mxu1 }
 0x1c7   :  { %395 = vst.msk [vmem:[%s670_s5 + $0x20] sm:$0xff] %vm390_vm1, %v344_v17  ;;  %v347_v21 = vadd.f32 %v430_v5, %v346_v20 }
 0x1c8   :  { %398 = vst.msk [vmem:[%s670_s5 + $0x38] sm:$0xff] %vm390_vm1, %v355_v19 }
 0x1c9   :  { %396 = vst.msk [vmem:[%s670_s5 + $0x28] sm:$0xff] %vm390_vm1, %v347_v21 }
 0x1cb   :  { %v495_v22 = vpop.f32.mrb[8].mxu1 }
 0x1cc   :  { %v368_v23 = vadd.f32 %v495_v22, %v430_v5  ;;  %v359_v24 = vpop.f32.mrb[9].mxu1 }
 0x1cd   :  { %v360_v25 = vadd.f32 %v430_v5, %v359_v24  ;;  %v496_v26 = vpop.f32.mrb[10].mxu1 }
 0x1ce   :  { %401 = vst.msk [vmem:[%s670_s5 + $0x50] sm:$0xff] %vm390_vm1, %v368_v23  ;;  %v371_v27 = vadd.f32 %v496_v26, %v430_v5  ;;  %v362_v28 = vpop.f32.mrb[11].mxu1 }
 0x1cf   :  { %399 = vst.msk [vmem:[%s670_s5 + $0x40] sm:$0xff] %vm390_vm1, %v360_v25  ;;  %v363_v29 = vadd.f32 %v430_v5, %v362_v28 }
 0x1d0   :  { %402 = vst.msk [vmem:[%s670_s5 + $0x58] sm:$0xff] %vm390_vm1, %v371_v27 }
 0x1d1   :  { %400 = vst.msk [vmem:[%s670_s5 + $0x48] sm:$0xff] %vm390_vm1, %v363_v29 }
 0x1d3   :  { %v499_v30 = vpop.f32.mrb[12].mxu1 }
 0x1d4   :  { %v384_v31 = vadd.f32 %v499_v30, %v430_v5  ;;  %v375_v32 = vpop.f32.mrb[13].mxu1 }
 0x1d5   :  { %v376_v33 = vadd.f32 %v430_v5, %v375_v32  ;;  %v500_v34 = vpop.f32.mrb[14].mxu1 }
 0x1d6   :  { %405 = vst.msk [vmem:[%s670_s5 + $0x70] sm:$0xff] %vm390_vm1, %v384_v31  ;;  %v387_v35 = vadd.f32 %v500_v34, %v430_v5  ;;  %v378_v36 = vpop.f32.mrb[15].mxu1 }
 0x1d7   :  { %403 = vst.msk [vmem:[%s670_s5 + $0x60] sm:$0xff] %vm390_vm1, %v376_v33  ;;  %v379_v37 = vadd.f32 %v430_v5, %v378_v36 }
 0x1d8   :  { %406 = vst.msk [vmem:[%s670_s5 + $0x78] sm:$0xff] %vm390_vm1, %v387_v35 }
 0x1d9   :  { %404 = vst.msk [vmem:[%s670_s5 + $0x68] sm:$0xff] %vm390_vm1, %v379_v37 }

// kernel: ocrnet_forward.16
= control target key start
LH: loop header
LB: loop body
LE: loop exit
PB: predicated region body
PF: predicated region fallthrough
CT: control target
= control target key end

     0   :  { %v387_v0 = vmov 0.0   ;;  %vm388_vm0 = vmmov 0   ;;  %vm75_vm1 = vcmask 523264   ;;  %vm146_vm2 = vcmask 261120   ;;  %s497_s1 = inlined_call_operand.vmem [shape: bf16[64,32], index: 1, kind: input, shape index: {}]   ;;  %s498_s0 = inlined_call_operand.vmem [shape: bf16[16,64], index: 0, kind: input, shape index: {}]   ;;  %s499_s3 = inlined_call_operand.vmem [shape: bf16[32,32], index: 3, kind: input, shape index: {}]   ;;  %s500_s5 = inlined_call_operand.vmem [shape: bf16[64,32], index: 5, kind: input, shape index: {}]   ;;  %s501_s2 = inlined_call_operand.vmem [shape: f32[1,32], index: 2, kind: input, shape index: {}]   ;;  %s502_s4 = inlined_call_operand.vmem [shape: f32[1,32], index: 4, kind: input, shape index: {}]   ;;  %s503_s7 = inlined_call_operand.vmem [shape: bf16[16,32], index: 7, kind: output, shape index: {0}]   ;;  %s504_s6 = inlined_call_operand.vmem [shape: f32[1,32], index: 6, kind: input, shape index: {}]   ;;  %s505_s8 = inlined_call_operand.vmem [shape: bf16[16,32], index: 8, kind: output, shape index: {1}]  }
   0x1   :  { %342 = vmatprep.subr.bf16.mxu0 %v387_v0  ;;  %v376_v1 = vld [vmem:[%s497_s1] sm:$0xff]   ;;  %350 = vmatprep.mubr.msk.bf16.mxu0 %vm388_vm0, %v387_v0  ;;  %v377_v2 = vld [vmem:[%s497_s1 + $0x8] sm:$0xff]   ;;  %v378_v3 = vld [vmem:[%s497_s1 + $0x10] sm:$0xff]   ;;  %vm283_vm3 = vcmask 257024  }
   0x2   :  { %354 = vmatprep.subr.bf16.mxu1 %v387_v0  ;;  %358 = vmatprep.mubr.msk.bf16.mxu1 %vm388_vm0, %v387_v0  ;;  %v379_v4 = vld [vmem:[%s497_s1 + $0x18] sm:$0xff]   ;;  %v380_v5 = vld [vmem:[%s498_s0] sm:$0xff]   ;;  %v382_v7 = vld [vmem:[%s499_s3 + $0x8] sm:$0xff]  }
   0x3   :  { %343 = vmatpush3.bf16.msra.mxu0 %v376_v1  ;;  %v381_v6 = vld [vmem:[%s499_s3] sm:$0xff]   ;;  %v384_v19 = vld [vmem:[%s500_s5 + $0x8] sm:$0xff]   ;;  %v385_v20 = vld [vmem:[%s500_s5 + $0x10] sm:$0xff]  }
   0x4   :  { %344 = vmatprep.subr.bf16.mxu0 %v387_v0  ;;  %355 = vmatpush3.bf16.msra.mxu1 %v381_v6  ;;  %v304_v8 = vld [vmem:[%s501_s2] ss:$0 sm:$0xff]  ;;  %v386_v21 = vld [vmem:[%s500_s5 + $0x18] sm:$0xff]  }
   0x5   :  { %356 = vmatprep.subr.bf16.mxu1 %v387_v0  ;;  %v383_v17 = vld [vmem:[%s500_s5] sm:$0xff]  }
   0x6   :  { %v311_v22 = vld [vmem:[%s502_s4] ss:$0 sm:$0xff] }
   0x7   :  { %345 = vmatpush3.bf16.msra.mxu0 %v377_v2  ;;  %v315_v33 = vld [vmem:[%s504_s6] ss:$0 sm:$0xff] }
   0x8   :  { %346 = vmatprep.subr.bf16.mxu0 %v387_v0  ;;  %357 = vmatpush3.bf16.msra.mxu1 %v382_v7 }
   0x9   :  { %362 = vmatprep.subr.bf16.mxu1 %v387_v0 }
   0xb   :  { %347 = vmatpush3.bf16.msra.mxu0 %v378_v3 }
   0xc   :  { %348 = vmatprep.subr.bf16.mxu0 %v387_v0 }
   0xf   :  { %349 = vmatpush3.bf16.msra.mxu0 %v379_v4 }
  0x12   :  { %351 = vmatmul.mubr.msk.bf16.vlgmr.msra.gmra.mrb[0].mxu0 %vm75_vm1, %v380_v5 }
  0xe5   :  { %v113_v9 = vpop.f32.mrb[0].mxu0 }
  0xe6   :  { %v114_v10 = vadd.f32 %v304_v8, %v113_v9  ;;  %v352_v11 = vpop.f32.mrb[1].mxu0 }
  0xe7   :  { %v116_v12 = vpop.f32.mrb[2].mxu0 }
  0xe8   :  { %v117_v13 = vadd.f32 %v304_v8, %v116_v12  ;;  %v353_v14 = vpop.f32.mrb[3].mxu0  ;;  %v120_v15 = vmax.f32 %v114_v10, 0.0 }
  0xea   :  { %v121_v16 = vmax.f32 %v117_v13, 0.0 }
  0xec   :  { %v122_v18 = vpack.c.bf16 %v121_v16, %v120_v15 }
  0xee   :  { %359 = vmatmul.mubr.msk.bf16.vlgmr.msra.gmra.mrb[0].mxu1 %vm146_vm2, %v122_v18 }
  0xef   :  { %363 = vmatpush3.bf16.msra.mxu1 %v383_v17  ;;  %370 = vmatprep.mubr.msk.bf16.mxu1 %vm388_vm0, %v387_v0 }
  0xf0   :  { %364 = vmatprep.subr.bf16.mxu1 %v387_v0 }
  0xf3   :  { %365 = vmatpush3.bf16.msra.mxu1 %v384_v19 }
  0xf4   :  { %366 = vmatprep.subr.bf16.mxu1 %v387_v0 }
  0xf7   :  { %367 = vmatpush3.bf16.msra.mxu1 %v385_v20 }
  0xf8   :  { %368 = vmatprep.subr.bf16.mxu1 %v387_v0 }
  0xfb   :  { %369 = vmatpush3.bf16.msra.mxu1 %v386_v21 }
  0xfe   :  { %371 = vmatmul.mubr.msk.bf16.vlgmr.msra.gmra.mrb[4].mxu1 %vm75_vm1, %v380_v5 }
 0x1c1   :  { %v184_v23 = vpop.f32.mrb[0].mxu1 }
 0x1c2   :  { %v185_v24 = vadd.f32 %v311_v22, %v184_v23  ;;  %v360_v25 = vpop.f32.mrb[1].mxu1 }
 0x1c3   :  { %v187_v26 = vpop.f32.mrb[2].mxu1 }
 0x1c4   :  { %v191_v27 = vmax.f32 %v185_v24, 0.0  ;;  %v188_v28 = vadd.f32 %v311_v22, %v187_v26  ;;  %v361_v29 = vpop.f32.mrb[3].mxu1 }
 0x1c6   :  { %v325_v30 = vpack.c.bf16 %v191_v27, %v191_v27  ;;  %v192_v31 = vmax.f32 %v188_v28, 0.0 }
 0x1c8   :  { %284 = vst.msk [vmem:[%s503_s7] sm:$0xf] %vm283_vm3, %v325_v30  ;;  %v326_v32 = vpack.c.bf16 %v192_v31, %v192_v31 }
 0x1ca   :  { %285 = vst.msk [vmem:[%s503_s7 + $0x4] sm:$0xf] %vm283_vm3, %v326_v32 }
 0x1d1   :  { %v266_v34 = vpop.f32.mrb[4].mxu1 }
 0x1d2   :  { %v267_v35 = vadd.f32 %v315_v33, %v266_v34  ;;  %v372_v36 = vpop.f32.mrb[5].mxu1 }
 0x1d3   :  { %v269_v37 = vpop.f32.mrb[6].mxu1 }
 0x1d4   :  { %v273_v38 = vmax.f32 %v267_v35, 0.0  ;;  %v270_v39 = vadd.f32 %v315_v33, %v269_v37  ;;  %v373_v40 = vpop.f32.mrb[7].mxu1 }
 0x1d6   :  { %v327_v41 = vpack.c.bf16 %v273_v38, %v273_v38  ;;  %v274_v42 = vmax.f32 %v270_v39, 0.0 }
 0x1d8   :  { %294 = vst.msk [vmem:[%s505_s8] sm:$0xf] %vm283_vm3, %v327_v41  ;;  %v328_v43 = vpack.c.bf16 %v274_v42, %v274_v42 }
 0x1da   :  { %295 = vst.msk [vmem:[%s505_s8 + $0x4] sm:$0xf] %vm283_vm3, %v328_v43 }

// kernel: ocrnet_forward.14
= control target key start
LH: loop header
LB: loop body
LE: loop exit
PB: predicated region body
PF: predicated region fallthrough
CT: control target
= control target key end

     0   :  { %s534_s9 = smov 0   ;;  %s536_s10 = smov 0   ;;  %s584_s0 = inlined_call_operand.vmem [shape: f32[2,8,64], index: 0, kind: input, shape index: {}]   ;;  %s585_s1 = inlined_call_operand.vmem [shape: bf16[2,64,64], index: 1, kind: input, shape index: {}]   ;;  %s586_s2 = inlined_call_operand.vmem [shape: bf16[2,8,64], index: 2, kind: output, shape index: {}]  }
   0x1   :  { %s538_s11 = smov 0  }
   0x2 LB: > { %s24_s12 = sadd.s32 1, %s509_s10  ;;  %p421_p0 = scmp.ge.s32.totalorder %s513_s11, 1  ;;  %s513_s11 = sphi %s538_s11, %s12_s11   ;;  %s509_s10 = sphi %s536_s10, %s588_s10   ;;  %s505_s9 = sphi %s534_s9, %s587_s9  }
   0x3   : > { %p26_p1 = scmp.ge.s32.totalorder %s24_s12, 2  ;;  %p145_p2 = scmp.lt.s32.totalorder %s513_s11, 3 }
   0x5   : > { %s590_s12 = smov (%p26_p1, %s24_s12), 0  ;;  %p146_p3 = pnand %p421_p0, %p145_p2 }
   0x6   : > { %p177_p4 = scmp.lt.s32.totalorder (!%p146_p3), %s505_s9, 1  ;;  %vm203_vm0 = vcmask (!%p146_p3), 7168   ;;  %v515_v0 = vmov (!%p146_p3), -inf   ;;  %vm206_vm1 = vcmask (!%p146_p3), 523264   ;;  %v516_v3 = vmov (!%p146_p3), 0  }
   0x7   : > { %149 = sbr.rel (%p146_p3) target bundleno = 603 (0x25b), region = 28  ;;  %204 = vst.msk [vmem:[#allocation2] sm:$0xff] (!%p146_p3), %vm203_vm0, %v515_v0  ;;  %479 = vset.pattern.permute.xlu0 (!%p146_p3), %v516_v3  ;;  %480 = vset.pattern.permute.xlu1 (!%p146_p3), %v516_v3  ;;  %v517_v4 = vmov (!%p146_p3), 0.0   ;;  %vm518_vm2 = vmmov (!%p146_p3), 0   ;;  %vm333_vm3 = vcmask (!%p146_p3), 519168  }
   0x8   : > { %207 = vst.msk [vmem:[#allocation4] sm:$0xff] (!%p146_p3), %vm206_vm1, %v517_v4  ;;  %439 = vmatprep.subr.bf16.mxu0 (!%p146_p3), %v517_v4  ;;  %447 = vmatprep.mubr.msk.bf16.mxu0 (!%p146_p3), %vm518_vm2, %v517_v4 }
   0x9   : > { %205 = vst.msk [vmem:[#allocation3] sm:$0xff] (!%p146_p3), %vm203_vm0, %v517_v4 }
   0xe   : > { %s592_s9 = smov (!%p177_p4, %s505_s9), 1  ;;  %v209_v5 = vld [vmem:[#allocation2] sm:$0xff] }
   0xf   : > { %s422_s13 = sshll.u32 %s592_s9, 3  ;;  %s433_s14 = sshll.u32 %s592_s9, 5  ;;  %v234_v26 = vld [vmem:[#allocation4] sm:$0xff] }
  0x10   : > { %s183_s17 = scalar_lea.vmem %s584_s0, %s422_s13  ;;  %s192_s20 = scalar_lea.vmem %s585_s1, %s433_s14  ;;  %v226_v21 = vld [vmem:[#allocation3] sm:$0xff] }
  0x11   : > { %v208_v1 = vld [vmem:[%s183_s17] sm:$0xff]  ;;  %v482_v10 = vld [vmem:[%s192_s20 + $0x8] sm:$0xff]   ;;  %v483_v11 = vld [vmem:[%s192_s20 + $0x10] sm:$0xff]   ;;  %s425_s21 = sshll.u32 %s592_s9, 2 }
  0x12   : > { %v211_v2 = vsel %vm206_vm1, %v208_v1, -inf  ;;  %v481_v9 = vld [vmem:[%s192_s20] sm:$0xff]   ;;  %v484_v12 = vld [vmem:[%s192_s20 + $0x18] sm:$0xff]   ;;  %s197_s24 = scalar_lea.vmem %s586_s2, %s425_s21 }
  0x13   : > { %212 = vmax.xlane.f32.xlu0 %v211_v2  ;;  %440 = vmatpush3.bf16.msra.mxu0 %v481_v9 }
  0x14   : > { %441 = vmatprep.subr.bf16.mxu0 %v517_v4 }
  0x17   : > { %442 = vmatpush3.bf16.msra.mxu0 %v482_v10 }
  0x18   : > { %443 = vmatprep.subr.bf16.mxu0 %v517_v4 }
  0x1b   : > { %444 = vmatpush3.bf16.msra.mxu0 %v483_v11 }
  0x1c   : > { %445 = vmatprep.subr.bf16.mxu0 %v517_v4 }
  0x1f   : > { %446 = vmatpush3.bf16.msra.mxu0 %v484_v12 }
  0xa0   : > { %v213_v6 = vpop.xlane.xlu0 %212 }
  0xa1   : > { %v214_v7 = vmax.f32 %v209_v5, %v213_v6 }
  0xa3   : > { %v215_v8 = vsub.f32 %v209_v5, %v214_v7  ;;  %319 = vst.msk [vmem:[#allocation2] sm:$0xff] %vm203_vm0, %v214_v7  ;;  %220 = vperm.xlu0 %479, %v214_v7  }
  0xa5   : > { %v216_v19 = vmul.f32 1.442695, %v215_v8 }
 0x122   : > { %v221_v13 = vpop.permute.xlu0 %220 }
 0x123   : > { %v223_v14 = vsub.f32 %v208_v1, %v221_v13 }
 0x125   : > { %v224_v15 = vmul.f32 1.442695, %v223_v14 }
 0x127   : > { %485 = vpow2.f32 %v224_v15 }
 0x128   : > { %487 = vpow2.f32 %v216_v19 }
 0x131   : > { %v486_v16 = vpop.eup %485 }
 0x132   : > { %v228_v17 = vsel %vm206_vm1, %v486_v16, 0.0  ;;  %v241_v18 = vpack.c.bf16 %v486_v16, %v486_v16  ;;  %v488_v20 = vpop.eup %487 }
 0x133   : > { %229 = vadd.xlane.f32.xlu1 %v228_v17  ;;  %v227_v22 = vmul.f32 %v488_v20, %v226_v21 }
 0x134   : > { %448 = vmatmul.mubr.msk.bf16.vlgmr.msra.gmra.mrb[0].mxu0 %vm206_vm1, %v241_v18 }
 0x144   : > { %237 = vperm.xlu1 %480, %v488_v20  }
 0x1c0   : > { %v230_v23 = vpop.xlane.xlu1 %229 }
 0x1c1   : > { %v231_v24 = vadd.f32 %v230_v23, %v227_v22 }
 0x1c3   : > { %233 = vst.msk [vmem:[#allocation3] sm:$0xff] %vm203_vm0, %v231_v24 }
 0x1c4   : > { %v238_v27 = vpop.permute.xlu1 %237 }
 0x1c5   : > { %v240_v28 = vmul.f32 %v238_v27, %v234_v26 }
 0x1ca   : > { %v324_v25 = vld [vmem:[#allocation3] sm:$0xff] }
 0x1cb   : > { %327 = vperm.xlu1 %480, %v324_v25  }
 0x207   : > { %v311_v29 = vpop.f32.mrb[0].mxu0 }
 0x208   : > { %v317_v30 = vadd.f32 %v311_v29, %v240_v28  ;;  %v449_v31 = vpop.f32.mrb[1].mxu0 }
 0x209   : > { %v314_v32 = vpop.f32.mrb[2].mxu0 }
 0x20a   : > { %318 = vst.msk [vmem:[#allocation4] sm:$0xff] %vm206_vm1, %v317_v30  ;;  %v450_v33 = vpop.f32.mrb[3].mxu0 }
 0x211   : > { %v323_v36 = vld [vmem:[#allocation4] sm:$0xff] }
 0x24a   : > { %v328_v34 = vpop.permute.xlu1 %327 }
 0x24b   : > { %489 = vrcp.f32 %v328_v34 }
 0x255   : > { %v490_v35 = vpop.eup %489 }
 0x256   : > { %v331_v37 = vmul.f32 %v490_v35, %v323_v36 }
 0x258   : > { %v332_v38 = vpack.c.bf16 %v331_v37, %v331_v37 }
 0x25a   : > { %334 = vst.msk [vmem:[%s197_s24] sm:$0xf] %vm333_vm3, %v332_v38 }
 0x25b PF: > { %s12_s11 = sadd.s32 1, %s513_s11   ;;  %s587_s9 = smov %s509_s10 }
 0x25c   : > { %p9_p5 = scmp.ge.s32.totalorder %s12_s11, 4   ;;  %s588_s10 = smov %s590_s12 }
 0x25e   :  { %11 = sbr.rel (!%p9_p5) target bundleno = 2 (0x2), region = 69 }

// kernel: ocrnet_forward.15
= control target key start
LH: loop header
LB: loop body
LE: loop exit
PB: predicated region body
PF: predicated region fallthrough
CT: control target
= control target key end

     0   :  { %vm116_vm0 = vcmask 523264   ;;  %vm285_vm1 = vcmask 261120   ;;  %vm487_vm2 = vcmask 257024   ;;  %s828_s1 = inlined_call_operand.vmem [shape: bf16[64,32], index: 1, kind: input, shape index: {}]   ;;  %s829_s0 = inlined_call_operand.vmem [shape: bf16[128,64], index: 0, kind: input, shape index: {}]   ;;  %s830_s3 = inlined_call_operand.vmem [shape: bf16[32,32], index: 3, kind: input, shape index: {}]   ;;  %s831_s2 = inlined_call_operand.vmem [shape: f32[1,32], index: 2, kind: input, shape index: {}]   ;;  %s832_s4 = inlined_call_operand.vmem [shape: f32[1,32], index: 4, kind: input, shape index: {}]   ;;  %s833_s5 = inlined_call_operand.vmem [shape: bf16[128,32], index: 5, kind: output, shape index: {}]  }
   0x1   :  { %v638_v0 = vld [vmem:[%s828_s1] sm:$0xff]   ;;  %v639_v1 = vld [vmem:[%s828_s1 + $0x8] sm:$0xff]   ;;  %v640_v2 = vld [vmem:[%s828_s1 + $0x10] sm:$0xff]  }
   0x2   :  { %594 = vmatprep.subr.bf16.mxu0 %v638_v0  ;;  %v642_v3 = vld [vmem:[%s829_s0] sm:$0xff]   ;;  %v641_v4 = vld [vmem:[%s828_s1 + $0x18] sm:$0xff]   ;;  %v643_v5 = vld [vmem:[%s829_s0 + $0x8] sm:$0xff]  }
   0x3   :  { %595 = vmatpush3.bf16.msra.mxu0 %v638_v0  ;;  %602 = vmatprep.mubr.msk.bf16.mxu0 %vm116_vm0, %v642_v3  ;;  %v644_v6 = vld [vmem:[%s829_s0 + $0x10] sm:$0xff]   ;;  %v645_v7 = vld [vmem:[%s829_s0 + $0x18] sm:$0xff]   ;;  %v646_v8 = vld [vmem:[%s829_s0 + $0x20] sm:$0xff]  }
   0x4   :  { %596 = vmatprep.subr.bf16.mxu0 %v639_v1  ;;  %v647_v9 = vld [vmem:[%s829_s0 + $0x28] sm:$0xff]   ;;  %v648_v10 = vld [vmem:[%s829_s0 + $0x30] sm:$0xff]   ;;  %v649_v11 = vld [vmem:[%s829_s0 + $0x38] sm:$0xff]  }
   0x5   :  { %v650_v12 = vld [vmem:[%s830_s3] sm:$0xff]   ;;  %v651_v13 = vld [vmem:[%s830_s3 + $0x8] sm:$0xff]  }
   0x6   :  { %618 = vmatprep.subr.bf16.mxu1 %v650_v12  ;;  %v508_v14 = vld [vmem:[%s831_s2] ss:$0 sm:$0xff] }
   0x7   :  { %597 = vmatpush3.bf16.msra.mxu0 %v639_v1  ;;  %619 = vmatpush3.bf16.msra.mxu1 %v650_v12 }
   0x8   :  { %598 = vmatprep.subr.bf16.mxu0 %v640_v2  ;;  %620 = vmatprep.subr.bf16.mxu1 %v651_v13 }
   0xb   :  { %599 = vmatpush3.bf16.msra.mxu0 %v640_v2  ;;  %621 = vmatpush3.bf16.msra.mxu1 %v651_v13 }
   0xc   :  { %600 = vmatprep.subr.bf16.mxu0 %v641_v4 }
   0xf   :  { %601 = vmatpush3.bf16.msra.mxu0 %v641_v4 }
  0x12   :  { %603 = vmatmul.mubr.msk.bf16.vlgmr.msra.gmra.mrb[0].mxu0 %vm116_vm0, %v643_v5 }
  0x13   :  { %606 = vmatprep.mubr.msk.bf16.mxu0 %vm116_vm0, %v644_v6 }
  0x1a   :  { %607 = vmatmul.mubr.msk.bf16.gmra.mrb[4].mxu0 %vm116_vm0, %v645_v7  ;;  %v746_v7 = vld [vmem:[%s832_s4] ss:$0 sm:$0xff] }
  0x1b   :  { %610 = vmatprep.mubr.msk.bf16.mxu0 %vm116_vm0, %v646_v8 }
  0x22   :  { %611 = vmatmul.mubr.msk.bf16.gmra.mrb[8].mxu0 %vm116_vm0, %v647_v9 }
  0x23   :  { %614 = vmatprep.mubr.msk.bf16.mxu0 %vm116_vm0, %v648_v10 }
  0x2a   :  { %615 = vmatmul.mubr.msk.bf16.gmra.mrb[12].mxu0 %vm116_vm0, %v649_v11 }
  0xe5   :  { %v604_v15 = vpop.f32.mrb[0].mxu0 }
  0xe6   :  { %v184_v16 = vadd.f32 %v604_v15, %v508_v14  ;;  %v175_v17 = vpop.f32.mrb[1].mxu0 }
  0xe7   :  { %v176_v18 = vadd.f32 %v508_v14, %v175_v17  ;;  %v605_v19 = vpop.f32.mrb[2].mxu0 }
  0xe8   :  { %v187_v20 = vadd.f32 %v605_v19, %v508_v14  ;;  %v178_v21 = vpop.f32.mrb[3].mxu0  ;;  %v240_v23 = vmax.f32 %v184_v16, 0.0 }
  0xe9   :  { %v179_v22 = vadd.f32 %v508_v14, %v178_v21  ;;  %v238_v25 = vmax.f32 %v176_v18, 0.0 }
  0xea   :  { %v241_v24 = vmax.f32 %v187_v20, 0.0 }
  0xeb   :  { %v239_v26 = vmax.f32 %v179_v22, 0.0 }
  0xec   :  { %v255_v27 = vpack.c.bf16 %v241_v24, %v240_v23 }
  0xed   :  { %v608_v28 = vpop.f32.mrb[4].mxu0  ;;  %v254_v29 = vpack.c.bf16 %v239_v26, %v238_v25 }
  0xee   :  { %v200_v30 = vadd.f32 %v608_v28, %v508_v14  ;;  %v191_v31 = vpop.f32.mrb[5].mxu0 }
  0xef   :  { %v192_v32 = vadd.f32 %v508_v14, %v191_v31  ;;  %v609_v33 = vpop.f32.mrb[6].mxu0  ;;  %622 = vmatprep.mubr.msk.bf16.mxu1 %vm285_vm1, %v254_v29 }
  0xf0   :  { %v203_v34 = vadd.f32 %v609_v33, %v508_v14  ;;  %v194_v35 = vpop.f32.mrb[7].mxu0  ;;  %623 = vmatmul.mubr.msk.bf16.vlgmr.msra.gmra.mrb[0].mxu1 %vm285_vm1, %v255_v27  ;;  %v244_v37 = vmax.f32 %v200_v30, 0.0 }
  0xf1   :  { %v195_v36 = vadd.f32 %v508_v14, %v194_v35  ;;  %v242_v39 = vmax.f32 %v192_v32, 0.0 }
  0xf2   :  { %v245_v38 = vmax.f32 %v203_v34, 0.0 }
  0xf3   :  { %v243_v40 = vmax.f32 %v195_v36, 0.0 }
  0xf4   :  { %v257_v41 = vpack.c.bf16 %v245_v38, %v244_v37 }
  0xf5   :  { %v256_v42 = vpack.c.bf16 %v243_v40, %v242_v39  ;;  %v612_v43 = vpop.f32.mrb[8].mxu0 }
  0xf6   :  { %v216_v44 = vadd.f32 %v612_v43, %v508_v14  ;;  %v207_v45 = vpop.f32.mrb[9].mxu0 }
  0xf7   :  { %v208_v46 = vadd.f32 %v508_v14, %v207_v45  ;;  %v613_v47 = vpop.f32.mrb[10].mxu0  ;;  %626 = vmatprep.mubr.msk.bf16.mxu1 %vm285_vm1, %v256_v42 }
  0xf8   :  { %v219_v48 = vadd.f32 %v613_v47, %v508_v14  ;;  %v210_v49 = vpop.f32.mrb[11].mxu0  ;;  %627 = vmatmul.mubr.msk.bf16.gmra.mrb[4].mxu1 %vm285_vm1, %v257_v41  ;;  %v248_v51 = vmax.f32 %v216_v44, 0.0 }
  0xf9   :  { %v211_v50 = vadd.f32 %v508_v14, %v210_v49  ;;  %v246_v53 = vmax.f32 %v208_v46, 0.0 }
  0xfa   :  { %v249_v52 = vmax.f32 %v219_v48, 0.0 }
  0xfb   :  { %v247_v54 = vmax.f32 %v211_v50, 0.0 }
  0xfc   :  { %v259_v55 = vpack.c.bf16 %v249_v52, %v248_v51 }
  0xfd   :  { %v258_v56 = vpack.c.bf16 %v247_v54, %v246_v53  ;;  %v616_v57 = vpop.f32.mrb[12].mxu0 }
  0xfe   :  { %v232_v58 = vadd.f32 %v616_v57, %v508_v14  ;;  %v223_v59 = vpop.f32.mrb[13].mxu0 }
  0xff   :  { %v224_v60 = vadd.f32 %v508_v14, %v223_v59  ;;  %v617_v61 = vpop.f32.mrb[14].mxu0  ;;  %630 = vmatprep.mubr.msk.bf16.mxu1 %vm285_vm1, %v258_v56 }
 0x100   :  { %v235_v62 = vadd.f32 %v617_v61, %v508_v14  ;;  %v226_v63 = vpop.f32.mrb[15].mxu0  ;;  %631 = vmatmul.mubr.msk.bf16.gmra.mrb[8].mxu1 %vm285_vm1, %v259_v55  ;;  %v252_v1 = vmax.f32 %v232_v58, 0.0 }
 0x101   :  { %v227_v0 = vadd.f32 %v508_v14, %v226_v63  ;;  %v250_v3 = vmax.f32 %v224_v60, 0.0 }
 0x102   :  { %v253_v2 = vmax.f32 %v235_v62, 0.0 }
 0x103   :  { %v251_v4 = vmax.f32 %v227_v0, 0.0 }
 0x104   :  { %v261_v5 = vpack.c.bf16 %v253_v2, %v252_v1 }
 0x105   :  { %v260_v6 = vpack.c.bf16 %v251_v4, %v250_v3 }
 0x107   :  { %634 = vmatprep.mubr.msk.bf16.mxu1 %vm285_vm1, %v260_v6 }
 0x108   :  { %635 = vmatmul.mubr.msk.bf16.gmra.mrb[12].mxu1 %vm285_vm1, %v261_v5 }
 0x1c3   :  { %v624_v8 = vpop.f32.mrb[0].mxu1 }
 0x1c4   :  { %v353_v9 = vadd.f32 %v624_v8, %v746_v7  ;;  %v344_v10 = vpop.f32.mrb[1].mxu1 }
 0x1c5   :  { %v345_v11 = vadd.f32 %v746_v7, %v344_v10  ;;  %v625_v12 = vpop.f32.mrb[2].mxu1 }
 0x1c6   :  { %v409_v13 = vmax.f32 %v353_v9, 0.0  ;;  %v356_v14 = vadd.f32 %v625_v12, %v746_v7  ;;  %v347_v15 = vpop.f32.mrb[3].mxu1 }
 0x1c7   :  { %v407_v16 = vmax.f32 %v345_v11, 0.0  ;;  %v348_v17 = vadd.f32 %v746_v7, %v347_v15 }
 0x1c8   :  { %v558_v18 = vpack.c.bf16 %v409_v13, %v409_v13  ;;  %v410_v19 = vmax.f32 %v356_v14, 0.0 }
 0x1c9   :  { %v556_v20 = vpack.c.bf16 %v407_v16, %v407_v16  ;;  %v408_v21 = vmax.f32 %v348_v17, 0.0 }
 0x1ca   :  { %490 = vst.msk [vmem:[%s833_s5 + $0x8] sm:$0xf] %vm487_vm2, %v558_v18  ;;  %v559_v22 = vpack.c.bf16 %v410_v19, %v410_v19 }
 0x1cb   :  { %488 = vst.msk [vmem:[%s833_s5] sm:$0xf] %vm487_vm2, %v556_v20  ;;  %v557_v23 = vpack.c.bf16 %v408_v21, %v408_v21  ;;  %v628_v24 = vpop.f32.mrb[4].mxu1 }
 0x1cc   :  { %491 = vst.msk [vmem:[%s833_s5 + $0xc] sm:$0xf] %vm487_vm2, %v559_v22  ;;  %v369_v25 = vadd.f32 %v628_v24, %v746_v7  ;;  %v360_v26 = vpop.f32.mrb[5].mxu1 }
 0x1cd   :  { %489 = vst.msk [vmem:[%s833_s5 + $0x4] sm:$0xf] %vm487_vm2, %v557_v23  ;;  %v361_v27 = vadd.f32 %v746_v7, %v360_v26  ;;  %v629_v28 = vpop.f32.mrb[6].mxu1 }
 0x1ce   :  { %v413_v29 = vmax.f32 %v369_v25, 0.0  ;;  %v372_v30 = vadd.f32 %v629_v28, %v746_v7  ;;  %v363_v31 = vpop.f32.mrb[7].mxu1 }
 0x1cf   :  { %v411_v32 = vmax.f32 %v361_v27, 0.0  ;;  %v364_v33 = vadd.f32 %v746_v7, %v363_v31 }
 0x1d0   :  { %v562_v34 = vpack.c.bf16 %v413_v29, %v413_v29  ;;  %v414_v35 = vmax.f32 %v372_v30, 0.0 }
 0x1d1   :  { %v560_v36 = vpack.c.bf16 %v411_v32, %v411_v32  ;;  %v412_v37 = vmax.f32 %v364_v33, 0.0 }
 0x1d2   :  { %494 = vst.msk [vmem:[%s833_s5 + $0x18] sm:$0xf] %vm487_vm2, %v562_v34  ;;  %v563_v38 = vpack.c.bf16 %v414_v35, %v414_v35 }
 0x1d3   :  { %492 = vst.msk [vmem:[%s833_s5 + $0x10] sm:$0xf] %vm487_vm2, %v560_v36  ;;  %v561_v39 = vpack.c.bf16 %v412_v37, %v412_v37  ;;  %v632_v40 = vpop.f32.mrb[8].mxu1 }
 0x1d4   :  { %495 = vst.msk [vmem:[%s833_s5 + $0x1c] sm:$0xf] %vm487_vm2, %v563_v38  ;;  %v385_v41 = vadd.f32 %v632_v40, %v746_v7  ;;  %v376_v42 = vpop.f32.mrb[9].mxu1 }
 0x1d5   :  { %493 = vst.msk [vmem:[%s833_s5 + $0x14] sm:$0xf] %vm487_vm2, %v561_v39  ;;  %v377_v43 = vadd.f32 %v746_v7, %v376_v42  ;;  %v633_v44 = vpop.f32.mrb[10].mxu1 }
 0x1d6   :  { %v417_v45 = vmax.f32 %v385_v41, 0.0  ;;  %v388_v46 = vadd.f32 %v633_v44, %v746_v7  ;;  %v379_v47 = vpop.f32.mrb[11].mxu1 }
 0x1d7   :  { %v415_v48 = vmax.f32 %v377_v43, 0.0  ;;  %v380_v49 = vadd.f32 %v746_v7, %v379_v47 }
 0x1d8   :  { %v566_v50 = vpack.c.bf16 %v417_v45, %v417_v45  ;;  %v418_v51 = vmax.f32 %v388_v46, 0.0 }
 0x1d9   :  { %v564_v52 = vpack.c.bf16 %v415_v48, %v415_v48  ;;  %v416_v53 = vmax.f32 %v380_v49, 0.0 }
 0x1da   :  { %498 = vst.msk [vmem:[%s833_s5 + $0x28] sm:$0xf] %vm487_vm2, %v566_v50  ;;  %v567_v54 = vpack.c.bf16 %v418_v51, %v418_v51 }
 0x1db   :  { %496 = vst.msk [vmem:[%s833_s5 + $0x20] sm:$0xf] %vm487_vm2, %v564_v52  ;;  %v565_v55 = vpack.c.bf16 %v416_v53, %v416_v53  ;;  %v636_v56 = vpop.f32.mrb[12].mxu1 }
 0x1dc   :  { %499 = vst.msk [vmem:[%s833_s5 + $0x2c] sm:$0xf] %vm487_vm2, %v567_v54  ;;  %v401_v57 = vadd.f32 %v636_v56, %v746_v7  ;;  %v392_v58 = vpop.f32.mrb[13].mxu1 }
 0x1dd   :  { %497 = vst.msk [vmem:[%s833_s5 + $0x24] sm:$0xf] %vm487_vm2, %v565_v55  ;;  %v393_v59 = vadd.f32 %v746_v7, %v392_v58  ;;  %v637_v60 = vpop.f32.mrb[14].mxu1 }
 0x1de   :  { %v421_v61 = vmax.f32 %v401_v57, 0.0  ;;  %v404_v62 = vadd.f32 %v637_v60, %v746_v7  ;;  %v395_v63 = vpop.f32.mrb[15].mxu1 }
 0x1df   :  { %v419_v0 = vmax.f32 %v393_v59, 0.0  ;;  %v396_v1 = vadd.f32 %v746_v7, %v395_v63 }
 0x1e0   :  { %v570_v2 = vpack.c.bf16 %v421_v61, %v421_v61  ;;  %v422_v3 = vmax.f32 %v404_v62, 0.0 }
 0x1e1   :  { %v568_v4 = vpack.c.bf16 %v419_v0, %v419_v0  ;;  %v420_v5 = vmax.f32 %v396_v1, 0.0 }
 0x1e2   :  { %502 = vst.msk [vmem:[%s833_s5 + $0x38] sm:$0xf] %vm487_vm2, %v570_v2  ;;  %v571_v6 = vpack.c.bf16 %v422_v3, %v422_v3 }
 0x1e3   :  { %500 = vst.msk [vmem:[%s833_s5 + $0x30] sm:$0xf] %vm487_vm2, %v568_v4  ;;  %v569_v8 = vpack.c.bf16 %v420_v5, %v420_v5 }
 0x1e4   :  { %503 = vst.msk [vmem:[%s833_s5 + $0x3c] sm:$0xf] %vm487_vm2, %v571_v6 }
 0x1e5   :  { %501 = vst.msk [vmem:[%s833_s5 + $0x34] sm:$0xf] %vm487_vm2, %v569_v8 }

// kernel: ocrnet_forward.12
= control target key start
LH: loop header
LB: loop body
LE: loop exit
PB: predicated region body
PF: predicated region fallthrough
CT: control target
= control target key end

     0   :  { %s3272_s12 = smov 0   ;;  %s3859_s0 = inlined_call_operand.vmem [shape: bf16[2,192,32], index: 0, kind: input, shape index: {}]   ;;  %s3860_s1 = inlined_call_operand.vmem [shape: bf16[288,64], index: 1, kind: input, shape index: {}]   ;;  %s3861_s2 = inlined_call_operand.vmem [shape: f32[1,64], index: 2, kind: input, shape index: {}]   ;;  %s3862_s3 = inlined_call_operand.vmem [shape: bf16[2,128,64], index: 3, kind: output, shape index: {}]  }
   0x1 LB: > { %s2523_s13 = sadd.s32 4294967295, %s3250_s12   ;;  %p2527_p0 = scmp.ge.s32.totalorder %s3250_s12, 1  ;;  %s3250_s12 = sphi %s3272_s12, %s13_s12  }
   0x2   : > { %p137_p1 = scmp.lt.s32.totalorder %s3250_s12, 3 }
   0x4   : > { %p138_p2 = pnand %p2527_p0, %p137_p1 }
   0x5   : > { %v3146_v0 = vld [vmem:[%s3860_s1 + $0x10] sm:$0xff] (!%p138_p2)   ;;  %p161_p3 = scmp.lt.s32.totalorder (!%p138_p2), %s2523_s13, 1  ;;  %v3286_v1 = vld [vmem:[%s3860_s1 + $0x40] sm:$0xff] (!%p138_p2)   ;;  %v3148_v2 = vld [vmem:[%s3860_s1 + $0x18] sm:$0xff] (!%p138_p2)   ;;  %vm249_vm0 = vcmask (!%p138_p2), 261120   ;;  %vm2451_vm3 = vcmask (!%p138_p2), 519168  }
   0x6   : > { %141 = sbr.rel (%p138_p2) target bundleno = 387 (0x183), region = 32  ;;  %2825 = vmatprep.subr.bf16.mxu1 (!%p138_p2), %v3146_v0  ;;  %2905 = vmatprep.subr.bf16.mxu0 (!%p138_p2), %v3286_v1  ;;  %v3149_v3 = vld [vmem:[%s3860_s1 + $0x48] sm:$0xff] (!%p138_p2)   ;;  %v3160_v4 = vld [vmem:[%s3860_s1] sm:$0xff] (!%p138_p2)   ;;  %v3305_v5 = vld [vmem:[%s3860_s1 + $0x50] sm:$0xff] (!%p138_p2)   ;;  %vm660_vm1 = vsmask.f32 (!%p138_p2), 7424 }
   0x7   : > { %2826 = vmatpush3.bf16.msra.mxu1 (!%p138_p2), %v3146_v0  ;;  %2906 = vmatpush3.bf16.msra.mxu0 (!%p138_p2), %v3286_v1  ;;  %v3169_v46 = vld [vmem:[%s3860_s1 + $0x58] sm:$0xff] (!%p138_p2)   ;;  %vm382_vm2 = vsmask.f32 (!%p138_p2), 4352 }
   0x8   : > { %2827 = vmatprep.subr.bf16.mxu1 (!%p138_p2), %v3148_v2  ;;  %2907 = vmatprep.subr.bf16.mxu0 (!%p138_p2), %v3149_v3 }
   0xb   : > { %2828 = vmatpush3.bf16.msra.mxu1 (!%p138_p2), %v3148_v2  ;;  %2908 = vmatpush3.bf16.msra.mxu0 (!%p138_p2), %v3149_v3 }
   0xc   : > { %2845 = vmatprep.subr.bf16.mxu1 (!%p138_p2), %v3160_v4  ;;  %2925 = vmatprep.subr.bf16.mxu0 (!%p138_p2), %v3305_v5 }
   0xd   : > { %s3864_s13 = smov (!%p161_p3, %s2523_s13), 1 }
   0xe   : > { %s3137_s22 = smul.u32 96, %s3864_s13  ;;  %s2718_s8 = sshll.u32 %s3864_s13, 6 }
   0xf   : > { %s3809_s11 = scalar_lea.vmem %s3862_s3, %s2718_s8 }
  0x10   : > { %s3310_s29 = scalar_lea.vmem %s3859_s0, %s3137_s22 }
  0x11   : > { %v172_v6 = vld [vmem:[%s3310_s29 + $0x4] sm:$0x8]  ;;  %v173_v7 = vld [vmem:[%s3310_s29 + $0x8] sm:$0xf]  ;;  %v174_v8 = vld [vmem:[%s3310_s29 + $0xc] sm:$0xf] }
  0x12   : > { %v175_v9 = vld [vmem:[%s3310_s29 + $0x10] sm:$0xf]  ;;  %v176_v10 = vld [vmem:[%s3310_s29 + $0x14] sm:$0xf]  ;;  %v3318_v11 = vld [vmem:[%s3310_s29 + $0x18] sm:$0xf]  ;;  %v2531_v12 = vcombine.low %v173_v7, %v174_v8  ;;  %v2549_v13 = vcombine.low %v172_v6, %v173_v7 }
  0x13   : > { %v2532_v14 = vcombine.low %v175_v9, %v176_v10  ;;  %v2550_v15 = vcombine.low %v174_v8, %v175_v9  ;;  %v2551_v16 = vcombine.low %v176_v10, %v3318_v11  ;;  %v878_v17 = vld [vmem:[%s3310_s29 + $0xc] sm:$0x8]  ;;  %v879_v18 = vld [vmem:[%s3310_s29 + $0x10] sm:$0xf]  ;;  %v880_v19 = vld [vmem:[%s3310_s29 + $0x14] sm:$0xf] }
  0x14   : > { %2829 = vmatprep.mubr.msk.bf16.mxu1 %vm249_vm0, %v2531_v12  ;;  %v384_v20 = vshrl.u32 %v2549_v13, 16  ;;  %v387_v21 = vshll.u32 %v2549_v13, 16  ;;  %v881_v22 = vld [vmem:[%s3310_s29 + $0x18] sm:$0xf]  ;;  %v882_v23 = vld [vmem:[%s3310_s29 + $0x1c] sm:$0xf]  ;;  %v2587_v24 = vcombine.low %v878_v17, %v879_v18  ;;  %v2606_v25 = vcombine.low %v879_v18, %v880_v19 }
  0x15   : > { %v392_v26 = vshrl.u32 %v2550_v15, 16  ;;  %v395_v27 = vshll.u32 %v2550_v15, 16  ;;  %v401_v28 = vshrl.u32 %v2551_v16, 16  ;;  %v404_v29 = vshll.u32 %v2551_v16, 16  ;;  %v883_v30 = vld [vmem:[%s3310_s29 + $0x20] sm:$0xf]  ;;  %2830 = vmatmul.mubr.msk.bf16.vlgmr.msra.gmra.mrb[0].mxu1 %vm249_vm0, %v2532_v14 }
  0x16   : > { %v3330_v31 = vrot.slane %v384_v20, 3  ;;  %v3332_v32 = vrot.slane %v387_v21, 4  ;;  %v2588_v33 = vcombine.low %v880_v19, %v881_v22  ;;  %v2589_v34 = vcombine.low %v882_v23, %v883_v30  ;;  %2909 = vmatprep.mubr.msk.bf16.mxu0 %vm249_vm0, %v2606_v25  ;;  %2846 = vmatpush3.bf16.msra.mxu1 %v3160_v4  ;;  %v3336_v35 = vld [vmem:[%s3310_s29 + $0x1c] sm:$0xf]  ;;  %v884_v40 = vld [vmem:[%s3310_s29 + $0x24] sm:$0xf] }
  0x17   : > { %v3338_v36 = vrot.slane %v392_v26, 3  ;;  %v3340_v37 = vrot.slane %v395_v27, 4  ;;  %v3342_v38 = vrot.slane %v401_v28, 3  ;;  %v3344_v39 = vrot.slane %v404_v29, 4  ;;  %v179_v45 = vld [vmem:[%s3310_s29 + $0x20] sm:$0xf] }
  0x18   : > { %v943_v41 = vshrl.u32 %v2587_v24, 16  ;;  %v946_v42 = vshll.u32 %v2587_v24, 16  ;;  %v951_v43 = vshrl.u32 %v2588_v33, 16  ;;  %v954_v44 = vshll.u32 %v2588_v33, 16  ;;  %v180_v50 = vld [vmem:[%s3310_s29 + $0x24] sm:$0xf] }
  0x19   : > { %v960_v47 = vshrl.u32 %v2589_v34, 16  ;;  %v963_v48 = vshll.u32 %v2589_v34, 16  ;;  %v2607_v49 = vcombine.low %v881_v22, %v882_v23  ;;  %v885_v51 = vld [vmem:[%s3310_s29 + $0x28] sm:$0xf]  ;;  %v3358_v56 = vld [vmem:[%s3310_s29 + $0x2c] sm:$0xf]  ;;  %v2533_v59 = vcombine.low %v3318_v11, %v3336_v35 }
  0x1a   : > { %v3353_v52 = vrot.slane %v943_v41, 3  ;;  %v3355_v53 = vrot.slane %v946_v42, 4  ;;  %v953_v54 = vrot.slane %v951_v43, 3  ;;  %v956_v55 = vrot.slane %v954_v44, 4  ;;  %v181_v61 = vld [vmem:[%s3310_s29 + $0x28] sm:$0xf] }
  0x1b   : > { %v962_v57 = vrot.slane %v960_v47, 3  ;;  %v965_v58 = vrot.slane %v963_v48, 4  ;;  %2910 = vmatmul.mubr.msk.bf16.vlgmr.msra.gmra.mrb[0].mxu0 %vm249_vm0, %v2607_v49  ;;  %v2608_v60 = vcombine.low %v883_v30, %v884_v40  ;;  %v3365_v62 = vld [vmem:[%s3310_s29 + $0x2c] sm:$0xf]  ;;  %v2534_v63 = vcombine.low %v179_v45, %v180_v50  ;;  %2833 = vmatprep.mubr.msk.bf16.mxu1 %vm249_vm0, %v2533_v59  ;;  %v3172_v3 = vld [vmem:[%s3310_s29 + $0x10] sm:$0xff]   ;;  %v3173_v4 = vld [vmem:[%s3310_s29 + $0x18] sm:$0xff]  }
  0x1c   : > { %2926 = vmatpush3.bf16.msra.mxu0 %v3305_v5  ;;  %v3368_v0 = vcombine.low %v884_v40, %v885_v51  ;;  %v2535_v2 = vcombine.low %v181_v61, %v3365_v62  ;;  %v3377_v6 = vld [vmem:[%s3310_s29 + $0x30] sm:$0xf]  ;;  %v3380_v5 = vld [vmem:[%s3310_s29 + $0x34] sm:$0xf]  ;;  %v2609_v7 = vcombine.low %v885_v51, %v3358_v56  ;;  %v1397_v8 = vshrl.u32 %v3172_v3, 16  ;;  %v3176_v12 = vld [vmem:[%s3860_s1 + $0x8] sm:$0xff]  }
  0x1d   : > { %2913 = vmatprep.mubr.msk.bf16.mxu0 %vm249_vm0, %v2608_v60  ;;  %2834 = vmatmul.mubr.msk.bf16.gmra.mrb[4].mxu1 %vm249_vm0, %v2534_v63  ;;  %v1399_v9 = vshll.u32 %v3172_v3, 16  ;;  %v1404_v10 = vshll.u32 %v3173_v4, 16  ;;  %v1408_v11 = vshrl.u32 %v3173_v4, 16  ;;  %v3177_v15 = vld [vmem:[%s3310_s29 + $0x20] sm:$0xff]   ;;  %v2536_v17 = vcombine.low %v3377_v6, %v3380_v5  ;;  %v3394_v18 = vld [vmem:[%s3310_s29 + $0x38] sm:$0xf] }
  0x1e   : > { %2927 = vmatprep.subr.bf16.mxu0 %v3169_v46  ;;  %2837 = vmatprep.mubr.msk.bf16.mxu1 %vm249_vm0, %v2535_v2  ;;  %v3178_v16 = vld [vmem:[%s3860_s1 + $0x60] sm:$0xff]   ;;  %v3397_v19 = vld [vmem:[%s3310_s29 + $0x3c] sm:$0xf]  ;;  %v1412_v21 = vshll.u32 %v3177_v15, 16  ;;  %v3181_v23 = vld [vmem:[%s3310_s29 + $0x28] sm:$0xff]   ;;  %v3403_v24 = vor.u32 %v965_v58, %v962_v57  ;;  %v2552_v25 = vcombine.low %v3336_v35, %v179_v45  ;;  %v1416_v27 = vshrl.u32 %v3177_v15, 16 }
  0x1f   : > { %v1401_v13 = vrot.slane %v1399_v9, 1  ;;  %v1406_v14 = vrot.slane %v1404_v10, 1  ;;  %2847 = vmatprep.subr.bf16.mxu1 %v3176_v12  ;;  %v2537_v22 = vcombine.low %v3394_v18, %v3397_v19  ;;  %v3185_v28 = vld [vmem:[%s3310_s29 + $0x30] sm:$0xff]   ;;  %v3407_v29 = vcombine.low %v180_v50, %v181_v61  ;;  %v3411_v40 = vld [vmem:[%s3310_s29 + $0x40] sm:$0xf]  ;;  %v3186_v48 = vld [vmem:[%s3310_s29 + $0x38] sm:$0xff]  }
  0x20   : > { %2928 = vmatpush3.bf16.msra.mxu0 %v3169_v46  ;;  %2848 = vmatpush3.bf16.msra.mxu1 %v3176_v12  ;;  %v1414_v33 = vrot.slane %v1412_v21, 1  ;;  %v1420_v34 = vshll.u32 %v3181_v23, 16  ;;  %v3414_v41 = vld [vmem:[%s3310_s29 + $0x44] sm:$0xf]  ;;  %v1424_v35 = vshrl.u32 %v3181_v23, 16  ;;  %v1428_v42 = vshll.u32 %v3185_v28, 16 }
  0x21   : > { %v1402_v20 = vor.u32 %v1401_v13, %v1397_v8  ;;  %2945 = vmatprep.subr.bf16.mxu0 %v3178_v16  ;;  %v1410_v26 = vor.u32 %v1408_v11, %v1406_v14  ;;  %v949_v43 = vor.u32 %v3355_v53, %v3353_v52  ;;  %v957_v44 = vor.u32 %v956_v55, %v953_v54  ;;  %v3430_v52 = vld [vmem:[%s3860_s1 + $0x20] sm:$0xff]   ;;  %v3456_v8 = vld [vmem:[%s3310_s29 + $0x48] sm:$0xff]   ;;  %v1613_v12 = vld [vmem:[%s3310_s29 + $0x14] sm:$0x8] }
  0x22   : > { %v1418_v45 = vor.u32 %v1416_v27, %v1414_v33  ;;  %v1422_v46 = vrot.slane %v1420_v34, 1  ;;  %v390_v47 = vor.u32 %v3332_v32, %v3330_v31  ;;  %v398_v50 = vor.u32 %v3340_v37, %v3338_v36  ;;  %v3433_v53 = vld [vmem:[%s3310_s29 + $0x40] sm:$0xff]   ;;  %2865 = vmatprep.subr.bf16.mxu1 %v3430_v52  ;;  %v3189_v36 = vld [vmem:[%s3860_s1 + $0x68] sm:$0xff]   ;;  %v3191_v13 = vld [vmem:[%s3310_s29 + $0x50] ss:$0 sps:$4 sm:$0x11]  }
  0x23   : > { %2914 = vmatmul.mubr.msk.bf16.gmra.mrb[4].mxu0 %vm249_vm0, %v2609_v7  ;;  %v1407_v30 = vsel %vm660_vm1, %v1402_v20, %v1406_v14  ;;  %v1415_v49 = vsel %vm660_vm1, %v1410_v26, %v1414_v33  ;;  %v1432_v51 = vshrl.u32 %v3185_v28, 16  ;;  %v410_v54 = vshrl.u32 %v2552_v25, 16  ;;  %v3470_v20 = vld [vmem:[%s3310_s29 + $0x18] sm:$0xf]  ;;  %v3473_v21 = vld [vmem:[%s3310_s29 + $0x1c] sm:$0xf] }
  0x24   : > { %2929 = vmatprep.mubr.msk.bf16.mxu0 %vm249_vm0, %v1407_v30  ;;  %v1423_v55 = vsel %vm660_vm1, %v1418_v45, %v1422_v46  ;;  %v1430_v57 = vrot.slane %v1428_v42, 1  ;;  %v1436_v58 = vshll.u32 %v3186_v48, 16  ;;  %v2538_v31 = vcombine.low %v3411_v40, %v3414_v41  ;;  %v3476_v23 = vld [vmem:[%s3310_s29 + $0x20] sm:$0xf]  ;;  %v3485_v34 = vld [vmem:[%s3310_s29 + $0x24] sm:$0xf] }
  0x25   : > { %2838 = vmatmul.mubr.msk.bf16.gmra.mrb[8].mxu1 %vm249_vm0, %v2536_v17  ;;  %v1426_v32 = vor.u32 %v1424_v35, %v1422_v46  ;;  %v3443_v37 = vsel %vm382_vm2, %v949_v43, %v957_v44  ;;  %v3447_v59 = vsel %vm382_vm2, %v957_v44, %v3403_v24  ;;  %v1444_v63 = vshll.u32 %v3433_v53, 16  ;;  %v3496_v45 = vld [vmem:[%s3310_s29 + $0x28] sm:$0xf] }
  0x26   : > { %2841 = vmatprep.mubr.msk.bf16.mxu1 %vm249_vm0, %v2537_v22  ;;  %v1434_v60 = vor.u32 %v1432_v51, %v1430_v57  ;;  %v1438_v61 = vrot.slane %v1436_v58, 1  ;;  %v413_v2 = vshll.u32 %v2552_v25, 16  ;;  %v2554_v3 = vcombine.low %v3365_v62, %v3377_v6  ;;  %v3513_v58 = vld [vmem:[%s3310_s29 + $0x2c] sm:$0xf] }
  0x27   : > { %v399_v4 = vsel %vm382_vm2, %v390_v47, %v398_v50  ;;  %v412_v7 = vrot.slane %v410_v54, 3  ;;  %v419_v9 = vshrl.u32 %v3407_v29, 16  ;;  %v422_v11 = vshll.u32 %v3407_v29, 16  ;;  %v3196_v47 = vld [vmem:[%s3860_s1 + $0x28] sm:$0xff]  }
  0x28   : > { %v415_v10 = vrot.slane %v413_v2, 4  ;;  %v407_v62 = vor.u32 %v3344_v39, %v3342_v38  ;;  %v1440_v6 = vshrl.u32 %v3186_v48, 16  ;;  %v1431_v14 = vsel %vm660_vm1, %v1426_v32, %v1430_v57 }
  0x29   : > { %v1439_v15 = vsel %vm660_vm1, %v1434_v60, %v1438_v61  ;;  %v1448_v17 = vshrl.u32 %v3433_v53, 16  ;;  %v428_v39 = vshrl.u32 %v2554_v3, 16  ;;  %v431_v22 = vshll.u32 %v2554_v3, 16 }
  0x2a   : > { %v416_v38 = vor.u32 %v415_v10, %v412_v7  ;;  %v2643_v25 = vcombine.low %v1613_v12, %v3470_v20  ;;  %v1452_v26 = vshll.u32 %v3456_v8, 16  ;;  %v421_v27 = vrot.slane %v419_v9, 3  ;;  %v3525_v7 = vld [vmem:[%s3860_s1 + $0x30] sm:$0xff]  }
  0x2b   : > { %2930 = vmatmul.mubr.msk.bf16.vlgmr.msra.gmra.mrb[0].mxu0 %vm249_vm0, %v1415_v49  ;;  %v424_v28 = vrot.slane %v422_v11, 4  ;;  %v1460_v29 = vshll.u32 %v3191_v13, 16  ;;  %v2555_v30 = vcombine.low %v3380_v5, %v3394_v18  ;;  %v2556_v33 = vcombine.low %v3397_v19, %v3411_v40  ;;  %v3501_v18 = vld [vmem:[%s3860_s1 + $0x70] sm:$0xff]  }
  0x2c   : > { %2946 = vmatpush3.bf16.msra.mxu0 %v3178_v16  ;;  %2933 = vmatprep.mubr.msk.bf16.mxu0 %vm249_vm0, %v1423_v55  ;;  %v1446_v16 = vrot.slane %v1444_v63, 1  ;;  %v2644_v35 = vcombine.low %v3473_v21, %v3476_v23  ;;  %v3491_v42 = vcombine.low %v3414_v41, %v3414_v41  ;;  %v408_v43 = vsel %vm382_vm2, %v398_v50, %v407_v62  ;;  %v3531_v11 = vld [vmem:[%s3310_s29 + $0x34] sm:$0xf] }
  0x2d   : > { %2947 = vmatprep.subr.bf16.mxu0 %v3189_v36  ;;  %2842 = vmatmul.mubr.msk.bf16.gmra.mrb[12].mxu1 %vm249_vm0, %v2538_v31  ;;  %v1442_v44 = vor.u32 %v1440_v6, %v1438_v61  ;;  %v1678_v5 = vshrl.u32 %v2643_v25, 16  ;;  %v417_v19 = vsel %vm382_vm2, %v407_v62, %v416_v38  ;;  %v430_v40 = vrot.slane %v428_v39, 3  ;;  %v3516_v31 = vld [vmem:[%s3310_s29 + $0x30] sm:$0xf] }
  0x2e   : > { %2849 = vmatprep.mubr.msk.bf16.mxu1 %vm249_vm0, %v399_v4  ;;  %v433_v41 = vrot.slane %v431_v22, 4  ;;  %v1681_v46 = vshll.u32 %v2643_v25, 16  ;;  %v1450_v48 = vor.u32 %v1448_v17, %v1446_v16  ;;  %v1454_v49 = vrot.slane %v1452_v26, 1  ;;  %v3545_v26 = vld [vmem:[%s3310_s29 + $0x3c] sm:$0xf] }
  0x2f   : > { %v1686_v50 = vshrl.u32 %v2644_v35, 16  ;;  %v1689_v51 = vshll.u32 %v2644_v35, 16  ;;  %v425_v53 = vor.u32 %v424_v28, %v421_v27  ;;  %v2645_v54 = vcombine.low %v3485_v34, %v3496_v45 }
  0x30   : > { %2948 = vmatpush3.bf16.msra.mxu0 %v3189_v36  ;;  %v437_v55 = vshrl.u32 %v2555_v30, 16  ;;  %v440_v57 = vshll.u32 %v2555_v30, 16  ;;  %v1447_v32 = vsel %vm660_vm1, %v1442_v44, %v1446_v16  ;;  %v1456_v36 = vshrl.u32 %v3456_v8, 16 }
  0x31   : > { %2965 = vmatprep.subr.bf16.mxu0 %v3501_v18  ;;  %v1462_v60 = vrot.slane %v1460_v29, 1  ;;  %v1680_v61 = vrot.slane %v1678_v5, 3  ;;  %v434_v63 = vor.u32 %v433_v41, %v430_v40  ;;  %v1683_v2 = vrot.slane %v1681_v46, 4  ;;  %v3558_v46 = vld [vmem:[%s3310_s29 + $0x10] sm:$0xff]  }
  0x32   : > { %v446_v3 = vshrl.u32 %v2556_v33, 16  ;;  %v449_v4 = vshll.u32 %v2556_v33, 16  ;;  %v1688_v9 = vrot.slane %v1686_v50, 3  ;;  %v1691_v10 = vrot.slane %v1689_v51, 4  ;;  %v3549_v33 = vld [vmem:[%s3310_s29 + $0x40] sm:$0xf] }
  0x33   : > { %2934 = vmatmul.mubr.msk.bf16.gmra.mrb[4].mxu0 %vm249_vm0, %v1431_v14  ;;  %v2646_v8 = vcombine.low %v3513_v58, %v3516_v31  ;;  %v426_v12 = vsel %vm382_vm2, %v416_v38, %v425_v53  ;;  %v439_v62 = vrot.slane %v437_v55, 3  ;;  %v442_v6 = vrot.slane %v440_v57, 4  ;;  %v3535_v14 = vld [vmem:[%s3310_s29 + $0x38] sm:$0xf] }
  0x34   : > { %2937 = vmatprep.mubr.msk.bf16.mxu0 %vm249_vm0, %v1439_v15  ;;  %v1695_v13 = vshrl.u32 %v2645_v54, 16  ;;  %v3538_v15 = vld [vmem:[%s3310_s29 + $0x8] sm:$0xff]   ;;  %v1698_v16 = vshll.u32 %v2645_v54, 16  ;;  %v448_v17 = vrot.slane %v446_v3, 3  ;;  %v451_v39 = vrot.slane %v449_v4, 4 }
  0x35   : > { %2850 = vmatmul.mubr.msk.bf16.vlgmr.msra.gmra.mrb[0].mxu1 %vm249_vm0, %v408_v43  ;;  %v455_v22 = vshrl.u32 %v3491_v42, 16  ;;  %v1458_v25 = vor.u32 %v1456_v36, %v1454_v49  ;;  %v435_v38 = vsel %vm382_vm2, %v425_v53, %v434_v63  ;;  %v1684_v27 = vor.u32 %v1683_v2, %v1680_v61  ;;  %v3203_v2 = vld [vmem:[%s3310_s29 + $0x18] sm:$0xff]   ;;  %v3573_v3 = vld [vmem:[%s3310_s29 + $0x48] sm:$0xf] }
  0x36   : > { %2866 = vmatpush3.bf16.msra.mxu1 %v3430_v52  ;;  %2853 = vmatprep.mubr.msk.bf16.mxu1 %vm249_vm0, %v417_v19  ;;  %v1455_v52 = vsel %vm660_vm1, %v1450_v48, %v1454_v49  ;;  %v1692_v28 = vor.u32 %v1691_v10, %v1688_v9  ;;  %v1704_v29 = vshrl.u32 %v2646_v8, 16  ;;  %v1707_v30 = vshll.u32 %v2646_v8, 16  ;;  %v3578_v8 = vld [vmem:[%s3310_s29 + $0x4c] sm:$0xf] }
  0x37   : > { %2867 = vmatprep.subr.bf16.mxu1 %v3196_v47  ;;  %v458_v35 = vshll.u32 %v3491_v42, 16  ;;  %v2647_v43 = vcombine.low %v3531_v11, %v3535_v14  ;;  %v443_v44 = vor.u32 %v442_v6, %v439_v62  ;;  %v1697_v5 = vrot.slane %v1695_v13, 3  ;;  %v3581_v62 = vld [vmem:[%s3310_s29 + $0x50] sm:$0xf] }
  0x38   : > { %v1700_v19 = vrot.slane %v1698_v16, 4  ;;  %v452_v40 = vor.u32 %v451_v39, %v448_v17  ;;  %v1463_v41 = vsel %vm660_vm1, %v1458_v25, %v1462_v60  ;;  %v2648_v42 = vcombine.low %v3545_v26, %v3549_v33  ;;  %v3590_v17 = vld [vmem:[%s3310_s29 + $0x20] sm:$0xff]   ;;  %v3593_v39 = vld [vmem:[%s3310_s29 + $0x30] sm:$0xf] }
  0x39   : > { %v1693_v48 = vsel %vm382_vm2, %v1684_v27, %v1692_v28  ;;  %v1706_v49 = vrot.slane %v1704_v29, 3  ;;  %v1709_v50 = vrot.slane %v1707_v30, 4  ;;  %v457_v51 = vrot.slane %v455_v22, 3  ;;  %v3206_v27 = vld [vmem:[%s3860_s1 + $0x78] sm:$0xff]  }
  0x3a   : > { %2868 = vmatpush3.bf16.msra.mxu1 %v3196_v47  ;;  %v664_v47 = vshll.u32 %v3538_v15, 16  ;;  %v460_v53 = vrot.slane %v458_v35, 4  ;;  %v1713_v54 = vshrl.u32 %v2647_v43, 16  ;;  %v1716_v55 = vshll.u32 %v2647_v43, 16 }
  0x3b   : > { %2938 = vmatmul.mubr.msk.bf16.gmra.mrb[8].mxu0 %vm249_vm0, %v1447_v32  ;;  %2885 = vmatprep.subr.bf16.mxu1 %v3525_v7  ;;  %v662_v57 = vshrl.u32 %v3538_v15, 16  ;;  %v3566_v32 = vld [vmem:[%s3310_s29 + $0x44] sm:$0xf]  ;;  %v444_v36 = vsel %vm382_vm2, %v434_v63, %v443_v44  ;;  %v1701_v60 = vor.u32 %v1700_v19, %v1697_v5  ;;  %v453_v61 = vsel %vm382_vm2, %v443_v44, %v452_v40  ;;  %v3602_v44 = vld [vmem:[%s3310_s29 + $0x28] sm:$0xff]  }
  0x3c   : > { %2941 = vmatprep.mubr.msk.bf16.mxu0 %vm249_vm0, %v1455_v52  ;;  %v666_v4 = vrot.slane %v664_v47, 1  ;;  %v669_v52 = vshll.u32 %v3558_v46, 16  ;;  %v1722_v9 = vshrl.u32 %v2648_v42, 16  ;;  %v1725_v10 = vshll.u32 %v2648_v42, 16  ;;  %v3608_v42 = vld [vmem:[%s3310_s29 + $0x54] sm:$0xf] }
  0x3d   : > { %2854 = vmatmul.mubr.msk.bf16.gmra.mrb[4].mxu1 %vm249_vm0, %v426_v12  ;;  %v1710_v12 = vor.u32 %v1709_v50, %v1706_v49  ;;  %v2649_v63 = vcombine.low %v3566_v32, %v3573_v3  ;;  %v1702_v6 = vsel %vm382_vm2, %v1692_v28, %v1701_v60  ;;  %v461_v13 = vor.u32 %v460_v53, %v457_v51 }
  0x3e   : > { %2857 = vmatprep.mubr.msk.bf16.mxu1 %vm249_vm0, %v435_v38  ;;  %v1715_v15 = vrot.slane %v1713_v54, 3  ;;  %v673_v16 = vshrl.u32 %v3558_v46, 16  ;;  %v1718_v22 = vrot.slane %v1716_v55, 4  ;;  %v667_v25 = vor.u32 %v666_v4, %v662_v57  ;;  %v3618_v55 = vld [vmem:[%s3860_s1 + $0x80] sm:$0xff]  }
  0x3f   : > { %v671_v38 = vrot.slane %v669_v52, 1  ;;  %v2650_v28 = vcombine.low %v3578_v8, %v3581_v62  ;;  %v1711_v29 = vsel %vm382_vm2, %v1701_v60, %v1710_v12  ;;  %v1724_v30 = vrot.slane %v1722_v9, 3  ;;  %v3627_v52 = vld [vmem:[%s3310_s29 + $0x30] sm:$0xff]  }
  0x40   : > { %v1727_v35 = vrot.slane %v1725_v10, 4  ;;  %v677_v43 = vshll.u32 %v3203_v2, 16  ;;  %v1731_v5 = vshrl.u32 %v2649_v63, 16  ;;  %v1734_v19 = vshll.u32 %v2649_v63, 16 }
  0x41   : > { %v681_v46 = vshrl.u32 %v3203_v2, 16  ;;  %v685_v47 = vshll.u32 %v3590_v17, 16  ;;  %v672_v49 = vsel %vm660_vm1, %v667_v25, %v671_v38  ;;  %v1740_v50 = vshrl.u32 %v2650_v28, 16 }
  0x42   : > { %v1743_v51 = vshll.u32 %v2650_v28, 16  ;;  %v2591_v53 = vcombine.low %v3358_v56, %v3593_v39  ;;  %v1728_v54 = vor.u32 %v1727_v35, %v1724_v30  ;;  %v1733_v57 = vrot.slane %v1731_v5, 3 }
  0x43   : > { %2942 = vmatmul.mubr.msk.bf16.gmra.mrb[12].mxu0 %vm249_vm0, %v1463_v41  ;;  %v462_v41 = vsel %vm382_vm2, %v452_v40, %v461_v13  ;;  %v679_v40 = vrot.slane %v677_v43, 1  ;;  %v2651_v60 = vcombine.low %v3608_v42, %v3608_v42  ;;  %v689_v2 = vshrl.u32 %v3590_v17, 16  ;;  %v3633_v13 = vld [vmem:[%s3310_s29 + $0x34] sm:$0xf] }
  0x44   : > { %2949 = vmatprep.mubr.msk.bf16.mxu0 %vm249_vm0, %v1693_v48  ;;  %v1719_v48 = vor.u32 %v1718_v22, %v1715_v15  ;;  %v693_v4 = vshll.u32 %v3602_v44, 16  ;;  %v1742_v10 = vrot.slane %v1740_v50, 3  ;;  %v1745_v63 = vrot.slane %v1743_v51, 4  ;;  %v3636_v15 = vld [vmem:[%s3310_s29 + $0x38] sm:$0xf]  ;;  %v3216_v51 = vld [vmem:[%s3310_s29 + $0x40] sm:$0xff]  }
  0x45   : > { %2858 = vmatmul.mubr.msk.bf16.gmra.mrb[8].mxu1 %vm249_vm0, %v444_v36  ;;  %v1736_v36 = vrot.slane %v1734_v19, 4  ;;  %v683_v56 = vor.u32 %v681_v46, %v679_v40  ;;  %v1749_v22 = vshrl.u32 %v2651_v60, 16  ;;  %v969_v25 = vshrl.u32 %v3368_v0, 16  ;;  %v3213_v50 = vld [vmem:[%s3310_s29 + $0x38] sm:$0xff]  }
  0x46   : > { %2861 = vmatprep.mubr.msk.bf16.mxu1 %vm249_vm0, %v453_v61  ;;  %v687_v61 = vrot.slane %v685_v47, 1  ;;  %v1720_v9 = vsel %vm382_vm2, %v1710_v12, %v1719_v48  ;;  %v972_v28 = vshll.u32 %v3368_v0, 16  ;;  %v697_v30 = vshrl.u32 %v3602_v44, 16 }
  0x47   : > { %v1737_v17 = vor.u32 %v1736_v36, %v1733_v57  ;;  %v701_v35 = vshll.u32 %v3627_v52, 16  ;;  %v971_v43 = vrot.slane %v969_v25, 3  ;;  %v981_v5 = vshll.u32 %v2591_v53, 16 }
  0x48   : > { %v688_v12 = vsel %vm660_vm1, %v683_v56, %v687_v61  ;;  %v1746_v19 = vor.u32 %v1745_v63, %v1742_v10  ;;  %v2592_v47 = vcombine.low %v3633_v13, %v3636_v15  ;;  %v695_v0 = vrot.slane %v693_v4, 1 }
  0x49   : > { %v1738_v44 = vsel %vm382_vm2, %v1728_v54, %v1737_v17  ;;  %v703_v56 = vrot.slane %v701_v35, 1  ;;  %v709_v10 = vshll.u32 %v3213_v50, 16  ;;  %v717_v25 = vshll.u32 %v3216_v51, 16 }
  0x4a   : > { %v990_v57 = vshll.u32 %v2592_v47, 16 }
  0x4b   : > { %2950 = vmatmul.mubr.msk.bf16.vlgmr.msra.gmra.mrb[0].mxu0 %vm249_vm0, %v1702_v6  ;;  %v1729_v6 = vsel %vm382_vm2, %v1719_v48, %v1728_v54  ;;  %v691_v48 = vor.u32 %v689_v2, %v687_v61  ;;  %v1747_v61 = vsel %vm382_vm2, %v1737_v17, %v1746_v19  ;;  %v719_v35 = vrot.slane %v717_v25, 1 }
  0x4c   : > { %2966 = vmatpush3.bf16.msra.mxu0 %v3501_v18  ;;  %2953 = vmatprep.mubr.msk.bf16.mxu0 %vm249_vm0, %v1711_v29  ;;  %v675_v18 = vor.u32 %v673_v16, %v671_v38  ;;  %v1752_v38 = vshll.u32 %v2651_v60, 16  ;;  %v978_v29 = vshrl.u32 %v2591_v53, 16  ;;  %v699_v60 = vor.u32 %v697_v30, %v695_v0 }
  0x4d   : > { %2967 = vmatprep.subr.bf16.mxu0 %v3206_v27  ;;  %2862 = vmatmul.mubr.msk.bf16.gmra.mrb[12].mxu1 %vm249_vm0, %v462_v41  ;;  %v974_v41 = vrot.slane %v972_v28, 4  ;;  %v992_v54 = vrot.slane %v990_v57, 4  ;;  %v696_v63 = vsel %vm660_vm1, %v691_v48, %v695_v0  ;;  %v3711_v48 = vld [vmem:[%s3310_s29 + $0x40] sm:$0xf]  ;;  %v3715_v0 = vld [vmem:[%s3310_s29 + $0x44] sm:$0xf] }
  0x4e   : > { %2869 = vmatprep.mubr.msk.bf16.mxu1 %vm249_vm0, %v672_v49  ;;  %v680_v16 = vsel %vm660_vm1, %v675_v18, %v679_v40  ;;  %v980_v46 = vrot.slane %v978_v29, 3  ;;  %v1751_v49 = vrot.slane %v1749_v22, 3  ;;  %v983_v40 = vrot.slane %v981_v5, 4 }
  0x4f   : > { %v975_v53 = vor.u32 %v974_v41, %v971_v43  ;;  %v987_v18 = vshrl.u32 %v2592_v47, 16  ;;  %v1754_v36 = vrot.slane %v1752_v38, 4  ;;  %v704_v17 = vsel %vm660_vm1, %v699_v60, %v703_v56  ;;  %v3222_v47 = vld [vmem:[%s3860_s1 + $0x88] sm:$0xff]  }
  0x50   : > { %2968 = vmatpush3.bf16.msra.mxu0 %v3206_v27  ;;  %v3214_v27 = vld [vmem:[%s3860_s1 + $0x38] sm:$0xff]   ;;  %v713_v22 = vshrl.u32 %v3213_v50, 16  ;;  %v711_v38 = vrot.slane %v709_v10, 1  ;;  %v2662_v29 = vcombine.low %v3470_v20, %v3473_v21  ;;  %v721_v43 = vshrl.u32 %v3216_v51, 16  ;;  %v3242_v50 = vld [vmem:[%s3860_s1 + $0x40] sm:$0xff]  }
  0x51   : > { %2985 = vmatprep.subr.bf16.mxu0 %v3618_v55  ;;  %v3660_v2 = vsel %vm382_vm2, %v3403_v24, %v975_v53  ;;  %v989_v4 = vrot.slane %v987_v18, 3  ;;  %v1755_v24 = vor.u32 %v1754_v36, %v1751_v49  ;;  %v3718_v49 = vld [vmem:[%s3310_s29 + $0x48] sm:$0xf]  ;;  %v2669_v10 = vcombine.low %v3581_v62, %v3608_v42 }
  0x52   : > { %v715_v30 = vor.u32 %v713_v22, %v711_v38  ;;  %v723_v20 = vor.u32 %v721_v43, %v719_v35  ;;  %v3236_v43 = vld [vmem:[%s3310_s29 + $0x40] sm:$0xff]  }
  0x53   : > { %2954 = vmatmul.mubr.msk.bf16.gmra.mrb[4].mxu0 %vm249_vm0, %v1720_v9  ;;  %v984_v9 = vor.u32 %v983_v40, %v980_v46  ;;  %v1756_v28 = vsel %vm382_vm2, %v1746_v19, %v1755_v24  ;;  %v2663_v19 = vcombine.low %v3476_v23, %v3485_v34  ;;  %v2664_v46 = vcombine.low %v3496_v45, %v3513_v58  ;;  %v3708_v58 = vld [vmem:[%s3310_s29 + $0x3c] sm:$0xf] }
  0x54   : > { %2957 = vmatprep.mubr.msk.bf16.mxu0 %vm249_vm0, %v1729_v6  ;;  %v705_v6 = vshrl.u32 %v3627_v52, 16  ;;  %v720_v41 = vsel %vm660_vm1, %v715_v30, %v719_v35  ;;  %v2665_v34 = vcombine.low %v3516_v31, %v3531_v11  ;;  %v2666_v45 = vcombine.low %v3535_v14, %v3545_v26  ;;  %v3227_v11 = vld [vmem:[%s3310_s29 + $0x20] sm:$0xff]  }
  0x55   : > { %2870 = vmatmul.mubr.msk.bf16.vlgmr.msra.gmra.mrb[0].mxu1 %vm249_vm0, %v680_v16  ;;  %v3668_v16 = vor.u32 %v992_v54, %v989_v4  ;;  %v2593_v31 = vcombine.low %v3708_v58, %v3711_v48  ;;  %v2667_v26 = vcombine.low %v3549_v33, %v3566_v32  ;;  %v2139_v36 = vshll.u32 %v3227_v11, 16  ;;  %v3232_v54 = vld [vmem:[%s3310_s29 + $0x30] sm:$0xff]  }
  0x56   : > { %2886 = vmatpush3.bf16.msra.mxu1 %v3525_v7  ;;  %2873 = vmatprep.mubr.msk.bf16.mxu1 %vm249_vm0, %v688_v12  ;;  %v3663_v7 = vsel %vm382_vm2, %v975_v53, %v984_v9  ;;  %v707_v52 = vor.u32 %v705_v6, %v703_v56  ;;  %v3742_v53 = vld [vmem:[%s3310_s29 + $0x4c] sm:$0xf]  ;;  %v2143_v22 = vshrl.u32 %v3227_v11, 16  ;;  %v3239_v11 = vld [vmem:[%s3310_s29 + $0x50] sm:$0xff]  }
  0x57   : > { %2887 = vmatprep.subr.bf16.mxu1 %v3214_v27  ;;  %v3675_v12 = vsel %vm382_vm2, %v984_v9, %v3668_v16  ;;  %v996_v51 = vshrl.u32 %v2593_v31, 16  ;;  %v999_v40 = vshll.u32 %v2593_v31, 16  ;;  %v3230_v9 = vld [vmem:[%s3310_s29 + $0x28] sm:$0xff]   ;;  %v2141_v4 = vrot.slane %v2139_v36, 1 }
  0x58   : > { %v2147_v6 = vshll.u32 %v3230_v9, 16 }
  0x59   : > { %v998_v60 = vrot.slane %v996_v51, 3  ;;  %v1001_v56 = vrot.slane %v999_v40, 4 }
  0x5a   : > { %2888 = vmatpush3.bf16.msra.mxu1 %v3214_v27  ;;  %v3218_v27 = vld [vmem:[%s3310_s29 + $0x48] ss:$0 sps:$4 sm:$0x11]   ;;  %v2149_v42 = vrot.slane %v2147_v6, 1 }
  0x5b   : > { %2958 = vmatmul.mubr.msk.bf16.gmra.mrb[8].mxu0 %vm249_vm0, %v1738_v44  ;;  %3005 = vmatprep.subr.bf16.mxu1 %v3286_v1  ;;  %v712_v1 = vsel %vm660_vm1, %v707_v52, %v711_v38  ;;  %v725_v5 = vshll.u32 %v3218_v27, 16  ;;  %v2668_v44 = vcombine.low %v3573_v3, %v3578_v8  ;;  %v2595_v3 = vcombine.low %v3742_v53, %v3742_v53 }
  0x5c   : > { %2961 = vmatprep.mubr.msk.bf16.mxu0 %vm249_vm0, %v1747_v61  ;;  %v2151_v52 = vshrl.u32 %v3230_v9, 16  ;;  %v2155_v27 = vshll.u32 %v3232_v54, 16 }
  0x5d   : > { %2874 = vmatmul.mubr.msk.bf16.gmra.mrb[4].mxu1 %vm249_vm0, %v696_v63  ;;  %v727_v21 = vrot.slane %v725_v5, 1  ;;  %v1002_v63 = vor.u32 %v1001_v56, %v998_v60  ;;  %v1014_v24 = vshrl.u32 %v2595_v3, 16  ;;  %v2191_v60 = vshrl.u32 %v3239_v11, 16 }
  0x5e   : > { %2877 = vmatprep.mubr.msk.bf16.mxu1 %vm249_vm0, %v704_v17  ;;  %v1017_v17 = vshll.u32 %v2595_v3, 16  ;;  %v2153_v35 = vor.u32 %v2151_v52, %v2149_v42  ;;  %v2613_v56 = vcombine.low %v3718_v49, %v3742_v53 }
  0x5f   : > { %v728_v23 = vsel %vm660_vm1, %v723_v20, %v727_v21  ;;  %v1003_v62 = vsel %vm382_vm2, %v3668_v16, %v1002_v63 }
  0x63   : > { %2962 = vmatmul.mubr.msk.bf16.gmra.mrb[12].mxu0 %vm249_vm0, %v1756_v28  ;;  %v1019_v28 = vrot.slane %v1017_v17, 4 }
  0x64   : > { %2969 = vmatprep.mubr.msk.bf16.mxu0 %vm249_vm0, %v2662_v29  ;;  %v2145_v29 = vor.u32 %v2143_v22, %v2141_v4 }
  0x65   : > { %2878 = vmatmul.mubr.msk.bf16.gmra.mrb[8].mxu1 %vm249_vm0, %v712_v1  ;;  %v2157_v1 = vrot.slane %v2155_v27, 1 }
  0x66   : > { %2881 = vmatprep.mubr.msk.bf16.mxu1 %vm249_vm0, %v720_v41  ;;  %v2150_v41 = vsel %vm660_vm1, %v2145_v29, %v2149_v42 }
  0x67   : > { %v2158_v20 = vsel %vm660_vm1, %v2153_v35, %v2157_v1 }
  0x6b   : > { %2970 = vmatmul.mubr.msk.bf16.vlgmr.msra.gmra.mrb[0].mxu0 %vm249_vm0, %v2663_v19  ;;  %v2159_v19 = vshrl.u32 %v3232_v54, 16 }
  0x6c   : > { %2986 = vmatpush3.bf16.msra.mxu0 %v3618_v55  ;;  %2973 = vmatprep.mubr.msk.bf16.mxu0 %vm249_vm0, %v2664_v46  ;;  %v3226_v55 = vld [vmem:[%s3310_s29 + $0x18] sm:$0xff]   ;;  %v2171_v46 = vshll.u32 %v3236_v43, 16 }
  0x6d   : > { %2987 = vmatprep.subr.bf16.mxu0 %v3222_v47  ;;  %2882 = vmatmul.mubr.msk.bf16.gmra.mrb[12].mxu1 %vm249_vm0, %v728_v23  ;;  %v2134_v14 = vshll.u32 %v3226_v55, 16  ;;  %v2132_v18 = vshrl.u32 %v3226_v55, 16  ;;  %v2161_v55 = vor.u32 %v2159_v19, %v2157_v1 }
  0x6e   : > { %2889 = vmatprep.mubr.msk.bf16.mxu1 %vm249_vm0, %v3443_v37  ;;  %v2594_v37 = vcombine.low %v3715_v0, %v3718_v49 }
  0x6f   : > { %v2136_v57 = vrot.slane %v2134_v14, 1 }
  0x70   : > { %2988 = vmatpush3.bf16.msra.mxu0 %v3222_v47  ;;  %v1005_v33 = vshrl.u32 %v2594_v37, 16  ;;  %v1008_v32 = vshll.u32 %v2594_v37, 16  ;;  %v2173_v37 = vrot.slane %v2171_v46, 1 }
  0x72   : > { %v1007_v8 = vrot.slane %v1005_v33, 3  ;;  %v1010_v61 = vrot.slane %v1008_v32, 4  ;;  %v3241_v32 = vld [vmem:[%s3310_s29 + $0x58] ss:$0 sps:$4 sm:$0x11]  }
  0x73   : > { %2974 = vmatmul.mubr.msk.bf16.gmra.mrb[4].mxu0 %vm249_vm0, %v2665_v34  ;;  %v2610_v34 = vcombine.low %v3593_v39, %v3633_v13  ;;  %v2187_v39 = vshll.u32 %v3239_v11, 16  ;;  %v2611_v13 = vcombine.low %v3636_v15, %v3708_v58  ;;  %v2195_v15 = vshll.u32 %v3241_v32, 16 }
  0x74   : > { %2977 = vmatprep.mubr.msk.bf16.mxu0 %vm249_vm0, %v2666_v45  ;;  %v1011_v25 = vor.u32 %v1010_v61, %v1007_v8  ;;  %v3237_v45 = vld [vmem:[%s3310_s29 + $0x48] sm:$0xff]  }
  0x75   : > { %2890 = vmatmul.mubr.msk.bf16.vlgmr.msra.gmra.mrb[0].mxu1 %vm249_vm0, %v3447_v59  ;;  %v3243_v59 = vld [vmem:[%s3860_s1 + $0x48] sm:$0xff]   ;;  %v2179_v14 = vshll.u32 %v3237_v45, 16  ;;  %v2183_v40 = vshrl.u32 %v3237_v45, 16 }
  0x76   : > { %3007 = vmatpush3.bf16.msra.mxu1 %v3242_v50  ;;  %2893 = vmatprep.mubr.msk.bf16.mxu1 %vm249_vm0, %v3660_v2  ;;  %v2137_v2 = vor.u32 %v2136_v57, %v2132_v18  ;;  %v1012_v30 = vsel %vm382_vm2, %v1002_v63, %v1011_v25  ;;  %v2175_v50 = vshrl.u32 %v3236_v43, 16  ;;  %v2189_v57 = vrot.slane %v2187_v39, 1  ;;  %v3800_v63 = vld [vmem:[%s3861_s2] ss:$0 sm:$0xff] }
  0x77   : > { %3006 = vmatprep.subr.bf16.mxu1 %v3243_v59 }
  0x78   : > { %v2142_v38 = vsel %vm660_vm1, %v2137_v2, %v2141_v4  ;;  %v2177_v33 = vor.u32 %v2175_v50, %v2173_v37 }
  0x7a   : > { %3008 = vmatpush3.bf16.msra.mxu1 %v3243_v59  ;;  %v2612_v59 = vcombine.low %v3711_v48, %v3715_v0  ;;  %v2193_v48 = vor.u32 %v2191_v60, %v2189_v57  ;;  %v2197_v0 = vrot.slane %v2195_v15, 1 }
  0x7b   : > { %2978 = vmatmul.mubr.msk.bf16.gmra.mrb[8].mxu0 %vm249_vm0, %v2667_v26 }
  0x7c   : > { %2981 = vmatprep.mubr.msk.bf16.mxu0 %vm249_vm0, %v2668_v44  ;;  %v2181_v44 = vrot.slane %v2179_v14, 1  ;;  %v2198_v9 = vsel %vm660_vm1, %v2193_v48, %v2197_v0 }
  0x7d   : > { %2894 = vmatmul.mubr.msk.bf16.gmra.mrb[4].mxu1 %vm249_vm0, %v3663_v7  ;;  %v1016_v7 = vrot.slane %v1014_v24, 3 }
  0x7e   : > { %2897 = vmatprep.mubr.msk.bf16.mxu1 %vm249_vm0, %v3675_v12  ;;  %v3234_v12 = vld [vmem:[%s3310_s29 + $0x38] sm:$0xff]   ;;  %v2185_v18 = vor.u32 %v2183_v40, %v2181_v44  ;;  %v2182_v36 = vsel %vm660_vm1, %v2177_v33, %v2181_v44 }
  0x7f   : > { %v1020_v5 = vor.u32 %v1019_v28, %v1016_v7  ;;  %v2163_v16 = vshll.u32 %v3234_v12, 16  ;;  %v2167_v21 = vshrl.u32 %v3234_v12, 16 }
  0x80   : > { %v2190_v58 = vsel %vm660_vm1, %v2185_v18, %v2189_v57 }
  0x81   : > { %v1021_v47 = vsel %vm382_vm2, %v1011_v25, %v1020_v5  ;;  %v2165_v23 = vrot.slane %v2163_v16, 1 }
  0x83   : > { %2982 = vmatmul.mubr.msk.bf16.gmra.mrb[12].mxu0 %vm249_vm0, %v2669_v10  ;;  %v2169_v31 = vor.u32 %v2167_v21, %v2165_v23  ;;  %v2166_v26 = vsel %vm660_vm1, %v2161_v55, %v2165_v23 }
  0x84   : > { %2989 = vmatprep.mubr.msk.bf16.mxu0 %vm249_vm0, %v2142_v38 }
  0x85   : > { %2898 = vmatmul.mubr.msk.bf16.gmra.mrb[8].mxu1 %vm249_vm0, %v1003_v62  ;;  %v2174_v51 = vsel %vm660_vm1, %v2169_v31, %v2173_v37 }
  0x86   : > { %2901 = vmatprep.mubr.msk.bf16.mxu1 %vm249_vm0, %v1012_v30 }
  0x8b   : > { %2990 = vmatmul.mubr.msk.bf16.vlgmr.msra.gmra.mrb[0].mxu0 %vm249_vm0, %v2150_v41 }
  0x8c   : > { %2993 = vmatprep.mubr.msk.bf16.mxu0 %vm249_vm0, %v2158_v20 }
  0x8d   : > { %2902 = vmatmul.mubr.msk.bf16.gmra.mrb[12].mxu1 %vm249_vm0, %v1021_v47 }
  0x8e   : > { %2917 = vmatprep.mubr.msk.bf16.mxu1 %vm249_vm0, %v2610_v34 }
  0x93   : > { %2994 = vmatmul.mubr.msk.bf16.gmra.mrb[4].mxu0 %vm249_vm0, %v2166_v26 }
  0x94   : > { %2997 = vmatprep.mubr.msk.bf16.mxu0 %vm249_vm0, %v2174_v51 }
  0x95   : > { %2918 = vmatmul.mubr.msk.bf16.vlgmr.msra.gmra.mrb[8].mxu1 %vm249_vm0, %v2611_v13 }
  0x96   : > { %2921 = vmatprep.mubr.msk.bf16.mxu1 %vm249_vm0, %v2612_v59 }
  0x9b   : > { %2998 = vmatmul.mubr.msk.bf16.gmra.mrb[8].mxu0 %vm249_vm0, %v2182_v36 }
  0x9c   : > { %3001 = vmatprep.mubr.msk.bf16.mxu0 %vm249_vm0, %v2190_v58 }
  0x9d   : > { %2922 = vmatmul.mubr.msk.bf16.gmra.mrb[12].mxu1 %vm249_vm0, %v2613_v56 }
  0xa3   : > { %3002 = vmatmul.mubr.msk.bf16.gmra.mrb[12].mxu0 %vm249_vm0, %v2198_v9 }
 0x148   : > { %v2891_v3 = vpop.f32.mrb[0].mxu1 }
 0x149   : > { %v1092_v8 = vpop.f32.mrb[1].mxu1 }
 0x14a   : > { %v2892_v61 = vpop.f32.mrb[2].mxu1 }
 0x14b   : > { %v1095_v2 = vpop.f32.mrb[3].mxu1 }
 0x150   : > { %v2895_v4 = vpop.f32.mrb[4].mxu1 }
 0x151   : > { %v1108_v54 = vpop.f32.mrb[5].mxu1 }
 0x152   : > { %v2896_v49 = vpop.f32.mrb[6].mxu1 }
 0x153   : > { %v1111_v53 = vpop.f32.mrb[7].mxu1 }
 0x15e   : > { %v2991_v10 = vpop.f32.mrb[0].mxu0 }
 0x15f   : > { %v3009_v6 = vadd.f32 %v2991_v10, %v2891_v3  ;;  %v2269_v24 = vpop.f32.mrb[1].mxu0 }
 0x160   : > { %v3010_v17 = vadd.f32 %v2269_v24, %v1092_v8  ;;  %v2992_v22 = vpop.f32.mrb[2].mxu0 }
 0x161   : > { %v2357_v25 = vadd.f32 %v3009_v6, %v3800_v63  ;;  %v3011_v38 = vadd.f32 %v2992_v22, %v2892_v61  ;;  %v2272_v52 = vpop.f32.mrb[3].mxu0 }
 0x162   : > { %v2355_v27 = vadd.f32 %v3010_v17, %v3800_v63  ;;  %v3012_v62 = vadd.f32 %v2272_v52, %v1095_v2 }
 0x163   : > { %v2373_v42 = vmax.f32 %v2357_v25, 0.0  ;;  %v2358_v7 = vadd.f32 %v3011_v38, %v3800_v63 }
 0x164   : > { %v2371_v28 = vmax.f32 %v2355_v27, 0.0  ;;  %v2356_v12 = vadd.f32 %v3012_v62, %v3800_v63 }
 0x165   : > { %v2721_v29 = vpack.c.bf16 %v2373_v42, %v2373_v42  ;;  %v2374_v30 = vmax.f32 %v2358_v7, 0.0 }
 0x166   : > { %v2719_v35 = vpack.c.bf16 %v2371_v28, %v2371_v28  ;;  %v2372_v1 = vmax.f32 %v2356_v12, 0.0  ;;  %v2995_v43 = vpop.f32.mrb[4].mxu0 }
 0x167   : > { %2454 = vst.msk [vmem:[%s3809_s11 + $0x8] sm:$0xf] %vm2451_vm3, %v2721_v29  ;;  %v2722_v5 = vpack.c.bf16 %v2374_v30, %v2374_v30  ;;  %v3013_v16 = vadd.f32 %v2995_v43, %v2895_v4  ;;  %v2285_v41 = vpop.f32.mrb[5].mxu0 }
 0x168   : > { %2452 = vst.msk [vmem:[%s3809_s11] sm:$0xf] %vm2451_vm3, %v2719_v35  ;;  %v2720_v19 = vpack.c.bf16 %v2372_v1, %v2372_v1  ;;  %v3014_v20 = vadd.f32 %v2285_v41, %v1108_v54  ;;  %v2996_v21 = vpop.f32.mrb[6].mxu0  ;;  %v2919_v34 = vpop.f32.mrb[8].mxu1 }
 0x169   : > { %2455 = vst.msk [vmem:[%s3809_s11 + $0xc] sm:$0xf] %vm2451_vm3, %v2722_v5  ;;  %v2361_v46 = vadd.f32 %v3013_v16, %v3800_v63  ;;  %v3015_v47 = vadd.f32 %v2996_v21, %v2896_v49  ;;  %v2288_v23 = vpop.f32.mrb[7].mxu0  ;;  %v1285_v31 = vpop.f32.mrb[9].mxu1 }
 0x16a   : > { %2453 = vst.msk [vmem:[%s3809_s11 + $0x4] sm:$0xf] %vm2451_vm3, %v2720_v19  ;;  %v2359_v45 = vadd.f32 %v3014_v20, %v3800_v63  ;;  %v3016_v55 = vadd.f32 %v2288_v23, %v1111_v53  ;;  %v2920_v14 = vpop.f32.mrb[10].mxu1 }
 0x16b   : > { %v2377_v37 = vmax.f32 %v2361_v46, 0.0  ;;  %v2362_v11 = vadd.f32 %v3015_v47, %v3800_v63  ;;  %v1288_v51 = vpop.f32.mrb[11].mxu1 }
 0x16c   : > { %v2375_v26 = vmax.f32 %v2359_v45, 0.0  ;;  %v2360_v50 = vadd.f32 %v3016_v55, %v3800_v63 }
 0x16d   : > { %v2725_v40 = vpack.c.bf16 %v2377_v37, %v2377_v37  ;;  %v2378_v39 = vmax.f32 %v2362_v11, 0.0 }
 0x16e   : > { %v2723_v13 = vpack.c.bf16 %v2375_v26, %v2375_v26  ;;  %v2376_v44 = vmax.f32 %v2360_v50, 0.0  ;;  %v2999_v59 = vpop.f32.mrb[8].mxu0 }
 0x16f   : > { %2458 = vst.msk [vmem:[%s3809_s11 + $0x18] sm:$0xf] %vm2451_vm3, %v2725_v40  ;;  %v2726_v33 = vpack.c.bf16 %v2378_v39, %v2378_v39  ;;  %v3017_v32 = vadd.f32 %v2999_v59, %v2919_v34  ;;  %v2301_v18 = vpop.f32.mrb[9].mxu0 }
 0x170   : > { %2456 = vst.msk [vmem:[%s3809_s11 + $0x10] sm:$0xf] %vm2451_vm3, %v2723_v13  ;;  %v2724_v57 = vpack.c.bf16 %v2376_v44, %v2376_v44  ;;  %v3018_v36 = vadd.f32 %v2301_v18, %v1285_v31  ;;  %v3000_v60 = vpop.f32.mrb[10].mxu0  ;;  %v2923_v48 = vpop.f32.mrb[12].mxu1 }
 0x171   : > { %2459 = vst.msk [vmem:[%s3809_s11 + $0x1c] sm:$0xf] %vm2451_vm3, %v2726_v33  ;;  %v2365_v15 = vadd.f32 %v3017_v32, %v3800_v63  ;;  %v3019_v58 = vadd.f32 %v3000_v60, %v2920_v14  ;;  %v2304_v56 = vpop.f32.mrb[11].mxu0  ;;  %v1301_v3 = vpop.f32.mrb[13].mxu1 }
 0x172   : > { %2457 = vst.msk [vmem:[%s3809_s11 + $0x14] sm:$0xf] %vm2451_vm3, %v2724_v57  ;;  %v2363_v0 = vadd.f32 %v3018_v36, %v3800_v63  ;;  %v3020_v9 = vadd.f32 %v2304_v56, %v1288_v51  ;;  %v2924_v2 = vpop.f32.mrb[14].mxu1 }
 0x173   : > { %v2381_v8 = vmax.f32 %v2365_v15, 0.0  ;;  %v2366_v61 = vadd.f32 %v3019_v58, %v3800_v63  ;;  %v1304_v49 = vpop.f32.mrb[15].mxu1 }
 0x174   : > { %v2379_v4 = vmax.f32 %v2363_v0, 0.0  ;;  %v2364_v54 = vadd.f32 %v3020_v9, %v3800_v63 }
 0x175   : > { %v2729_v53 = vpack.c.bf16 %v2381_v8, %v2381_v8  ;;  %v2382_v10 = vmax.f32 %v2366_v61, 0.0 }
 0x176   : > { %v2727_v6 = vpack.c.bf16 %v2379_v4, %v2379_v4  ;;  %v2380_v24 = vmax.f32 %v2364_v54, 0.0  ;;  %v3003_v17 = vpop.f32.mrb[12].mxu0 }
 0x177   : > { %2462 = vst.msk [vmem:[%s3809_s11 + $0x28] sm:$0xf] %vm2451_vm3, %v2729_v53  ;;  %v2730_v22 = vpack.c.bf16 %v2382_v10, %v2382_v10  ;;  %v3021_v25 = vadd.f32 %v3003_v17, %v2923_v48  ;;  %v2317_v38 = vpop.f32.mrb[13].mxu0 }
 0x178   : > { %2460 = vst.msk [vmem:[%s3809_s11 + $0x20] sm:$0xf] %vm2451_vm3, %v2727_v6  ;;  %v2728_v52 = vpack.c.bf16 %v2380_v24, %v2380_v24  ;;  %v3022_v27 = vadd.f32 %v2317_v38, %v1301_v3  ;;  %v3004_v62 = vpop.f32.mrb[14].mxu0 }
 0x179   : > { %2463 = vst.msk [vmem:[%s3809_s11 + $0x2c] sm:$0xf] %vm2451_vm3, %v2730_v22  ;;  %v2369_v42 = vadd.f32 %v3021_v25, %v3800_v63  ;;  %v3023_v7 = vadd.f32 %v3004_v62, %v2924_v2  ;;  %v2320_v28 = vpop.f32.mrb[15].mxu0 }
 0x17a   : > { %2461 = vst.msk [vmem:[%s3809_s11 + $0x24] sm:$0xf] %vm2451_vm3, %v2728_v52  ;;  %v2367_v12 = vadd.f32 %v3022_v27, %v3800_v63  ;;  %v3024_v29 = vadd.f32 %v2320_v28, %v1304_v49 }
 0x17b   : > { %v2385_v30 = vmax.f32 %v2369_v42, 0.0  ;;  %v2370_v35 = vadd.f32 %v3023_v7, %v3800_v63 }
 0x17c   : > { %v2383_v1 = vmax.f32 %v2367_v12, 0.0  ;;  %v2368_v43 = vadd.f32 %v3024_v29, %v3800_v63 }
 0x17d   : > { %v2733_v5 = vpack.c.bf16 %v2385_v30, %v2385_v30  ;;  %v2386_v16 = vmax.f32 %v2370_v35, 0.0 }
 0x17e   : > { %v2731_v41 = vpack.c.bf16 %v2383_v1, %v2383_v1  ;;  %v2384_v19 = vmax.f32 %v2368_v43, 0.0 }
 0x17f   : > { %2466 = vst.msk [vmem:[%s3809_s11 + $0x38] sm:$0xf] %vm2451_vm3, %v2733_v5  ;;  %v2734_v20 = vpack.c.bf16 %v2386_v16, %v2386_v16 }
 0x180   : > { %2464 = vst.msk [vmem:[%s3809_s11 + $0x30] sm:$0xf] %vm2451_vm3, %v2731_v41  ;;  %v2732_v21 = vpack.c.bf16 %v2384_v19, %v2384_v19 }
 0x181   : > { %2467 = vst.msk [vmem:[%s3809_s11 + $0x3c] sm:$0xf] %vm2451_vm3, %v2734_v20 }
 0x182   : > { %2465 = vst.msk [vmem:[%s3809_s11 + $0x34] sm:$0xf] %vm2451_vm3, %v2732_v21 }
 0x183 PF: > { %s13_s12 = sadd.s32 1, %s3250_s12  }
 0x184   : > { %p10_p4 = scmp.ge.s32.totalorder %s13_s12, 4  }
 0x186   :  { %12 = sbr.rel (!%p10_p4) target bundleno = 1 (0x1), region = 62 }

// kernel: ocrnet_forward.17
= control target key start
LH: loop header
LB: loop body
LE: loop exit
PB: predicated region body
PF: predicated region fallthrough
CT: control target
= control target key end

     0   :  { %s861_s12 = smov 0   ;;  %s863_s13 = smov 0   ;;  %s940_s0 = inlined_call_operand.vmem [shape: bf16[2,64,32], index: 0, kind: input, shape index: {}]   ;;  %s941_s1 = inlined_call_operand.vmem [shape: bf16[2,8,32], index: 1, kind: input, shape index: {}]   ;;  %s942_s2 = inlined_call_operand.vmem [shape: bf16[2,8,32], index: 2, kind: input, shape index: {}]   ;;  %s943_s3 = inlined_call_operand.vmem [shape: bf16[2,64,32], index: 3, kind: output, shape index: {}]  }
   0x1   :  { %s865_s14 = smov 0  }
   0x2 LB: > { %s25_s15 = sadd.s32 1, %s835_s13  ;;  %p686_p0 = scmp.ge.s32.totalorder %s839_s14, 1  ;;  %s839_s14 = sphi %s865_s14, %s13_s14   ;;  %s835_s13 = sphi %s863_s13, %s945_s13   ;;  %s831_s12 = sphi %s861_s12, %s944_s12  }
   0x3   : > { %p27_p1 = scmp.ge.s32.totalorder %s25_s15, 2  ;;  %p176_p2 = scmp.lt.s32.totalorder %s839_s14, 3 }
   0x5   : > { %s947_s15 = smov (%p27_p1, %s25_s15), 0  ;;  %p177_p3 = pnand %p686_p0, %p176_p2 }
   0x6   : > { %p217_p4 = scmp.lt.s32.totalorder (!%p177_p3), %s831_s12, 1  ;;  %vm274_vm0 = vcmask (!%p177_p3), 261120   ;;  %vm355_vm1 = vcmask (!%p177_p3), 64512   ;;  %vm461_vm2 = vcmask (!%p177_p3), 1043456   ;;  %vm562_vm3 = vcmask (!%p177_p3), 257024  }
   0x7   : > { %180 = sbr.rel (%p177_p3) target bundleno = 789 (0x315), region = 32 }
   0xe   : > { %s949_s12 = smov (!%p217_p4, %s831_s12), 1 }
   0xf   : > { %s715_s16 = sshll.u32 %s949_s12, 5  ;;  %s689_s17 = sshll.u32 %s949_s12, 2 }
  0x10   : > { %s224_s20 = scalar_lea.vmem %s940_s0, %s715_s16  ;;  %s229_s23 = scalar_lea.vmem %s941_s1, %s689_s17 }
  0x11   : > { %v253_v0 = vld [vmem:[%s229_s23] sm:$0xf]  ;;  %v782_v3 = vld [vmem:[%s224_s20 + $0x8] sm:$0xff]   ;;  %v783_v4 = vld [vmem:[%s224_s20 + $0x10] sm:$0xff]   ;;  %s233_s26 = scalar_lea.vmem %s942_s2, %s689_s17  ;;  %s242_s29 = scalar_lea.vmem %s943_s3, %s715_s16 }
  0x12   : > { %755 = vmatprep.subr.msk.bf16.mxu0 %vm274_vm0, %v253_v0  ;;  %v288_v1 = vsel %vm274_vm0, %v253_v0, 0  ;;  %v781_v2 = vld [vmem:[%s224_s20] sm:$0xff]   ;;  %v784_v5 = vld [vmem:[%s224_s20 + $0x18] sm:$0xff]  }
  0x13   : > { %736 = vmatpush3.bf16.xpose.msra.mxu0 %v288_v1  ;;  %737 = vmatprep.mubr.msk.bf16.mxu0 %vm274_vm0, %v781_v2  ;;  %v448_v62 = vld [vmem:[%s233_s26] sm:$0xf] }
  0x14   : > { %756 = vmatprep.subr.msk.bf16.mxu1 %vm461_vm2, %v448_v62  ;;  %v463_v63 = vsel %vm461_vm2, %v448_v62, 0 }
  0x15   : > { %746 = vmatpush3.bf16.msra.mxu1 %v463_v63 }
  0x1a   : > { %738 = vmatmul.mubr.msk.bf16.vlgmr.msra.gmra.mrb[0].mxu0 %vm274_vm0, %v782_v3 }
  0x1b   : > { %741 = vmatprep.mubr.msk.bf16.mxu0 %vm274_vm0, %v783_v4 }
  0x22   : > { %742 = vmatmul.mubr.msk.bf16.gmra.mrb[4].mxu0 %vm274_vm0, %v784_v5 }
  0xed   : > { %v739_v6 = vpop.f32.mrb[0].mxu0 }
  0xee   : > { %v324_v7 = vpop.f32.mrb[1].mxu0  ;;  %v362_v8 = vsel %vm355_vm1, %v739_v6, -inf }
  0xef   : > { %363 = vmax.xlane.f32.xlu1 %v362_v8  ;;  %v740_v9 = vpop.f32.mrb[2].mxu0  ;;  %v356_v10 = vsel %vm355_vm1, %v324_v7, -inf }
  0xf0   : > { %357 = vmax.xlane.f32.xlu0 %v356_v10  ;;  %v327_v11 = vpop.f32.mrb[3].mxu0  ;;  %v365_v12 = vsel %vm355_vm1, %v740_v9, -inf }
  0xf1   : > { %v359_v13 = vsel %vm355_vm1, %v327_v11, -inf }
  0xf3   : > { %366 = vmax.xlane.f32.xlu1 %v365_v12 }
  0xf4   : > { %360 = vmax.xlane.f32.xlu0 %v359_v13 }
  0xf5   : > { %v743_v14 = vpop.f32.mrb[4].mxu0 }
  0xf6   : > { %v340_v15 = vpop.f32.mrb[5].mxu0  ;;  %v374_v20 = vsel %vm355_vm1, %v743_v14, -inf }
  0xf7   : > { %v744_v16 = vpop.f32.mrb[6].mxu0  ;;  %v368_v17 = vsel %vm355_vm1, %v340_v15, -inf }
  0xf8   : > { %369 = vmax.xlane.f32.xlu0 %v368_v17  ;;  %v343_v18 = vpop.f32.mrb[7].mxu0  ;;  %v377_v21 = vsel %vm355_vm1, %v744_v16, -inf }
  0xf9   : > { %v371_v19 = vsel %vm355_vm1, %v343_v18, -inf }
  0xfa   : > { %372 = vmax.xlane.f32.xlu1 %v371_v19 }
  0xfc   : > { %375 = vmax.xlane.f32.xlu0 %v374_v20 }
  0xfe   : > { %378 = vmax.xlane.f32.xlu1 %v377_v21 }
 0x17c   : > { %v364_v22 = vpop.xlane.xlu1 %363 }
 0x17d   : > { %v382_v23 = vsub.f32 %v739_v6, %v364_v22  ;;  %v358_v24 = vpop.xlane.xlu0 %357 }
 0x17e   : > { %v380_v25 = vsub.f32 %v324_v7, %v358_v24 }
 0x17f   : > { %v392_v26 = vmul.f32 1.442695, %v382_v23 }
 0x180   : > { %v388_v27 = vmul.f32 1.442695, %v380_v25  ;;  %v367_v28 = vpop.xlane.xlu1 %366 }
 0x181   : > { %v383_v29 = vsub.f32 %v740_v9, %v367_v28  ;;  %v361_v30 = vpop.xlane.xlu0 %360 }
 0x182   : > { %785 = vpow2.f32 %v388_v27  ;;  %v381_v31 = vsub.f32 %v327_v11, %v361_v30 }
 0x183   : > { %787 = vpow2.f32 %v392_v26  ;;  %v394_v32 = vmul.f32 1.442695, %v383_v29 }
 0x184   : > { %v390_v33 = vmul.f32 1.442695, %v381_v31 }
 0x185   : > { %v370_v34 = vpop.xlane.xlu0 %369 }
 0x186   : > { %789 = vpow2.f32 %v390_v33  ;;  %v384_v35 = vsub.f32 %v340_v15, %v370_v34 }
 0x187   : > { %v373_v36 = vpop.xlane.xlu1 %372  ;;  %791 = vpow2.f32 %v394_v32 }
 0x188   : > { %v396_v37 = vmul.f32 1.442695, %v384_v35  ;;  %v385_v38 = vsub.f32 %v343_v18, %v373_v36 }
 0x189   : > { %v376_v39 = vpop.xlane.xlu0 %375 }
 0x18a   : > { %793 = vpow2.f32 %v396_v37  ;;  %v398_v40 = vmul.f32 1.442695, %v385_v38  ;;  %v386_v41 = vsub.f32 %v743_v14, %v376_v39 }
 0x18b   : > { %v379_v42 = vpop.xlane.xlu1 %378 }
 0x18c   : > { %v786_v43 = vpop.eup %785  ;;  %795 = vpow2.f32 %v398_v40  ;;  %v400_v44 = vmul.f32 1.442695, %v386_v41  ;;  %v387_v45 = vsub.f32 %v744_v16, %v379_v42 }
 0x18d   : > { %v404_v46 = vsel %vm355_vm1, %v786_v43, 0.0  ;;  %v788_v47 = vpop.eup %787 }
 0x18e   : > { %797 = vpow2.f32 %v400_v44  ;;  %v402_v48 = vmul.f32 1.442695, %v387_v45  ;;  %405 = vadd.xlane.f32.xlu0 %v404_v46  ;;  %v410_v50 = vsel %vm355_vm1, %v788_v47, 0.0 }
 0x190   : > { %v790_v49 = vpop.eup %789  ;;  %799 = vpow2.f32 %v402_v48 }
 0x191   : > { %v407_v51 = vsel %vm355_vm1, %v790_v49, 0.0  ;;  %v792_v52 = vpop.eup %791 }
 0x192   : > { %411 = vadd.xlane.f32.xlu0 %v410_v50  ;;  %408 = vadd.xlane.f32.xlu1 %v407_v51  ;;  %v413_v55 = vsel %vm355_vm1, %v792_v52, 0.0 }
 0x194   : > { %v794_v53 = vpop.eup %793 }
 0x195   : > { %v416_v54 = vsel %vm355_vm1, %v794_v53, 0.0 }
 0x196   : > { %v796_v56 = vpop.eup %795  ;;  %417 = vadd.xlane.f32.xlu0 %v416_v54  ;;  %414 = vadd.xlane.f32.xlu1 %v413_v55 }
 0x197   : > { %v419_v59 = vsel %vm355_vm1, %v796_v56, 0.0 }
 0x198   : > { %v798_v57 = vpop.eup %797 }
 0x199   : > { %v422_v58 = vsel %vm355_vm1, %v798_v57, 0.0 }
 0x19a   : > { %v800_v60 = vpop.eup %799  ;;  %423 = vadd.xlane.f32.xlu0 %v422_v58  ;;  %420 = vadd.xlane.f32.xlu1 %v419_v59 }
 0x19b   : > { %v425_v61 = vsel %vm355_vm1, %v800_v60, 0.0 }
 0x19e   : > { %426 = vadd.xlane.f32.xlu1 %v425_v61 }
 0x21b   : > { %v406_v0 = vpop.xlane.xlu0 %405 }
 0x21c   : > { %801 = vrcp.f32 %v406_v0 }
 0x21f   : > { %v412_v1 = vpop.xlane.xlu0 %411  ;;  %v409_v2 = vpop.xlane.xlu1 %408 }
 0x220   : > { %803 = vrcp.f32 %v409_v2 }
 0x221   : > { %805 = vrcp.f32 %v412_v1 }
 0x223   : > { %v418_v3 = vpop.xlane.xlu0 %417  ;;  %v415_v4 = vpop.xlane.xlu1 %414 }
 0x224   : > { %807 = vrcp.f32 %v415_v4 }
 0x225   : > { %809 = vrcp.f32 %v418_v3 }
 0x226   : > { %v802_v7 = vpop.eup %801 }
 0x227   : > { %v424_v5 = vpop.xlane.xlu0 %423  ;;  %v421_v6 = vpop.xlane.xlu1 %420  ;;  %v429_v10 = vmul.f32 %v802_v7, %v786_v43 }
 0x228   : > { %811 = vrcp.f32 %v421_v6 }
 0x229   : > { %813 = vrcp.f32 %v424_v5 }
 0x22a   : > { %v804_v8 = vpop.eup %803 }
 0x22b   : > { %v427_v9 = vpop.xlane.xlu1 %426  ;;  %v431_v11 = vmul.f32 %v804_v8, %v790_v49  ;;  %v806_v12 = vpop.eup %805 }
 0x22c   : > { %815 = vrcp.f32 %v427_v9  ;;  %v433_v15 = vmul.f32 %v806_v12, %v788_v47 }
 0x22d   : > { %v444_v13 = vpack.c.bf16 %v431_v11, %v429_v10 }
 0x22e   : > { %v808_v14 = vpop.eup %807 }
 0x22f   : > { %747 = vmatprep.mubr.msk.bf16.mxu1 %vm355_vm1, %v444_v13  ;;  %v435_v16 = vmul.f32 %v808_v14, %v792_v52  ;;  %v810_v17 = vpop.eup %809 }
 0x230   : > { %v437_v21 = vmul.f32 %v810_v17, %v794_v53 }
 0x231   : > { %v445_v18 = vpack.c.bf16 %v435_v16, %v433_v15 }
 0x232   : > { %v812_v19 = vpop.eup %811 }
 0x233   : > { %v814_v20 = vpop.eup %813  ;;  %748 = vmatmul.mubr.msk.bf16.vlgmr.msra.gmra.mrb[0].mxu1 %vm355_vm1, %v445_v18  ;;  %v439_v22 = vmul.f32 %v812_v19, %v796_v56 }
 0x234   : > { %v441_v25 = vmul.f32 %v814_v20, %v798_v57 }
 0x235   : > { %v446_v24 = vpack.c.bf16 %v439_v22, %v437_v21 }
 0x236   : > { %v816_v23 = vpop.eup %815 }
 0x237   : > { %v443_v26 = vmul.f32 %v816_v23, %v800_v60  ;;  %751 = vmatprep.mubr.msk.bf16.mxu1 %vm355_vm1, %v446_v24 }
 0x239   : > { %v447_v27 = vpack.c.bf16 %v443_v26, %v441_v25 }
 0x23b   : > { %752 = vmatmul.mubr.msk.bf16.gmra.mrb[4].mxu1 %vm355_vm1, %v447_v27 }
 0x306   : > { %v749_v28 = vpop.f32.mrb[0].mxu1 }
 0x307   : > { %v719_v29 = vpack.c.bf16 %v749_v28, %v749_v28  ;;  %v499_v30 = vpop.f32.mrb[1].mxu1 }
 0x308   : > { %v717_v31 = vpack.c.bf16 %v499_v30, %v499_v30  ;;  %v750_v32 = vpop.f32.mrb[2].mxu1 }
 0x309   : > { %565 = vst.msk [vmem:[%s242_s29 + $0x8] sm:$0xf] %vm562_vm3, %v719_v29  ;;  %v720_v33 = vpack.c.bf16 %v750_v32, %v750_v32  ;;  %v502_v34 = vpop.f32.mrb[3].mxu1 }
 0x30a   : > { %563 = vst.msk [vmem:[%s242_s29] sm:$0xf] %vm562_vm3, %v717_v31  ;;  %v718_v35 = vpack.c.bf16 %v502_v34, %v502_v34 }
 0x30b   : > { %566 = vst.msk [vmem:[%s242_s29 + $0xc] sm:$0xf] %vm562_vm3, %v720_v33 }
 0x30c   : > { %564 = vst.msk [vmem:[%s242_s29 + $0x4] sm:$0xf] %vm562_vm3, %v718_v35 }
 0x30e   : > { %v753_v36 = vpop.f32.mrb[4].mxu1 }
 0x30f   : > { %v723_v37 = vpack.c.bf16 %v753_v36, %v753_v36  ;;  %v515_v38 = vpop.f32.mrb[5].mxu1 }
 0x310   : > { %v721_v39 = vpack.c.bf16 %v515_v38, %v515_v38  ;;  %v754_v40 = vpop.f32.mrb[6].mxu1 }
 0x311   : > { %569 = vst.msk [vmem:[%s242_s29 + $0x18] sm:$0xf] %vm562_vm3, %v723_v37  ;;  %v724_v41 = vpack.c.bf16 %v754_v40, %v754_v40  ;;  %v518_v42 = vpop.f32.mrb[7].mxu1 }
 0x312   : > { %567 = vst.msk [vmem:[%s242_s29 + $0x10] sm:$0xf] %vm562_vm3, %v721_v39  ;;  %v722_v43 = vpack.c.bf16 %v518_v42, %v518_v42 }
 0x313   : > { %570 = vst.msk [vmem:[%s242_s29 + $0x1c] sm:$0xf] %vm562_vm3, %v724_v41 }
 0x314   : > { %568 = vst.msk [vmem:[%s242_s29 + $0x14] sm:$0xf] %vm562_vm3, %v722_v43 }
 0x315 PF: > { %s13_s14 = sadd.s32 1, %s839_s14   ;;  %s944_s12 = smov %s835_s13 }
 0x316   : > { %p10_p5 = scmp.ge.s32.totalorder %s13_s14, 4   ;;  %s945_s13 = smov %s947_s15 }
 0x318   :  { %12 = sbr.rel (!%p10_p5) target bundleno = 2 (0x2), region = 68 }

// kernel: ocrnet_forward.19
= control target key start
LH: loop header
LB: loop body
LE: loop exit
PB: predicated region body
PF: predicated region fallthrough
CT: control target
= control target key end

     0   :  { %8 = vsyncpa [#allocation3], 0  ;;  %s765_s0 = inlined_call_operand.vmem [shape: f32[16,8,8], index: 0, kind: input, shape index: {}]   ;;  %s766_s1 = inlined_call_operand.vmem [shape: f32[32,8], index: 1, kind: input, shape index: {}, may-alias: {1,2}]   ;;  %s767_s2 = inlined_call_operand.vmem [shape: f32[32,8], index: 2, kind: input, shape index: {}, may-alias: {1,2}]   ;;  %s768_s3 = inlined_call_operand.hbm [shape: f32[16,32,32], index: 3, kind: output, shape index: {}]  }
   0x1   :  { %10 = vsyncpa [#allocation3 + $0x1], 0  ;;  %s631_s12 = smov 0   ;;  %s633_s13 = smov 0  }
   0x2   :  { %s635_s14 = smov 0   ;;  %s637_s15 = smov 0  }
   0x3 LB: > { %s652_s16 = sadd.s32 4294967295, %s603_s15   ;;  %s439_s17 = sadd.s32 4294967294, %s603_s15   ;;  %s603_s15 = sphi %s637_s15, %s774_s15   ;;  %s599_s14 = sphi %s635_s14, %s773_s14   ;;  %s595_s13 = sphi %s633_s13, %s772_s13   ;;  %s591_s12 = sphi %s631_s12, %s771_s12  }
   0x4   : > { %s656_s18 = sadd.s32 1, %s603_s15   ;;  %s91_s19 = sadd.s32 1, %s599_s14 }
   0x5   : > { %s88_s20 = ssub.s32 %s603_s15, %s656_s18  ;;  %p101_p0 = scmp.ne.s32.totalorder %s599_s14, %s595_s13 }
   0x6   : > { %p89_p1 = scmp.eq.s32.totalorder %s88_s20, 0  ;;  %p102_p2 = scmp.eq.s32.totalorder %s652_s16, 15 }
   0x7   : > { %p107_p3 = scmp.ne.s32.totalorder %s595_s13, %s591_s12  ;;  %p108_p4 = scmp.eq.s32.totalorder %s439_s17, 15 }
   0x8   : > { %s667_s21 = scalar_select %p89_p1, %s599_s14, %s91_s19  }
   0x9   : > { %p669_p5 = por %p102_p2, %p101_p0  ;;  %p673_p6 = por %p108_p4, %p107_p3 }
   0xa   : > { %p442_p7 = scmp.ge.s32.totalorder %s603_s15, 1  ;;  %p139_p8 = scmp.lt.s32.totalorder %s603_s15, 17 }
   0xc   : > { %p140_p9 = pnand %p442_p7, %p139_p8 }
   0xd   : > { %v167_v0 = vld [vmem:[%s767_s2] sm:$0xff] (!%p140_p9)  ;;  %v168_v1 = vld [vmem:[%s767_s2 + $0x8] sm:$0xff] (!%p140_p9)  ;;  %vm171_vm0 = vcmask (!%p140_p9), 64512   ;;  %v605_v2 = vmov (!%p140_p9), 0.0|0.0   ;;  %p162_p10 = scmp.lt.s32.totalorder (!%p140_p9), %s652_s16, 15  ;;  %vm606_vm2 = vmmov (!%p140_p9), 0  }
   0xe   : > { %143 = sbr.rel (%p140_p9) target bundleno = 477 (0x1dd), region = 32  ;;  %489 = vmatprep.subr.bf16.mxu0 (!%p140_p9), %v605_v2  ;;  %v490_v3 = vpack.c.bf16 (!%p140_p9), %v168_v1, %v167_v0  ;;  %vm491_vm1 = vmpackc.low (!%p140_p9), %vm171_vm0, %vm171_vm0  ;;  %v607_v4 = vmov (!%p140_p9), 0.0   ;;  %v169_v5 = vld [vmem:[%s767_s2 + $0x10] sm:$0xff] (!%p140_p9)  ;;  %v170_v6 = vld [vmem:[%s767_s2 + $0x18] sm:$0xff] (!%p140_p9)  ;;  %s159_s27 = sand.u32 (!%p140_p9), 1, %s595_s13   ;;  %vm358_vm3 = vcmask (!%p140_p9), 261120  }
   0xf   : > { %478 = vmatprep.mubr.msk.f32.mxu0 (!%p140_p9), %vm606_vm2, %v607_v4  ;;  %v494_v7 = vpack.c.bf16 (!%p140_p9), %v170_v6, %v169_v5  ;;  %v257_v9 = vld [vmem:[%s766_s1] sm:$0xff] (!%p140_p9)  ;;  %v258_v11 = vld [vmem:[%s766_s1 + $0x8] sm:$0xff] (!%p140_p9)  ;;  %v259_v13 = vld [vmem:[%s766_s1 + $0x10] sm:$0xff] (!%p140_p9)  ;;  %s443_s28 = sshll.u32 (!%p140_p9), %s159_s27, 5  ;;  %s459_s4 = sshll.u32 (!%p140_p9), %s652_s16, 9 }
  0x10   : > { %492 = vmatpush3.bf16.xpose.msk.msra.mxu0 (!%p140_p9), %vm491_vm1, %v490_v3  ;;  %483 = vmatprep.mubr.msk.f32.mxu1 (!%p140_p9), %vm171_vm0, %v257_v9  ;;  %v260_v14 = vld [vmem:[%s766_s1 + $0x18] sm:$0xff] (!%p140_p9)  ;;  %s161_s29 = scalar_lea.vmem (!%p140_p9), [#allocation2], %s443_s28  ;;  %s722_s7 = scalar_lea.hbm (!%p140_p9), %s768_s3, %s459_s4 }
  0x11   : > { %493 = vmatprep.subr.bf16.mxu0 (!%p140_p9), %v605_v2  ;;  %s377_s30 = sshll.u32 (!%p140_p9), %s161_s29, 4  ;;  %s724_s8 = scalar_lea.sflag (!%p140_p9), [#allocation3], %s159_s27  ;;  %s717_s30 = int_to_ptr.vmem [resolvable:$true] %s377_s30 }
  0x15   : > { %s163_s5 = scalar_select %p162_p10, %s652_s16, 15 }
  0x16   : > { %s541_s16 = scalar_lea.vmem %s717_s30, 512 }
  0x17   : > { %s444_s6 = sshll.u32 %s163_s5, 3  ;;  %p542_p11 = scmp.ne.s32.totalorder %s717_s30, %s541_s16 }
  0x18   : > { %496 = vmatpush3.bf16.xpose.msk.msra.mxu0 %vm491_vm1, %v494_v7  ;;  %s165_s9 = scalar_lea.vmem %s765_s0, %s444_s6 }
  0x19   : > { %v166_v8 = vld [vmem:[%s165_s9] sm:$0xff]  ;;  %p543_p12 = pnand %p542_p11, %p669_p5  ;;  %s608_s9 = smov [#allocation2]  }
  0x1a   : > { %s545_s10 = sshll.u32 %s608_s9, 4  ;;  %s546_s10 = int_to_ptr.vmem [resolvable:$false] %s545_s10 }
  0x1b   : > { %p544_p13 = pneg %p543_p12  ;;  %s547_s11 = scalar_lea.vmem %s546_s10, 1024 }
  0x1c   : > { %p548_p0 = scmp.lt.s32.totalorder %s717_s30, %s546_s10  ;;  %p549_p1 = scmp.lt.s32.totalorder %s547_s11, %s541_s16 }
  0x1e   : > { %p550_p2 = por %p549_p1, %p548_p0 }
  0x1f   : > { %479 = vmatmul.mubr.msk.f32.vlgmr.msra.gmra.mrb[0].mxu0 %vm171_vm0, %v166_v8 }
  0x20   : > { %p551_p3 = pnand %p550_p2, %p544_p13 }
  0xf2   : > { %v253_v10 = vpop.f32.mrb[0].mxu0 }
  0xf3   : > { %v480_v12 = vpop.f32.mrb[1].mxu0  ;;  %481 = vmatprep.subr.mxu1 %v253_v10 }
  0xf4   : > { %482 = vmatpush3.msra.mxu1 %v253_v10 }
  0xf5   : > { %484 = vmatmul.mubr.msk.f32.vlgmr.msra.gmra.mrb[0].mxu1 %vm171_vm0, %v258_v11 }
  0xf6   : > { %486 = vmatprep.mubr.msk.f32.mxu1 %vm171_vm0, %v259_v13 }
  0xf9   : > { %487 = vmatmul.mubr.msk.f32.gmra.mrb[2].mxu1 %vm171_vm0, %v260_v14 }
 0x1c8   : > { %v485_v15 = vpop.f32.mrb[0].mxu1 }
 0x1c9   : > { %360 = vst.msk [vmem:[%s161_s29 + $0x8] sm:$0xff] %vm358_vm3, %v485_v15  ;;  %v339_v16 = vpop.f32.mrb[1].mxu1 }
 0x1ca   : > { %359 = vst.msk [vmem:[%s161_s29] sm:$0xff] %vm358_vm3, %v339_v16 }
 0x1cc   : > { %v488_v17 = vpop.f32.mrb[2].mxu1 }
 0x1cd   : > { %362 = vst.msk [vmem:[%s161_s29 + $0x18] sm:$0xff] %vm358_vm3, %v488_v17  ;;  %v349_v18 = vpop.f32.mrb[3].mxu1 }
 0x1ce   : > { %361 = vst.msk [vmem:[%s161_s29 + $0x10] sm:$0xff] %vm358_vm3, %v349_v18 }
 0x1cf   : > { %554 = shalt.err (!%p551_p3)
}
 0x1d0   : > { %s555_s17 = scalar_lea.hbm %s722_s7, 512  ;;  %s559_s24 = scalar_lea.hbm %s768_s3, 8192 }
 0x1d1   : > { %p556_p4 = scmp.ne.s32.totalorder %s722_s7, %s555_s17  ;;  %p560_p9 = scmp.lt.u32.totalorder %s722_s7, %s768_s3 }
 0x1d2   : > { %p561_p10 = scmp.lt.u32.totalorder %s559_s24, %s555_s17  ;;  %p563_p12 = scmp.lt.u32.totalorder %s555_s17, %s722_s7 }
 0x1d3   : > { %p557_p7 = pnand %p556_p4, %p669_p5 }
 0x1d4   : > { %p562_p11 = por %p561_p10, %p560_p9 }
 0x1d5   : > { %p558_p8 = pneg %p557_p7 }
 0x1d6   : > { %p564_p13 = por %p563_p12, %p562_p11 }
 0x1d8   : > { %p565_p0 = pnand %p564_p13, %p558_p8 }
 0x1da   : > { %568 = shalt.err (!%p565_p0)
}
 0x1db   : > { %s609_s27 = smov 128   ;;  %s610_s28 = smov 8  }
 0x1dc   : > { %497 = dma.vmem_to_hbm [thread:$0]  (%p669_p5), %s717_s30, 512, %s722_s7, %s724_s8, %s609_s27, %s609_s27, %s610_s28  }
 0x1dd PF: > { %p503_p1 = scmp.ge.s32.totalorder %s603_s15, 2  ;;  %s392_s29 = sand.u32 1, %s591_s12  }
 0x1de   : > { %s393_s4 = scalar_lea.sflag [#allocation3], %s392_s29 }
 0x1df   : > { %p500_p2 = pnand %p503_p1, %p673_p6 }
 0x1e1   : > { %586 = dma.done.wait (!%p500_p2), %s393_s4, 512  }
 0x1e2   : > { %588 = vsyncadd (!%p500_p2), %s393_s4, 4294966784  ;;  %p13_p3 = scmp.ge.s32.totalorder %s656_s18, 18   ;;  %s771_s12 = smov %s595_s13 }
 0x1e3   : > { %s772_s13 = smov %s599_s14  ;;  %s773_s14 = smov %s667_s21 }
 0x1e4   : > { %s774_s15 = smov %s656_s18  ;;  %15 = sbr.rel (!%p13_p3) target bundleno = 3 (0x3), region = 67 }
 0x1eb   :  { %398 = vsyncpa [#allocation3], 1 }
 0x1ec   :  { %400 = vsyncpa [#allocation3 + $0x1], 1 }

// kernel: ocrnet_forward.18
= control target key start
LH: loop header
LB: loop body
LE: loop exit
PB: predicated region body
PF: predicated region fallthrough
CT: control target
= control target key end

     0   :  { %vm112_vm0 = vcmask 261120   ;;  %vm354_vm1 = vcmask 523264   ;;  %vm828_vm2 = vcmask 64512   ;;  %s1343_s2 = inlined_call_operand.vmem [shape: bf16[32,64], index: 2, kind: input, shape index: {}]   ;;  %s1344_s0 = inlined_call_operand.vmem [shape: bf16[128,32], index: 0, kind: input, shape index: {}]   ;;  %s1345_s5 = inlined_call_operand.vmem [shape: bf16[64,64], index: 5, kind: input, shape index: {}]   ;;  %s1346_s1 = inlined_call_operand.vmem [shape: bf16[128,64], index: 1, kind: input, shape index: {}]   ;;  %s1347_s4 = inlined_call_operand.vmem [shape: bf16[64,64], index: 4, kind: input, shape index: {}]   ;;  %s1348_s7 = inlined_call_operand.vmem [shape: bf16[64,8], index: 7, kind: input, shape index: {}]   ;;  %s1349_s3 = inlined_call_operand.vmem [shape: f32[1,64], index: 3, kind: input, shape index: {}]   ;;  %s1350_s6 = inlined_call_operand.vmem [shape: f32[1,64], index: 6, kind: input, shape index: {}]   ;;  %s1351_s8 = inlined_call_operand.vmem [shape: f32[1,8], index: 8, kind: input, shape index: {}]   ;;  %s1352_s9 = inlined_call_operand.vmem [shape: f32[128,8], index: 9, kind: output, shape index: {}]  }
   0x1   :  { %v1068_v0 = vld [vmem:[%s1343_s2] sm:$0xff]   ;;  %v1069_v1 = vld [vmem:[%s1343_s2 + $0x8] sm:$0xff]   ;;  %v1072_v4 = vld [vmem:[%s1344_s0 + $0x10] sm:$0xff]  }
   0x2   :  { %960 = vmatprep.subr.bf16.mxu0 %v1068_v0  ;;  %v1070_v2 = vld [vmem:[%s1344_s0] sm:$0xff]   ;;  %v1071_v3 = vld [vmem:[%s1344_s0 + $0x8] sm:$0xff]   ;;  %v1073_v7 = vld [vmem:[%s1344_s0 + $0x18] sm:$0xff]  }
   0x3   :  { %961 = vmatpush3.bf16.msra.mxu0 %v1068_v0  ;;  %964 = vmatprep.mubr.msk.bf16.mxu0 %vm112_vm0, %v1070_v2  ;;  %v1078_v5 = vld [vmem:[%s1345_s5] sm:$0xff]   ;;  %v1079_v6 = vld [vmem:[%s1345_s5 + $0x8] sm:$0xff]   ;;  %v1080_v8 = vld [vmem:[%s1345_s5 + $0x10] sm:$0xff]  }
   0x4   :  { %962 = vmatprep.subr.bf16.mxu0 %v1069_v1  ;;  %980 = vmatprep.subr.bf16.mxu1 %v1078_v5  ;;  %v1082_v9 = vld [vmem:[%s1346_s1] sm:$0xff]   ;;  %v1081_v11 = vld [vmem:[%s1345_s5 + $0x18] sm:$0xff]   ;;  %v1075_v12 = vld [vmem:[%s1344_s0 + $0x28] sm:$0xff]  }
   0x5   :  { %981 = vmatpush3.bf16.msra.mxu1 %v1078_v5  ;;  %v1074_v10 = vld [vmem:[%s1344_s0 + $0x20] sm:$0xff]   ;;  %988 = vmatprep.mubr.msk.bf16.mxu1 %vm354_vm1, %v1082_v9  ;;  %v1076_v13 = vld [vmem:[%s1344_s0 + $0x30] sm:$0xff]   ;;  %v1084_v15 = vld [vmem:[%s1346_s1 + $0x8] sm:$0xff]  }
   0x6   :  { %982 = vmatprep.subr.bf16.mxu1 %v1079_v6  ;;  %v1083_v14 = vld [vmem:[%s1347_s4] sm:$0xff]   ;;  %v1085_v16 = vld [vmem:[%s1346_s1 + $0x10] sm:$0xff]   ;;  %v1086_v17 = vld [vmem:[%s1347_s4 + $0x8] sm:$0xff]  }
   0x7   :  { %963 = vmatpush3.bf16.msra.mxu0 %v1069_v1  ;;  %v1077_v18 = vld [vmem:[%s1344_s0 + $0x38] sm:$0xff]   ;;  %v1089_v19 = vld [vmem:[%s1347_s4 + $0x10] sm:$0xff]   ;;  %v1088_v21 = vld [vmem:[%s1346_s1 + $0x20] sm:$0xff]  }
   0x8   :  { %v1087_v20 = vld [vmem:[%s1346_s1 + $0x18] sm:$0xff]   ;;  %v1090_v22 = vld [vmem:[%s1346_s1 + $0x28] sm:$0xff]   ;;  %v1091_v23 = vld [vmem:[%s1346_s1 + $0x30] sm:$0xff]  }
   0x9   :  { %983 = vmatpush3.bf16.msra.mxu1 %v1079_v6  ;;  %v1093_v24 = vld [vmem:[%s1346_s1 + $0x38] sm:$0xff]   ;;  %v1094_v26 = vld [vmem:[%s1348_s7] sm:$0xff]   ;;  %v1095_v27 = vld [vmem:[%s1348_s7 + $0x8] sm:$0xff]  }
   0xa   :  { %965 = vmatmul.mubr.msk.bf16.vlgmr.msra.gmra.mrb[0].mxu0 %vm112_vm0, %v1071_v3  ;;  %984 = vmatprep.subr.bf16.mxu1 %v1080_v8  ;;  %v1092_v25 = vld [vmem:[%s1347_s4 + $0x18] sm:$0xff]   ;;  %v1096_v28 = vld [vmem:[%s1348_s7 + $0x10] sm:$0xff]   ;;  %v849_v29 = vld [vmem:[%s1349_s3] ss:$0 sm:$0xff] }
   0xb   :  { %968 = vmatprep.mubr.msk.bf16.mxu0 %vm112_vm0, %v1072_v4  ;;  %1028 = vmatprep.subr.bf16.mxu0 %v1094_v26 }
   0xc   :  { %1029 = vmatpush3.bf16.msra.mxu0 %v1094_v26 }
   0xd   :  { %985 = vmatpush3.bf16.msra.mxu1 %v1080_v8  ;;  %1030 = vmatprep.subr.bf16.mxu0 %v1095_v27 }
   0xe   :  { %986 = vmatprep.subr.bf16.mxu1 %v1081_v11 }
  0x10   :  { %1031 = vmatpush3.bf16.msra.mxu0 %v1095_v27 }
  0x11   :  { %987 = vmatpush3.bf16.msra.mxu1 %v1081_v11  ;;  %1032 = vmatprep.subr.bf16.mxu0 %v1096_v28 }
  0x12   :  { %969 = vmatmul.mubr.msk.bf16.gmra.mrb[4].mxu0 %vm112_vm0, %v1073_v7  ;;  %1004 = vmatprep.subr.bf16.mxu1 %v1083_v14 }
  0x13   :  { %972 = vmatprep.mubr.msk.bf16.mxu0 %vm112_vm0, %v1074_v10 }
  0x14   :  { %989 = vmatmul.mubr.msk.bf16.vlgmr.msra.gmra.mrb[0].mxu1 %vm354_vm1, %v1084_v15  ;;  %1033 = vmatpush3.bf16.msra.mxu0 %v1096_v28 }
  0x15   :  { %1005 = vmatpush3.bf16.msra.mxu1 %v1083_v14  ;;  %992 = vmatprep.mubr.msk.bf16.mxu1 %vm354_vm1, %v1085_v16 }
  0x16   :  { %1006 = vmatprep.subr.bf16.mxu1 %v1086_v17 }
  0x19   :  { %1007 = vmatpush3.bf16.msra.mxu1 %v1086_v17 }
  0x1a   :  { %973 = vmatmul.mubr.msk.bf16.gmra.mrb[8].mxu0 %vm112_vm0, %v1075_v12  ;;  %1008 = vmatprep.subr.bf16.mxu1 %v1089_v19 }
  0x1b   :  { %976 = vmatprep.mubr.msk.bf16.mxu0 %vm112_vm0, %v1076_v13 }
  0x1c   :  { %993 = vmatmul.mubr.msk.bf16.gmra.mrb[4].mxu1 %vm354_vm1, %v1087_v20 }
  0x1d   :  { %996 = vmatprep.mubr.msk.bf16.mxu1 %vm354_vm1, %v1088_v21  ;;  %1009 = vmatpush3.bf16.msra.mxu1 %v1089_v19 }
  0x1e   :  { %1010 = vmatprep.subr.bf16.mxu1 %v1092_v25 }
  0x21   :  { %1011 = vmatpush3.bf16.msra.mxu1 %v1092_v25 }
  0x22   :  { %977 = vmatmul.mubr.msk.bf16.gmra.mrb[12].mxu0 %vm112_vm0, %v1077_v18 }
  0x24   :  { %997 = vmatmul.mubr.msk.bf16.gmra.mrb[8].mxu1 %vm354_vm1, %v1090_v22  ;;  %v1097_v22 = vld [vmem:[%s1348_s7 + $0x18] sm:$0xff]  }
  0x25   :  { %1000 = vmatprep.mubr.msk.bf16.mxu1 %vm354_vm1, %v1091_v23  ;;  %1034 = vmatprep.subr.bf16.mxu0 %v1097_v22  ;;  %v900_v23 = vld [vmem:[%s1350_s6] ss:$0 sm:$0xff] }
  0x26   :  { %1035 = vmatpush3.bf16.msra.mxu0 %v1097_v22 }
  0x2c   :  { %1001 = vmatmul.mubr.msk.bf16.gmra.mrb[12].mxu1 %vm354_vm1, %v1093_v24 }
  0xdd   :  { %v966_v30 = vpop.f32.mrb[0].mxu0 }
  0xde   :  { %v180_v31 = vadd.f32 %v966_v30, %v849_v29  ;;  %v171_v32 = vpop.f32.mrb[1].mxu0 }
  0xdf   :  { %v172_v33 = vadd.f32 %v849_v29, %v171_v32  ;;  %v967_v34 = vpop.f32.mrb[2].mxu0 }
  0xe0   :  { %v183_v35 = vadd.f32 %v967_v34, %v849_v29  ;;  %v174_v36 = vpop.f32.mrb[3].mxu0  ;;  %v236_v38 = vmax.f32 %v180_v31, 0.0 }
  0xe1   :  { %v175_v37 = vadd.f32 %v849_v29, %v174_v36  ;;  %v234_v40 = vmax.f32 %v172_v33, 0.0 }
  0xe2   :  { %v237_v39 = vmax.f32 %v183_v35, 0.0 }
  0xe3   :  { %v235_v41 = vmax.f32 %v175_v37, 0.0 }
  0xe4   :  { %v251_v42 = vpack.c.bf16 %v237_v39, %v236_v38 }
  0xe5   :  { %v250_v43 = vpack.c.bf16 %v235_v41, %v234_v40  ;;  %v970_v44 = vpop.f32.mrb[4].mxu0 }
  0xe6   :  { %v196_v45 = vadd.f32 %v970_v44, %v849_v29  ;;  %v187_v46 = vpop.f32.mrb[5].mxu0 }
  0xe7   :  { %v188_v47 = vadd.f32 %v849_v29, %v187_v46  ;;  %v971_v48 = vpop.f32.mrb[6].mxu0  ;;  %1012 = vmatprep.mubr.msk.bf16.mxu1 %vm354_vm1, %v250_v43 }
  0xe8   :  { %v199_v49 = vadd.f32 %v971_v48, %v849_v29  ;;  %v190_v50 = vpop.f32.mrb[7].mxu0  ;;  %1013 = vmatmul.mubr.msk.bf16.vlgmr.msra.gmra.mrb[0].mxu1 %vm354_vm1, %v251_v42  ;;  %v240_v52 = vmax.f32 %v196_v45, 0.0 }
  0xe9   :  { %v191_v51 = vadd.f32 %v849_v29, %v190_v50  ;;  %v238_v54 = vmax.f32 %v188_v47, 0.0 }
  0xea   :  { %v241_v53 = vmax.f32 %v199_v49, 0.0 }
  0xeb   :  { %v239_v55 = vmax.f32 %v191_v51, 0.0 }
  0xec   :  { %v253_v56 = vpack.c.bf16 %v241_v53, %v240_v52 }
  0xed   :  { %v252_v57 = vpack.c.bf16 %v239_v55, %v238_v54  ;;  %v974_v58 = vpop.f32.mrb[8].mxu0 }
  0xee   :  { %v212_v59 = vadd.f32 %v974_v58, %v849_v29  ;;  %v203_v60 = vpop.f32.mrb[9].mxu0 }
  0xef   :  { %v204_v61 = vadd.f32 %v849_v29, %v203_v60  ;;  %v975_v62 = vpop.f32.mrb[10].mxu0  ;;  %1016 = vmatprep.mubr.msk.bf16.mxu1 %vm354_vm1, %v252_v57 }
  0xf0   :  { %v215_v63 = vadd.f32 %v975_v62, %v849_v29  ;;  %v206_v0 = vpop.f32.mrb[11].mxu0  ;;  %1017 = vmatmul.mubr.msk.bf16.gmra.mrb[4].mxu1 %vm354_vm1, %v253_v56  ;;  %v244_v2 = vmax.f32 %v212_v59, 0.0 }
  0xf1   :  { %v207_v1 = vadd.f32 %v849_v29, %v206_v0  ;;  %v242_v4 = vmax.f32 %v204_v61, 0.0 }
  0xf2   :  { %v245_v3 = vmax.f32 %v215_v63, 0.0 }
  0xf3   :  { %v243_v5 = vmax.f32 %v207_v1, 0.0 }
  0xf4   :  { %v255_v6 = vpack.c.bf16 %v245_v3, %v244_v2 }
  0xf5   :  { %v254_v7 = vpack.c.bf16 %v243_v5, %v242_v4  ;;  %v978_v8 = vpop.f32.mrb[12].mxu0 }
  0xf6   :  { %v228_v9 = vadd.f32 %v978_v8, %v849_v29  ;;  %v219_v10 = vpop.f32.mrb[13].mxu0 }
  0xf7   :  { %v220_v11 = vadd.f32 %v849_v29, %v219_v10  ;;  %v979_v12 = vpop.f32.mrb[14].mxu0  ;;  %1020 = vmatprep.mubr.msk.bf16.mxu1 %vm354_vm1, %v254_v7 }
  0xf8   :  { %v231_v13 = vadd.f32 %v979_v12, %v849_v29  ;;  %v222_v14 = vpop.f32.mrb[15].mxu0  ;;  %1021 = vmatmul.mubr.msk.bf16.gmra.mrb[8].mxu1 %vm354_vm1, %v255_v6  ;;  %v248_v16 = vmax.f32 %v228_v9, 0.0 }
  0xf9   :  { %v223_v15 = vadd.f32 %v849_v29, %v222_v14  ;;  %v246_v18 = vmax.f32 %v220_v11, 0.0 }
  0xfa   :  { %v249_v17 = vmax.f32 %v231_v13, 0.0 }
  0xfb   :  { %v247_v19 = vmax.f32 %v223_v15, 0.0 }
  0xfc   :  { %v257_v20 = vpack.c.bf16 %v249_v17, %v248_v16  ;;  %v901_v16 = vld [vmem:[%s1351_s8] ss:$0 sm:$0xff] }
  0xfd   :  { %v256_v21 = vpack.c.bf16 %v247_v19, %v246_v18 }
  0xff   :  { %1024 = vmatprep.mubr.msk.bf16.mxu1 %vm354_vm1, %v256_v21 }
 0x100   :  { %1025 = vmatmul.mubr.msk.bf16.gmra.mrb[12].mxu1 %vm354_vm1, %v257_v20 }
 0x1bb   :  { %v1014_v24 = vpop.f32.mrb[0].mxu1 }
 0x1bc   :  { %v630_v25 = vadd.f32 %v1014_v24, %v900_v23  ;;  %v558_v26 = vpop.f32.mrb[1].mxu1 }
 0x1bd   :  { %v628_v27 = vadd.f32 %v900_v23, %v558_v26  ;;  %v1015_v28 = vpop.f32.mrb[2].mxu1 }
 0x1be   :  { %v631_v29 = vadd.f32 %v1015_v28, %v900_v23  ;;  %v561_v30 = vpop.f32.mrb[3].mxu1  ;;  %v646_v32 = vmax.f32 %v630_v25, 0.0 }
 0x1bf   :  { %v629_v31 = vadd.f32 %v900_v23, %v561_v30  ;;  %v644_v34 = vmax.f32 %v628_v27, 0.0 }
 0x1c0   :  { %v647_v33 = vmax.f32 %v631_v29, 0.0 }
 0x1c1   :  { %v645_v35 = vmax.f32 %v629_v31, 0.0 }
 0x1c2   :  { %v661_v36 = vpack.c.bf16 %v647_v33, %v646_v32 }
 0x1c3   :  { %v660_v37 = vpack.c.bf16 %v645_v35, %v644_v34  ;;  %v1018_v38 = vpop.f32.mrb[4].mxu1 }
 0x1c4   :  { %v634_v39 = vadd.f32 %v1018_v38, %v900_v23  ;;  %v574_v40 = vpop.f32.mrb[5].mxu1 }
 0x1c5   :  { %v632_v41 = vadd.f32 %v900_v23, %v574_v40  ;;  %v1019_v42 = vpop.f32.mrb[6].mxu1  ;;  %1036 = vmatprep.mubr.msk.bf16.mxu0 %vm354_vm1, %v660_v37 }
 0x1c6   :  { %v635_v43 = vadd.f32 %v1019_v42, %v900_v23  ;;  %v577_v44 = vpop.f32.mrb[7].mxu1  ;;  %1037 = vmatmul.mubr.msk.bf16.vlgmr.msra.gmra.mrb[16].mxu0 %vm354_vm1, %v661_v36  ;;  %v650_v46 = vmax.f32 %v634_v39, 0.0 }
 0x1c7   :  { %v633_v45 = vadd.f32 %v900_v23, %v577_v44  ;;  %v648_v48 = vmax.f32 %v632_v41, 0.0 }
 0x1c8   :  { %v651_v47 = vmax.f32 %v635_v43, 0.0 }
 0x1c9   :  { %v649_v49 = vmax.f32 %v633_v45, 0.0 }
 0x1ca   :  { %v663_v50 = vpack.c.bf16 %v651_v47, %v650_v46 }
 0x1cb   :  { %v662_v51 = vpack.c.bf16 %v649_v49, %v648_v48  ;;  %v1022_v52 = vpop.f32.mrb[8].mxu1 }
 0x1cc   :  { %v638_v53 = vadd.f32 %v1022_v52, %v900_v23  ;;  %v590_v54 = vpop.f32.mrb[9].mxu1 }
 0x1cd   :  { %v636_v55 = vadd.f32 %v900_v23, %v590_v54  ;;  %v1023_v56 = vpop.f32.mrb[10].mxu1  ;;  %1040 = vmatprep.mubr.msk.bf16.mxu0 %vm354_vm1, %v662_v51 }
 0x1ce   :  { %v639_v57 = vadd.f32 %v1023_v56, %v900_v23  ;;  %v593_v58 = vpop.f32.mrb[11].mxu1  ;;  %1041 = vmatmul.mubr.msk.bf16.gmra.mrb[20].mxu0 %vm354_vm1, %v663_v50  ;;  %v654_v60 = vmax.f32 %v638_v53, 0.0 }
 0x1cf   :  { %v637_v59 = vadd.f32 %v900_v23, %v593_v58  ;;  %v652_v62 = vmax.f32 %v636_v55, 0.0 }
 0x1d0   :  { %v655_v61 = vmax.f32 %v639_v57, 0.0 }
 0x1d1   :  { %v653_v63 = vmax.f32 %v637_v59, 0.0 }
 0x1d2   :  { %v665_v0 = vpack.c.bf16 %v655_v61, %v654_v60 }
 0x1d3   :  { %v664_v1 = vpack.c.bf16 %v653_v63, %v652_v62  ;;  %v1026_v2 = vpop.f32.mrb[12].mxu1 }
 0x1d4   :  { %v642_v3 = vadd.f32 %v1026_v2, %v900_v23  ;;  %v606_v4 = vpop.f32.mrb[13].mxu1 }
 0x1d5   :  { %v640_v5 = vadd.f32 %v900_v23, %v606_v4  ;;  %v1027_v6 = vpop.f32.mrb[14].mxu1  ;;  %1044 = vmatprep.mubr.msk.bf16.mxu0 %vm354_vm1, %v664_v1 }
 0x1d6   :  { %v643_v7 = vadd.f32 %v1027_v6, %v900_v23  ;;  %v609_v8 = vpop.f32.mrb[15].mxu1  ;;  %1045 = vmatmul.mubr.msk.bf16.gmra.mrb[24].mxu0 %vm354_vm1, %v665_v0  ;;  %v658_v10 = vmax.f32 %v642_v3, 0.0 }
 0x1d7   :  { %v641_v9 = vadd.f32 %v900_v23, %v609_v8  ;;  %v656_v12 = vmax.f32 %v640_v5, 0.0 }
 0x1d8   :  { %v659_v11 = vmax.f32 %v643_v7, 0.0 }
 0x1d9   :  { %v657_v13 = vmax.f32 %v641_v9, 0.0 }
 0x1da   :  { %v667_v14 = vpack.c.bf16 %v659_v11, %v658_v10 }
 0x1db   :  { %v666_v15 = vpack.c.bf16 %v657_v13, %v656_v12 }
 0x1dd   :  { %1048 = vmatprep.mubr.msk.bf16.mxu0 %vm354_vm1, %v666_v15 }
 0x1de   :  { %1049 = vmatmul.mubr.msk.bf16.gmra.mrb[28].mxu0 %vm354_vm1, %v667_v14 }
 0x299   :  { %v1038_v17 = vpop.f32.mrb[16].mxu0 }
 0x29a   :  { %v774_v18 = vadd.f32 %v1038_v17, %v901_v16  ;;  %v765_v19 = vpop.f32.mrb[17].mxu0 }
 0x29b   :  { %v766_v20 = vadd.f32 %v901_v16, %v765_v19  ;;  %v1039_v21 = vpop.f32.mrb[18].mxu0 }
 0x29c   :  { %831 = vst.msk [vmem:[%s1352_s9 + $0x10] sm:$0xff] %vm828_vm2, %v774_v18  ;;  %v777_v22 = vadd.f32 %v1039_v21, %v901_v16  ;;  %v768_v23 = vpop.f32.mrb[19].mxu0 }
 0x29d   :  { %829 = vst.msk [vmem:[%s1352_s9] sm:$0xff] %vm828_vm2, %v766_v20  ;;  %v769_v24 = vadd.f32 %v901_v16, %v768_v23 }
 0x29e   :  { %832 = vst.msk [vmem:[%s1352_s9 + $0x18] sm:$0xff] %vm828_vm2, %v777_v22 }
 0x29f   :  { %830 = vst.msk [vmem:[%s1352_s9 + $0x8] sm:$0xff] %vm828_vm2, %v769_v24 }
 0x2a1   :  { %v1042_v25 = vpop.f32.mrb[20].mxu0 }
 0x2a2   :  { %v790_v26 = vadd.f32 %v1042_v25, %v901_v16  ;;  %v781_v27 = vpop.f32.mrb[21].mxu0 }
 0x2a3   :  { %v782_v28 = vadd.f32 %v901_v16, %v781_v27  ;;  %v1043_v29 = vpop.f32.mrb[22].mxu0 }
 0x2a4   :  { %835 = vst.msk [vmem:[%s1352_s9 + $0x30] sm:$0xff] %vm828_vm2, %v790_v26  ;;  %v793_v30 = vadd.f32 %v1043_v29, %v901_v16  ;;  %v784_v31 = vpop.f32.mrb[23].mxu0 }
 0x2a5   :  { %833 = vst.msk [vmem:[%s1352_s9 + $0x20] sm:$0xff] %vm828_vm2, %v782_v28  ;;  %v785_v32 = vadd.f32 %v901_v16, %v784_v31 }
 0x2a6   :  { %836 = vst.msk [vmem:[%s1352_s9 + $0x38] sm:$0xff] %vm828_vm2, %v793_v30 }
 0x2a7   :  { %834 = vst.msk [vmem:[%s1352_s9 + $0x28] sm:$0xff] %vm828_vm2, %v785_v32 }
 0x2a9   :  { %v1046_v33 = vpop.f32.mrb[24].mxu0 }
 0x2aa   :  { %v806_v34 = vadd.f32 %v1046_v33, %v901_v16  ;;  %v797_v35 = vpop.f32.mrb[25].mxu0 }
 0x2ab   :  { %v798_v36 = vadd.f32 %v901_v16, %v797_v35  ;;  %v1047_v37 = vpop.f32.mrb[26].mxu0 }
 0x2ac   :  { %839 = vst.msk [vmem:[%s1352_s9 + $0x50] sm:$0xff] %vm828_vm2, %v806_v34  ;;  %v809_v38 = vadd.f32 %v1047_v37, %v901_v16  ;;  %v800_v39 = vpop.f32.mrb[27].mxu0 }
 0x2ad   :  { %837 = vst.msk [vmem:[%s1352_s9 + $0x40] sm:$0xff] %vm828_vm2, %v798_v36  ;;  %v801_v40 = vadd.f32 %v901_v16, %v800_v39 }
 0x2ae   :  { %840 = vst.msk [vmem:[%s1352_s9 + $0x58] sm:$0xff] %vm828_vm2, %v809_v38 }
 0x2af   :  { %838 = vst.msk [vmem:[%s1352_s9 + $0x48] sm:$0xff] %vm828_vm2, %v801_v40 }
 0x2b1   :  { %v1050_v41 = vpop.f32.mrb[28].mxu0 }
 0x2b2   :  { %v822_v42 = vadd.f32 %v1050_v41, %v901_v16  ;;  %v813_v43 = vpop.f32.mrb[29].mxu0 }
 0x2b3   :  { %v814_v44 = vadd.f32 %v901_v16, %v813_v43  ;;  %v1051_v45 = vpop.f32.mrb[30].mxu0 }
 0x2b4   :  { %843 = vst.msk [vmem:[%s1352_s9 + $0x70] sm:$0xff] %vm828_vm2, %v822_v42  ;;  %v825_v46 = vadd.f32 %v1051_v45, %v901_v16  ;;  %v816_v47 = vpop.f32.mrb[31].mxu0 }
 0x2b5   :  { %841 = vst.msk [vmem:[%s1352_s9 + $0x60] sm:$0xff] %vm828_vm2, %v814_v44  ;;  %v817_v48 = vadd.f32 %v901_v16, %v816_v47 }
 0x2b6   :  { %844 = vst.msk [vmem:[%s1352_s9 + $0x78] sm:$0xff] %vm828_vm2, %v825_v46 }
 0x2b7   :  { %842 = vst.msk [vmem:[%s1352_s9 + $0x68] sm:$0xff] %vm828_vm2, %v817_v48 }

</bundles_post_ra>
